<compile_context>
chip_gen: v7x
topology: tpu7x:2x2x1
jax: 0.10.0
libtpu: 0.0.40
codegen_flags: <defaults>
</compile_context>

<pallas_src>
import functools

import jax
import jax.numpy as jnp
import numpy as np
from jax import lax
from jax.experimental import pallas as pl
from jax.experimental.pallas import tpu as pltpu


def _leaky_relu(x):
    # nn.LeakyReLU(0.2)
    return jnp.where(x > 0, x, 0.2 * x)


def _round_up(x, m):
    return ((x + m - 1) // m) * m


def encdec_kernel(emb_ref, feat_ref, w_ref, b_ref,
                  loss_ref, acc_ref,
                  enc_buf, gi_buf,
                  *, B, E, T):
    """Padded shapes:
       emb_ref  (T*Bp, Ep)   bf16   time-major token embeddings
       feat_ref (Bp, Ep)     f32    features (initial encoder hidden)
       w_ref    (5, Ep, 3Ep) bf16   [wi_enc, wh_enc, wi_dec, wh_dec, [lin|lin1|lin2]]
       b_ref    (8, 3Ep)     f32    row0=bgi_enc, row1=bgi_dec,
                                    row2=[bhn_enc|bhn_dec|b_lin], row3=[b_lin1|b_lin2|0]
    """
    Bp, Ep = feat_ref.shape
    f32 = jnp.float32
    bf16 = jnp.bfloat16
    E2 = 2 * Ep

    feat = feat_ref[...]

    # ---- weights / biases: loaded & broadcast ONCE (hoisted out of loops) ---
    wi_e = w_ref[0]
    wh_e = w_ref[1]
    wi_d = w_ref[2]
    wh_d = w_ref[3]
    lin_all = w_ref[4]                       # (Ep, 3Ep): [wlin | wlin1 | wlin2]
    wlin = lin_all[:, 0:Ep]
    wlin1 = lin_all[:, Ep:E2]
    wlin2 = lin_all[:, E2:]

    bgi_e = b_ref[0:1, :]                    # (1, 3Ep) folded bi+bh (r,z), bi (n)
    bgi_d = b_ref[1:2, :]
    bhn_e = jnp.broadcast_to(b_ref[2:3, 0:Ep], (Bp, Ep))
    bhn_d = jnp.broadcast_to(b_ref[2:3, Ep:E2], (Bp, Ep))
    blin = b_ref[2:3, E2:]
    blin1 = b_ref[3:4, 0:Ep]
    blin2 = b_ref[3:4, Ep:E2]

    # ---- hoisted encoder input-side gates: one MXU-friendly matmul ----------
    gi_buf[...] = (
        jnp.dot(emb_ref[...], wi_e, preferred_element_type=f32) + bgi_e)

    def gru_step(gi, h, wh, bhn_b):
        # Single stacked recurrent matmul per step: (Bp,Ep) @ (Ep,3Ep).
        gh = jnp.dot(h.astype(bf16), wh, preferred_element_type=f32)
        # Fused r/z sigmoid over one 2*Ep slab.
        rz = jax.nn.sigmoid(gi[:, 0:E2] + gh[:, 0:E2])
        r = rz[:, 0:Ep]
        z = rz[:, Ep:E2]
        # PyTorch GRU: n = tanh(W_in x + b_in + r * (W_hn h + b_hn))
        n = jnp.tanh(gi[:, E2:] + r * (gh[:, E2:] + bhn_b))
        # (1-z)*n + z*h  ==  n + z*(h - n)   (one fewer multiply)
        return n + z * (h - n)

    # ---- encoder recurrence (serial; hidden initialized with features) ------
    def enc_body(g, h):
        off = pl.multiple_of(g * Bp, Bp)
        h_new = gru_step(gi_buf[pl.ds(off, Bp), :], h, wh_e, bhn_e)
        enc_buf[pl.ds(off, Bp), :] = h_new
        return h_new

    h_enc = lax.fori_loop(0, T, enc_body, feat, unroll=True)

    # gru_hiddens_2 = LeakyReLU(linear1(final encoder hidden))
    h2_0 = _leaky_relu(
        jnp.dot(h_enc.astype(bf16), wlin1, preferred_element_type=f32) + blin1)

    # ---- hoisted decoder input projection + input-side gates (batched) ------
    x_all = _leaky_relu(
        jnp.dot(enc_buf[...].astype(bf16), wlin, preferred_element_type=f32)
        + blin)
    gi_buf[...] = (
        jnp.dot(x_all.astype(bf16), wi_d, preferred_element_type=f32) + bgi_d)

    # ---- decoder recurrence, accumulating outputs ----------------------------
    def dec_body(g, carry):
        h, info_sum = carry
        off = pl.multiple_of(g * Bp, Bp)
        h_new = gru_step(gi_buf[pl.ds(off, Bp), :], h, wh_d, bhn_d)
        return (h_new, info_sum + h_new)

    _, info = lax.fori_loop(0, T, dec_body,
                            (h2_0, jnp.zeros((Bp, Ep), f32)), unroll=True)
    info = info * (1.0 / T)
    info = _leaky_relu(
        jnp.dot(info.astype(bf16), wlin2, preferred_element_type=f32) + blin2)

    # ---- Loss = EPE with torch broadcast: diff[i,j,e] = feat[j,e]-info[i,e].
    # Algebraic expansion over j (padded feat rows/cols are zero so they drop):
    #   sum_j (f_j - x)^2 = sum_j f_j^2 - 2*x*sum_j f_j + B*x^2
    # NOTE: clamped at 0; at realistic scales a direct (f-x)^2 j-loop is more
    # accurate if tighter tolerance is ever needed.
    row_mask = (lax.broadcasted_iota(jnp.int32, (Bp, 1), 0) < B).astype(f32)
    s1 = jnp.sum(feat, axis=0, keepdims=True)              # (1, Ep)
    s2 = jnp.sum(feat * feat, axis=0, keepdims=True)       # (1, Ep)
    epe_sq = s2 - 2.0 * info * s1 + float(B) * info * info
    epe = jnp.sqrt(jnp.maximum(epe_sq, 0.0)) * row_mask    # mask padded rows
    loss_ref[0, 0] = jnp.sum(epe) / (B * E)

    # ---- acc = (1/B) * sum_b cosine(features[b], info[b]) (F.normalize eps) --
    eps = 1e-12
    f_inv = lax.rsqrt(jnp.maximum(
        jnp.sum(feat * feat, axis=1, keepdims=True), eps * eps))
    i_inv = lax.rsqrt(jnp.maximum(
        jnp.sum(info * info, axis=1, keepdims=True), eps * eps))
    cos = jnp.sum(feat * info, axis=1, keepdims=True) * f_inv * i_inv
    acc_ref[0, 0] = jnp.sum(cos * row_mask) / B


def _pad2(x, rows, cols):
    return jnp.pad(x, ((0, rows - x.shape[0]), (0, cols - x.shape[1])))


def _stack_gate_w(w3, Ep):
    # (3, E, E) -> (Ep, 3*Ep), per-gate zero padding so splits are lane-aligned.
    return jnp.concatenate([_pad2(w3[k], Ep, Ep) for k in range(3)], axis=1)


def encdec_forward(features, gen_captions, p):
    """features: (B, E) f32, gen_captions: (B, T) int32 -> (Loss scalar, acc (1,1))."""
    B, E = features.shape
    T = gen_captions.shape[1]
    Bp = _round_up(max(B, 8), 8)      # sublane-dense batch
    Ep = _round_up(E, 128)            # lane-dense embed

    # Embedding gather + time-major layout + padding (wrapper glue).
    # TODO(synk): for non-toy vocab/T, move this gather in-kernel via
    # PrefetchScalarGridSpec scalar-prefetched caption ids + manual DMA, stream
    # emb/gi over a T-chunk grid (weights resident), and add a batch-parallel
    # leading grid axis so both v7x TensorCores are used within 64 MiB VMEM.
    emb = jnp.transpose(p["embed"][gen_captions], (1, 0, 2))     # (T, B, E)
    emb = jnp.pad(emb, ((0, 0), (0, Bp - B), (0, Ep - E)))
    emb_flat = emb.reshape(T * Bp, Ep).astype(jnp.bfloat16)      # (T*Bp, Ep)

    feat_p = _pad2(features, Bp, Ep).astype(jnp.float32)

    # ---- coalesced bf16 weight slab: (5, Ep, 3Ep) ----------------------------
    lin_slab = jnp.concatenate([_pad2(p["w_lin"], Ep, Ep),
                                _pad2(p["w_lin1"], Ep, Ep),
                                _pad2(p["w_lin2"], Ep, Ep)], axis=1)
    w_all = jnp.stack([_stack_gate_w(p["wi_enc"], Ep),
                       _stack_gate_w(p["wh_enc"], Ep),
                       _stack_gate_w(p["wi_dec"], Ep),
                       _stack_gate_w(p["wh_dec"], Ep),
                       lin_slab], axis=0).astype(jnp.bfloat16)

    # ---- coalesced f32 bias slab: (8, 3Ep) -----------------------------------
    def gate_bias_rows(bi, bh):
        # Fold loop-invariant biases: b_i + b_h for r,z; b_i only for n
        # (b_hn must stay inside r*(...)).
        bgi = jnp.concatenate([_pad2(bi[0] + bh[0], 1, Ep),
                               _pad2(bi[1] + bh[1], 1, Ep),
                               _pad2(bi[2], 1, Ep)], axis=1)     # (1, 3Ep)
        bhn = _pad2(bh[2], 1, Ep)                                # (1, Ep)
        return bgi, bhn

    bgi_e, bhn_e = gate_bias_rows(p["bi_enc"], p["bh_enc"])
    bgi_d, bhn_d = gate_bias_rows(p["bi_dec"], p["bh_dec"])
    row2 = jnp.concatenate([bhn_e, bhn_d, _pad2(p["b_lin"], 1, Ep)], axis=1)
    row3 = jnp.concatenate([_pad2(p["b_lin1"], 1, Ep),
                            _pad2(p["b_lin2"], 1, Ep),
                            jnp.zeros((1, Ep), jnp.float32)], axis=1)
    b_all = jnp.concatenate(
        [bgi_e, bgi_d, row2, row3, jnp.zeros((4, 3 * Ep), jnp.float32)],
        axis=0).astype(jnp.float32)

    inputs = (emb_flat, feat_p, w_all, b_all)

    # Advisory cost: the two hoisted GI matmuls + decoder projection + 2T serial
    # recurrent matmuls + 2 linears; sigmoids/tanh/sqrt as transcendentals.
    TB = T * Bp
    flops = int(2 * 2 * TB * Ep * (3 * Ep)          # enc + dec hoisted GI
                + 2 * TB * Ep * Ep                   # decoder input projection
                + 2 * (2 * T) * Bp * Ep * (3 * Ep)   # serial recurrent matmuls
                + 2 * 2 * Bp * Ep * Ep)              # linear1 + linear2
    transc = int((2 * T) * 3 * Bp * Ep + Bp * Ep + 2 * Bp)
    bytes_acc = int(emb_flat.size * 2 + feat_p.size * 4
                    + w_all.size * 2 + b_all.size * 4 + 2 * 4)

    kernel = functools.partial(encdec_kernel, B=B, E=E, T=T)

    loss, acc = pl.pallas_call(
        kernel,
        out_shape=(jax.ShapeDtypeStruct((1, 1), jnp.float32),
                   jax.ShapeDtypeStruct((1, 1), jnp.float32)),
        in_specs=[pl.BlockSpec(memory_space=pltpu.MemorySpace.VMEM)] * len(inputs),
        out_specs=(pl.BlockSpec(memory_space=pltpu.MemorySpace.SMEM),
                   pl.BlockSpec(memory_space=pltpu.MemorySpace.SMEM)),
        scratch_shapes=[pltpu.VMEM((T * Bp, Ep), jnp.float32),       # encoder outs
                        pltpu.VMEM((T * Bp, 3 * Ep), jnp.float32)],  # GI gates (reused)
        compiler_params=pltpu.CompilerParams(vmem_limit_bytes=4 * 1024 * 1024),
        cost_estimate=pl.CostEstimate(flops=flops, transcendentals=transc,
                                      bytes_accessed=bytes_acc),
    )(*inputs)
    return loss[0, 0], acc


def init_params(key, vocab_size, embed_size):
    E = embed_size
    ks = jax.random.split(key, 15)
    g = lambda k, shape, s: s * jax.random.normal(k, shape, jnp.float32)
    return dict(
        embed=g(ks[0], (vocab_size, E), 0.5),
        wi_enc=g(ks[1], (3, E, E), 0.2), wh_enc=g(ks[2], (3, E, E), 0.2),
        bi_enc=g(ks[3], (3, 1, E), 0.1), bh_enc=g(ks[4], (3, 1, E), 0.1),
        wi_dec=g(ks[5], (3, E, E), 0.2), wh_dec=g(ks[6], (3, E, E), 0.2),
        bi_dec=g(ks[7], (3, 1, E), 0.1), bh_dec=g(ks[8], (3, 1, E), 0.1),
        w_lin=g(ks[9], (E, E), 0.2),  b_lin=g(ks[10], (1, E), 0.1),
        w_lin1=g(ks[11], (E, E), 0.2), b_lin1=g(ks[12], (1, E), 0.1),
        w_lin2=g(ks[13], (E, E), 0.2), b_lin2=g(ks[14], (1, E), 0.1),
    )


def encdec_reference(features, gen_captions, p):
    """Pure-JAX f32 mirror of the PyTorch forward (for correctness checking)."""
    B, E = features.shape
    T = gen_captions.shape[1]
    lrelu = lambda x: jnp.where(x > 0, x, 0.2 * x)

    def gru_step(x, h, wi, wh, bi, bh):
        r = jax.nn.sigmoid(x @ wi[0] + bi[0] + h @ wh[0] + bh[0])
        z = jax.nn.sigmoid(x @ wi[1] + bi[1] + h @ wh[1] + bh[1])
        n = jnp.tanh(x @ wi[2] + bi[2] + r * (h @ wh[2] + bh[2]))
        return (1.0 - z) * n + z * h

    emb = p["embed"][gen_captions]                        # (B, T, E)
    h = features
    encoded = []
    for g in range(T):
        h = gru_step(emb[:, g, :], h, p["wi_enc"], p["wh_enc"], p["bi_enc"], p["bh_enc"])
        encoded.append(h)
    h2 = lrelu(h @ p["w_lin1"] + p["b_lin1"])
    info = jnp.zeros((B, E), jnp.float32)
    for g in range(T):
        x = lrelu(encoded[g] @ p["w_lin"] + p["b_lin"])
        h2 = gru_step(x, h2, p["wi_dec"], p["wh_dec"], p["bi_dec"], p["bh_dec"])
        info = info + h2
    info = info / T
    info = lrelu(info @ p["w_lin2"] + p["b_lin2"])
    diff = features[None, :, :] - info[:, None, :]        # (B, B, E) torch broadcast
    epe = jnp.sqrt(jnp.sum(diff * diff, axis=1))          # (B, E)
    loss = jnp.mean(epe)
    eps = 1e-12
    f_n = features / jnp.maximum(jnp.linalg.norm(features, axis=1, keepdims=True), eps)
    i_n = info / jnp.maximum(jnp.linalg.norm(info, axis=1, keepdims=True), eps)
    acc = jnp.sum(f_n * i_n) / B
    return loss, jnp.reshape(acc, (1, 1))


if __name__ == "__main__":
    B, T, E, V = 2, 8, 32, 50
    key = jax.random.PRNGKey(0)
    k_feat, k_cap, k_par = jax.random.split(key, 3)
    features = jax.random.normal(k_feat, (B, E), jnp.float32)
    gen_captions = jax.random.randint(k_cap, (B, T), 0, V, jnp.int32)
    params = init_params(k_par, V, E)

    loss, acc = encdec_forward(features, gen_captions, params)
    jax.block_until_ready((loss, acc))

    loss_ref, acc_ref = encdec_reference(features, gen_captions, params)
    # bf16 weights/emb in the kernel vs pure-f32 reference -> allow ~ bf16 drift.
    np.testing.assert_allclose(np.array(loss), np.array(loss_ref), rtol=5e-2, atol=5e-2)
    np.testing.assert_allclose(np.array(acc), np.array(acc_ref), rtol=5e-2, atol=5e-2)
    print("KERNEL_OK")
</pallas_src>

<mosaic_0001>
module attributes {stable_mosaic.version = 11 : i64} {
  func.func @encdec_kernel(%arg0: memref<64x128xbf16, #tpu.memory_space<vmem>>, %arg1: memref<8x128xf32, #tpu.memory_space<vmem>>, %arg2: memref<5x128x384xbf16, #tpu.memory_space<vmem>>, %arg3: memref<8x384xf32, #tpu.memory_space<vmem>>, %arg4: memref<1x1xf32, #tpu.memory_space<smem>>, %arg5: memref<1x1xf32, #tpu.memory_space<smem>>, %arg6: memref<64x128xf32, #tpu.memory_space<vmem>>, %arg7: memref<64x384xf32, #tpu.memory_space<vmem>>) attributes {dimension_semantics = [], scalar_prefetch = 0 : i64, scratch_operands = 2 : i64, tpu.core_type = #tpu.core_type<tc>} {
    %c0 = arith.constant 0 : index
    %c0_0 = arith.constant 0 : index
    %0 = vector.load %arg1[%c0, %c0_0] : memref<8x128xf32, #tpu.memory_space<vmem>>, vector<8x128xf32>
    %c0_1 = arith.constant 0 : index
    %c0_2 = arith.constant 0 : index
    %c0_3 = arith.constant 0 : index
    %1 = vector.load %arg2[%c0_1, %c0_2, %c0_3] : memref<5x128x384xbf16, #tpu.memory_space<vmem>>, vector<1x128x384xbf16>
    %2 = vector.shape_cast %1 : vector<1x128x384xbf16> to vector<128x384xbf16>
    %c1 = arith.constant 1 : index
    %c0_4 = arith.constant 0 : index
    %c0_5 = arith.constant 0 : index
    %3 = vector.load %arg2[%c1, %c0_4, %c0_5] : memref<5x128x384xbf16, #tpu.memory_space<vmem>>, vector<1x128x384xbf16>
    %4 = vector.shape_cast %3 : vector<1x128x384xbf16> to vector<128x384xbf16>
    %c2 = arith.constant 2 : index
    %c0_6 = arith.constant 0 : index
    %c0_7 = arith.constant 0 : index
    %5 = vector.load %arg2[%c2, %c0_6, %c0_7] : memref<5x128x384xbf16, #tpu.memory_space<vmem>>, vector<1x128x384xbf16>
    %6 = vector.shape_cast %5 : vector<1x128x384xbf16> to vector<128x384xbf16>
    %c3 = arith.constant 3 : index
    %c0_8 = arith.constant 0 : index
    %c0_9 = arith.constant 0 : index
    %7 = vector.load %arg2[%c3, %c0_8, %c0_9] : memref<5x128x384xbf16, #tpu.memory_space<vmem>>, vector<1x128x384xbf16>
    %8 = vector.shape_cast %7 : vector<1x128x384xbf16> to vector<128x384xbf16>
    %c4 = arith.constant 4 : index
    %c0_10 = arith.constant 0 : index
    %c0_11 = arith.constant 0 : index
    %9 = vector.load %arg2[%c4, %c0_10, %c0_11] : memref<5x128x384xbf16, #tpu.memory_space<vmem>>, vector<1x128x384xbf16>
    %10 = vector.shape_cast %9 : vector<1x128x384xbf16> to vector<128x384xbf16>
    %11 = vector.extract_strided_slice %10 {offsets = [0, 0], sizes = [128, 128], strides = [1, 1]} : vector<128x384xbf16> to vector<128x128xbf16>
    %12 = vector.extract_strided_slice %10 {offsets = [0, 128], sizes = [128, 128], strides = [1, 1]} : vector<128x384xbf16> to vector<128x128xbf16>
    %13 = vector.extract_strided_slice %10 {offsets = [0, 256], sizes = [128, 128], strides = [1, 1]} : vector<128x384xbf16> to vector<128x128xbf16>
    %c0_12 = arith.constant 0 : index
    %c0_13 = arith.constant 0 : index
    %14 = vector.load %arg3[%c0_12, %c0_13] : memref<8x384xf32, #tpu.memory_space<vmem>>, vector<1x384xf32>
    %c1_14 = arith.constant 1 : index
    %c0_15 = arith.constant 0 : index
    %15 = vector.load %arg3[%c1_14, %c0_15] : memref<8x384xf32, #tpu.memory_space<vmem>>, vector<1x384xf32>
    %c2_16 = arith.constant 2 : index
    %c0_17 = arith.constant 0 : index
    %16 = vector.load %arg3[%c2_16, %c0_17] : memref<8x384xf32, #tpu.memory_space<vmem>>, vector<1x128xf32>
    %17 = vector.shape_cast %16 : vector<1x128xf32> to vector<1x128xf32>
    %18 = vector.broadcast %17 : vector<1x128xf32> to vector<8x128xf32>
    %c2_18 = arith.constant 2 : index
    %c128 = arith.constant 128 : index
    %19 = vector.load %arg3[%c2_18, %c128] : memref<8x384xf32, #tpu.memory_space<vmem>>, vector<1x128xf32>
    %20 = vector.shape_cast %19 : vector<1x128xf32> to vector<1x128xf32>
    %21 = vector.broadcast %20 : vector<1x128xf32> to vector<8x128xf32>
    %c2_19 = arith.constant 2 : index
    %c256 = arith.constant 256 : index
    %22 = vector.load %arg3[%c2_19, %c256] : memref<8x384xf32, #tpu.memory_space<vmem>>, vector<1x128xf32>
    %c3_20 = arith.constant 3 : index
    %c0_21 = arith.constant 0 : index
    %23 = vector.load %arg3[%c3_20, %c0_21] : memref<8x384xf32, #tpu.memory_space<vmem>>, vector<1x128xf32>
    %c3_22 = arith.constant 3 : index
    %c128_23 = arith.constant 128 : index
    %24 = vector.load %arg3[%c3_22, %c128_23] : memref<8x384xf32, #tpu.memory_space<vmem>>, vector<1x128xf32>
    %c0_24 = arith.constant 0 : index
    %c0_25 = arith.constant 0 : index
    %25 = vector.load %arg0[%c0_24, %c0_25] : memref<64x128xbf16, #tpu.memory_space<vmem>>, vector<64x128xbf16>
    %cst = arith.constant dense<0.000000e+00> : vector<64x384xf32>
    %26 = tpu.matmul %25, %2, %cst {dimension_numbers = #tpu.dot_dimension_numbers<[1], [0], [0], [1], [0, 0, 1, 1], [], []>} : vector<64x128xbf16>, vector<128x384xbf16>, vector<64x384xf32> -> vector<64x384xf32>
    %27 = vector.broadcast %14 : vector<1x384xf32> to vector<64x384xf32>
    %28 = arith.addf %26, %27 : vector<64x384xf32>
    %c0_26 = arith.constant 0 : index
    %c0_27 = arith.constant 0 : index
    %29 = vector.load %arg7[%c0_26, %c0_27] : memref<64x384xf32, #tpu.memory_space<vmem>>, vector<64x384xf32>
    tpu.vector_store %arg7[%c0_26, %c0_27], %28 {strides = array<i32>} : memref<64x384xf32, #tpu.memory_space<vmem>>, vector<64x384xf32>,
    %c0_i32 = arith.constant 0 : i32
    %c8_i32 = arith.constant 8 : i32
    %30 = arith.muli %c0_i32, %c8_i32 : i32
    %31 = tpu.assume_multiple %30, 8 : i32
    %32 = arith.index_cast %31 : i32 to index
    %c0_28 = arith.constant 0 : index
    %33 = vector.load %arg7[%32, %c0_28] : memref<64x384xf32, #tpu.memory_space<vmem>>, vector<8x384xf32>
    %34 = arith.truncf %0 : vector<8x128xf32> to vector<8x128xbf16>
    %cst_29 = arith.constant dense<0.000000e+00> : vector<8x384xf32>
    %35 = tpu.matmul %34, %4, %cst_29 {dimension_numbers = #tpu.dot_dimension_numbers<[1], [0], [0], [1], [0, 0, 1, 1], [], []>} : vector<8x128xbf16>, vector<128x384xbf16>, vector<8x384xf32> -> vector<8x384xf32>
    %36 = vector.extract_strided_slice %33 {offsets = [0, 0], sizes = [8, 256], strides = [1, 1]} : vector<8x384xf32> to vector<8x256xf32>
    %37 = vector.extract_strided_slice %35 {offsets = [0, 0], sizes = [8, 256], strides = [1, 1]} : vector<8x384xf32> to vector<8x256xf32>
    %38 = arith.addf %36, %37 : vector<8x256xf32>
    %39 = arith.negf %38 : vector<8x256xf32>
    %40 = math.exp %39 : vector<8x256xf32>
    %cst_30 = arith.constant 1.000000e+00 : f32
    %41 = vector.broadcast %cst_30 : f32 to vector<8x256xf32>
    %42 = arith.addf %41, %40 : vector<8x256xf32>
    %43 = arith.divf %41, %42 : vector<8x256xf32>
    %44 = vector.extract_strided_slice %43 {offsets = [0, 0], sizes = [8, 128], strides = [1, 1]} : vector<8x256xf32> to vector<8x128xf32>
    %45 = vector.extract_strided_slice %43 {offsets = [0, 128], sizes = [8, 128], strides = [1, 1]} : vector<8x256xf32> to vector<8x128xf32>
    %46 = vector.extract_strided_slice %33 {offsets = [0, 256], sizes = [8, 128], strides = [1, 1]} : vector<8x384xf32> to vector<8x128xf32>
    %47 = vector.extract_strided_slice %35 {offsets = [0, 256], sizes = [8, 128], strides = [1, 1]} : vector<8x384xf32> to vector<8x128xf32>
    %48 = arith.addf %47, %18 : vector<8x128xf32>
    %49 = arith.mulf %44, %48 : vector<8x128xf32>
    %50 = arith.addf %46, %49 : vector<8x128xf32>
    %51 = math.tanh %50 : vector<8x128xf32>
    %52 = arith.subf %0, %51 : vector<8x128xf32>
    %53 = arith.mulf %45, %52 : vector<8x128xf32>
    %54 = arith.addf %51, %53 : vector<8x128xf32>
    %55 = arith.index_cast %31 : i32 to index
    %c0_31 = arith.constant 0 : index
    %56 = vector.load %arg6[%55, %c0_31] : memref<64x128xf32, #tpu.memory_space<vmem>>, vector<8x128xf32>
    tpu.vector_store %arg6[%55, %c0_31], %54 {strides = array<i32>} : memref<64x128xf32, #tpu.memory_space<vmem>>, vector<8x128xf32>,
    %c1_i32 = arith.constant 1 : i32
    %c8_i32_32 = arith.constant 8 : i32
    %57 = arith.muli %c1_i32, %c8_i32_32 : i32
    %58 = tpu.assume_multiple %57, 8 : i32
    %59 = arith.index_cast %58 : i32 to index
    %c0_33 = arith.constant 0 : index
    %60 = vector.load %arg7[%59, %c0_33] : memref<64x384xf32, #tpu.memory_space<vmem>>, vector<8x384xf32>
    %61 = arith.truncf %54 : vector<8x128xf32> to vector<8x128xbf16>
    %cst_34 = arith.constant dense<0.000000e+00> : vector<8x384xf32>
    %62 = tpu.matmul %61, %4, %cst_34 {dimension_numbers = #tpu.dot_dimension_numbers<[1], [0], [0], [1], [0, 0, 1, 1], [], []>} : vector<8x128xbf16>, vector<128x384xbf16>, vector<8x384xf32> -> vector<8x384xf32>
    %63 = vector.extract_strided_slice %60 {offsets = [0, 0], sizes = [8, 256], strides = [1, 1]} : vector<8x384xf32> to vector<8x256xf32>
    %64 = vector.extract_strided_slice %62 {offsets = [0, 0], sizes = [8, 256], strides = [1, 1]} : vector<8x384xf32> to vector<8x256xf32>
    %65 = arith.addf %63, %64 : vector<8x256xf32>
    %66 = arith.negf %65 : vector<8x256xf32>
    %67 = math.exp %66 : vector<8x256xf32>
    %cst_35 = arith.constant 1.000000e+00 : f32
    %68 = vector.broadcast %cst_35 : f32 to vector<8x256xf32>
    %69 = arith.addf %68, %67 : vector<8x256xf32>
    %70 = arith.divf %68, %69 : vector<8x256xf32>
    %71 = vector.extract_strided_slice %70 {offsets = [0, 0], sizes = [8, 128], strides = [1, 1]} : vector<8x256xf32> to vector<8x128xf32>
    %72 = vector.extract_strided_slice %70 {offsets = [0, 128], sizes = [8, 128], strides = [1, 1]} : vector<8x256xf32> to vector<8x128xf32>
    %73 = vector.extract_strided_slice %60 {offsets = [0, 256], sizes = [8, 128], strides = [1, 1]} : vector<8x384xf32> to vector<8x128xf32>
    %74 = vector.extract_strided_slice %62 {offsets = [0, 256], sizes = [8, 128], strides = [1, 1]} : vector<8x384xf32> to vector<8x128xf32>
    %75 = arith.addf %74, %18 : vector<8x128xf32>
    %76 = arith.mulf %71, %75 : vector<8x128xf32>
    %77 = arith.addf %73, %76 : vector<8x128xf32>
    %78 = math.tanh %77 : vector<8x128xf32>
    %79 = arith.subf %54, %78 : vector<8x128xf32>
    %80 = arith.mulf %72, %79 : vector<8x128xf32>
    %81 = arith.addf %78, %80 : vector<8x128xf32>
    %82 = arith.index_cast %58 : i32 to index
    %c0_36 = arith.constant 0 : index
    %83 = vector.load %arg6[%82, %c0_36] : memref<64x128xf32, #tpu.memory_space<vmem>>, vector<8x128xf32>
    tpu.vector_store %arg6[%82, %c0_36], %81 {strides = array<i32>} : memref<64x128xf32, #tpu.memory_space<vmem>>, vector<8x128xf32>,
    %c2_i32 = arith.constant 2 : i32
    %c8_i32_37 = arith.constant 8 : i32
    %84 = arith.muli %c2_i32, %c8_i32_37 : i32
    %85 = tpu.assume_multiple %84, 8 : i32
    %86 = arith.index_cast %85 : i32 to index
    %c0_38 = arith.constant 0 : index
    %87 = vector.load %arg7[%86, %c0_38] : memref<64x384xf32, #tpu.memory_space<vmem>>, vector<8x384xf32>
    %88 = arith.truncf %81 : vector<8x128xf32> to vector<8x128xbf16>
    %cst_39 = arith.constant dense<0.000000e+00> : vector<8x384xf32>
    %89 = tpu.matmul %88, %4, %cst_39 {dimension_numbers = #tpu.dot_dimension_numbers<[1], [0], [0], [1], [0, 0, 1, 1], [], []>} : vector<8x128xbf16>, vector<128x384xbf16>, vector<8x384xf32> -> vector<8x384xf32>
    %90 = vector.extract_strided_slice %87 {offsets = [0, 0], sizes = [8, 256], strides = [1, 1]} : vector<8x384xf32> to vector<8x256xf32>
    %91 = vector.extract_strided_slice %89 {offsets = [0, 0], sizes = [8, 256], strides = [1, 1]} : vector<8x384xf32> to vector<8x256xf32>
    %92 = arith.addf %90, %91 : vector<8x256xf32>
    %93 = arith.negf %92 : vector<8x256xf32>
    %94 = math.exp %93 : vector<8x256xf32>
    %cst_40 = arith.constant 1.000000e+00 : f32
    %95 = vector.broadcast %cst_40 : f32 to vector<8x256xf32>
    %96 = arith.addf %95, %94 : vector<8x256xf32>
    %97 = arith.divf %95, %96 : vector<8x256xf32>
    %98 = vector.extract_strided_slice %97 {offsets = [0, 0], sizes = [8, 128], strides = [1, 1]} : vector<8x256xf32> to vector<8x128xf32>
    %99 = vector.extract_strided_slice %97 {offsets = [0, 128], sizes = [8, 128], strides = [1, 1]} : vector<8x256xf32> to vector<8x128xf32>
    %100 = vector.extract_strided_slice %87 {offsets = [0, 256], sizes = [8, 128], strides = [1, 1]} : vector<8x384xf32> to vector<8x128xf32>
    %101 = vector.extract_strided_slice %89 {offsets = [0, 256], sizes = [8, 128], strides = [1, 1]} : vector<8x384xf32> to vector<8x128xf32>
    %102 = arith.addf %101, %18 : vector<8x128xf32>
    %103 = arith.mulf %98, %102 : vector<8x128xf32>
    %104 = arith.addf %100, %103 : vector<8x128xf32>
    %105 = math.tanh %104 : vector<8x128xf32>
    %106 = arith.subf %81, %105 : vector<8x128xf32>
    %107 = arith.mulf %99, %106 : vector<8x128xf32>
    %108 = arith.addf %105, %107 : vector<8x128xf32>
    %109 = arith.index_cast %85 : i32 to index
    %c0_41 = arith.constant 0 : index
    %110 = vector.load %arg6[%109, %c0_41] : memref<64x128xf32, #tpu.memory_space<vmem>>, vector<8x128xf32>
    tpu.vector_store %arg6[%109, %c0_41], %108 {strides = array<i32>} : memref<64x128xf32, #tpu.memory_space<vmem>>, vector<8x128xf32>,
    %c3_i32 = arith.constant 3 : i32
    %c8_i32_42 = arith.constant 8 : i32
    %111 = arith.muli %c3_i32, %c8_i32_42 : i32
    %112 = tpu.assume_multiple %111, 8 : i32
    %113 = arith.index_cast %112 : i32 to index
    %c0_43 = arith.constant 0 : index
    %114 = vector.load %arg7[%113, %c0_43] : memref<64x384xf32, #tpu.memory_space<vmem>>, vector<8x384xf32>
    %115 = arith.truncf %108 : vector<8x128xf32> to vector<8x128xbf16>
    %cst_44 = arith.constant dense<0.000000e+00> : vector<8x384xf32>
    %116 = tpu.matmul %115, %4, %cst_44 {dimension_numbers = #tpu.dot_dimension_numbers<[1], [0], [0], [1], [0, 0, 1, 1], [], []>} : vector<8x128xbf16>, vector<128x384xbf16>, vector<8x384xf32> -> vector<8x384xf32>
    %117 = vector.extract_strided_slice %114 {offsets = [0, 0], sizes = [8, 256], strides = [1, 1]} : vector<8x384xf32> to vector<8x256xf32>
    %118 = vector.extract_strided_slice %116 {offsets = [0, 0], sizes = [8, 256], strides = [1, 1]} : vector<8x384xf32> to vector<8x256xf32>
    %119 = arith.addf %117, %118 : vector<8x256xf32>
    %120 = arith.negf %119 : vector<8x256xf32>
    %121 = math.exp %120 : vector<8x256xf32>
    %cst_45 = arith.constant 1.000000e+00 : f32
    %122 = vector.broadcast %cst_45 : f32 to vector<8x256xf32>
    %123 = arith.addf %122, %121 : vector<8x256xf32>
    %124 = arith.divf %122, %123 : vector<8x256xf32>
    %125 = vector.extract_strided_slice %124 {offsets = [0, 0], sizes = [8, 128], strides = [1, 1]} : vector<8x256xf32> to vector<8x128xf32>
    %126 = vector.extract_strided_slice %124 {offsets = [0, 128], sizes = [8, 128], strides = [1, 1]} : vector<8x256xf32> to vector<8x128xf32>
    %127 = vector.extract_strided_slice %114 {offsets = [0, 256], sizes = [8, 128], strides = [1, 1]} : vector<8x384xf32> to vector<8x128xf32>
    %128 = vector.extract_strided_slice %116 {offsets = [0, 256], sizes = [8, 128], strides = [1, 1]} : vector<8x384xf32> to vector<8x128xf32>
    %129 = arith.addf %128, %18 : vector<8x128xf32>
    %130 = arith.mulf %125, %129 : vector<8x128xf32>
    %131 = arith.addf %127, %130 : vector<8x128xf32>
    %132 = math.tanh %131 : vector<8x128xf32>
    %133 = arith.subf %108, %132 : vector<8x128xf32>
    %134 = arith.mulf %126, %133 : vector<8x128xf32>
    %135 = arith.addf %132, %134 : vector<8x128xf32>
    %136 = arith.index_cast %112 : i32 to index
    %c0_46 = arith.constant 0 : index
    %137 = vector.load %arg6[%136, %c0_46] : memref<64x128xf32, #tpu.memory_space<vmem>>, vector<8x128xf32>
    tpu.vector_store %arg6[%136, %c0_46], %135 {strides = array<i32>} : memref<64x128xf32, #tpu.memory_space<vmem>>, vector<8x128xf32>,
    %c4_i32 = arith.constant 4 : i32
    %c8_i32_47 = arith.constant 8 : i32
    %138 = arith.muli %c4_i32, %c8_i32_47 : i32
    %139 = tpu.assume_multiple %138, 8 : i32
    %140 = arith.index_cast %139 : i32 to index
    %c0_48 = arith.constant 0 : index
    %141 = vector.load %arg7[%140, %c0_48] : memref<64x384xf32, #tpu.memory_space<vmem>>, vector<8x384xf32>
    %142 = arith.truncf %135 : vector<8x128xf32> to vector<8x128xbf16>
    %cst_49 = arith.constant dense<0.000000e+00> : vector<8x384xf32>
    %143 = tpu.matmul %142, %4, %cst_49 {dimension_numbers = #tpu.dot_dimension_numbers<[1], [0], [0], [1], [0, 0, 1, 1], [], []>} : vector<8x128xbf16>, vector<128x384xbf16>, vector<8x384xf32> -> vector<8x384xf32>
    %144 = vector.extract_strided_slice %141 {offsets = [0, 0], sizes = [8, 256], strides = [1, 1]} : vector<8x384xf32> to vector<8x256xf32>
    %145 = vector.extract_strided_slice %143 {offsets = [0, 0], sizes = [8, 256], strides = [1, 1]} : vector<8x384xf32> to vector<8x256xf32>
    %146 = arith.addf %144, %145 : vector<8x256xf32>
    %147 = arith.negf %146 : vector<8x256xf32>
    %148 = math.exp %147 : vector<8x256xf32>
    %cst_50 = arith.constant 1.000000e+00 : f32
    %149 = vector.broadcast %cst_50 : f32 to vector<8x256xf32>
    %150 = arith.addf %149, %148 : vector<8x256xf32>
    %151 = arith.divf %149, %150 : vector<8x256xf32>
    %152 = vector.extract_strided_slice %151 {offsets = [0, 0], sizes = [8, 128], strides = [1, 1]} : vector<8x256xf32> to vector<8x128xf32>
    %153 = vector.extract_strided_slice %151 {offsets = [0, 128], sizes = [8, 128], strides = [1, 1]} : vector<8x256xf32> to vector<8x128xf32>
    %154 = vector.extract_strided_slice %141 {offsets = [0, 256], sizes = [8, 128], strides = [1, 1]} : vector<8x384xf32> to vector<8x128xf32>
    %155 = vector.extract_strided_slice %143 {offsets = [0, 256], sizes = [8, 128], strides = [1, 1]} : vector<8x384xf32> to vector<8x128xf32>
    %156 = arith.addf %155, %18 : vector<8x128xf32>
    %157 = arith.mulf %152, %156 : vector<8x128xf32>
    %158 = arith.addf %154, %157 : vector<8x128xf32>
    %159 = math.tanh %158 : vector<8x128xf32>
    %160 = arith.subf %135, %159 : vector<8x128xf32>
    %161 = arith.mulf %153, %160 : vector<8x128xf32>
    %162 = arith.addf %159, %161 : vector<8x128xf32>
    %163 = arith.index_cast %139 : i32 to index
    %c0_51 = arith.constant 0 : index
    %164 = vector.load %arg6[%163, %c0_51] : memref<64x128xf32, #tpu.memory_space<vmem>>, vector<8x128xf32>
    tpu.vector_store %arg6[%163, %c0_51], %162 {strides = array<i32>} : memref<64x128xf32, #tpu.memory_space<vmem>>, vector<8x128xf32>,
    %c5_i32 = arith.constant 5 : i32
    %c8_i32_52 = arith.constant 8 : i32
    %165 = arith.muli %c5_i32, %c8_i32_52 : i32
    %166 = tpu.assume_multiple %165, 8 : i32
    %167 = arith.index_cast %166 : i32 to index
    %c0_53 = arith.constant 0 : index
    %168 = vector.load %arg7[%167, %c0_53] : memref<64x384xf32, #tpu.memory_space<vmem>>, vector<8x384xf32>
    %169 = arith.truncf %162 : vector<8x128xf32> to vector<8x128xbf16>
    %cst_54 = arith.constant dense<0.000000e+00> : vector<8x384xf32>
    %170 = tpu.matmul %169, %4, %cst_54 {dimension_numbers = #tpu.dot_dimension_numbers<[1], [0], [0], [1], [0, 0, 1, 1], [], []>} : vector<8x128xbf16>, vector<128x384xbf16>, vector<8x384xf32> -> vector<8x384xf32>
    %171 = vector.extract_strided_slice %168 {offsets = [0, 0], sizes = [8, 256], strides = [1, 1]} : vector<8x384xf32> to vector<8x256xf32>
    %172 = vector.extract_strided_slice %170 {offsets = [0, 0], sizes = [8, 256], strides = [1, 1]} : vector<8x384xf32> to vector<8x256xf32>
    %173 = arith.addf %171, %172 : vector<8x256xf32>
    %174 = arith.negf %173 : vector<8x256xf32>
    %175 = math.exp %174 : vector<8x256xf32>
    %cst_55 = arith.constant 1.000000e+00 : f32
    %176 = vector.broadcast %cst_55 : f32 to vector<8x256xf32>
    %177 = arith.addf %176, %175 : vector<8x256xf32>
    %178 = arith.divf %176, %177 : vector<8x256xf32>
    %179 = vector.extract_strided_slice %178 {offsets = [0, 0], sizes = [8, 128], strides = [1, 1]} : vector<8x256xf32> to vector<8x128xf32>
    %180 = vector.extract_strided_slice %178 {offsets = [0, 128], sizes = [8, 128], strides = [1, 1]} : vector<8x256xf32> to vector<8x128xf32>
    %181 = vector.extract_strided_slice %168 {offsets = [0, 256], sizes = [8, 128], strides = [1, 1]} : vector<8x384xf32> to vector<8x128xf32>
    %182 = vector.extract_strided_slice %170 {offsets = [0, 256], sizes = [8, 128], strides = [1, 1]} : vector<8x384xf32> to vector<8x128xf32>
    %183 = arith.addf %182, %18 : vector<8x128xf32>
    %184 = arith.mulf %179, %183 : vector<8x128xf32>
    %185 = arith.addf %181, %184 : vector<8x128xf32>
    %186 = math.tanh %185 : vector<8x128xf32>
    %187 = arith.subf %162, %186 : vector<8x128xf32>
    %188 = arith.mulf %180, %187 : vector<8x128xf32>
    %189 = arith.addf %186, %188 : vector<8x128xf32>
    %190 = arith.index_cast %166 : i32 to index
    %c0_56 = arith.constant 0 : index
    %191 = vector.load %arg6[%190, %c0_56] : memref<64x128xf32, #tpu.memory_space<vmem>>, vector<8x128xf32>
    tpu.vector_store %arg6[%190, %c0_56], %189 {strides = array<i32>} : memref<64x128xf32, #tpu.memory_space<vmem>>, vector<8x128xf32>,
    %c6_i32 = arith.constant 6 : i32
    %c8_i32_57 = arith.constant 8 : i32
    %192 = arith.muli %c6_i32, %c8_i32_57 : i32
    %193 = tpu.assume_multiple %192, 8 : i32
    %194 = arith.index_cast %193 : i32 to index
    %c0_58 = arith.constant 0 : index
    %195 = vector.load %arg7[%194, %c0_58] : memref<64x384xf32, #tpu.memory_space<vmem>>, vector<8x384xf32>
    %196 = arith.truncf %189 : vector<8x128xf32> to vector<8x128xbf16>
    %cst_59 = arith.constant dense<0.000000e+00> : vector<8x384xf32>
    %197 = tpu.matmul %196, %4, %cst_59 {dimension_numbers = #tpu.dot_dimension_numbers<[1], [0], [0], [1], [0, 0, 1, 1], [], []>} : vector<8x128xbf16>, vector<128x384xbf16>, vector<8x384xf32> -> vector<8x384xf32>
    %198 = vector.extract_strided_slice %195 {offsets = [0, 0], sizes = [8, 256], strides = [1, 1]} : vector<8x384xf32> to vector<8x256xf32>
    %199 = vector.extract_strided_slice %197 {offsets = [0, 0], sizes = [8, 256], strides = [1, 1]} : vector<8x384xf32> to vector<8x256xf32>
    %200 = arith.addf %198, %199 : vector<8x256xf32>
    %201 = arith.negf %200 : vector<8x256xf32>
    %202 = math.exp %201 : vector<8x256xf32>
    %cst_60 = arith.constant 1.000000e+00 : f32
    %203 = vector.broadcast %cst_60 : f32 to vector<8x256xf32>
    %204 = arith.addf %203, %202 : vector<8x256xf32>
    %205 = arith.divf %203, %204 : vector<8x256xf32>
    %206 = vector.extract_strided_slice %205 {offsets = [0, 0], sizes = [8, 128], strides = [1, 1]} : vector<8x256xf32> to vector<8x128xf32>
    %207 = vector.extract_strided_slice %205 {offsets = [0, 128], sizes = [8, 128], strides = [1, 1]} : vector<8x256xf32> to vector<8x128xf32>
    %208 = vector.extract_strided_slice %195 {offsets = [0, 256], sizes = [8, 128], strides = [1, 1]} : vector<8x384xf32> to vector<8x128xf32>
    %209 = vector.extract_strided_slice %197 {offsets = [0, 256], sizes = [8, 128], strides = [1, 1]} : vector<8x384xf32> to vector<8x128xf32>
    %210 = arith.addf %209, %18 : vector<8x128xf32>
    %211 = arith.mulf %206, %210 : vector<8x128xf32>
    %212 = arith.addf %208, %211 : vector<8x128xf32>
    %213 = math.tanh %212 : vector<8x128xf32>
    %214 = arith.subf %189, %213 : vector<8x128xf32>
    %215 = arith.mulf %207, %214 : vector<8x128xf32>
    %216 = arith.addf %213, %215 : vector<8x128xf32>
    %217 = arith.index_cast %193 : i32 to index
    %c0_61 = arith.constant 0 : index
    %218 = vector.load %arg6[%217, %c0_61] : memref<64x128xf32, #tpu.memory_space<vmem>>, vector<8x128xf32>
    tpu.vector_store %arg6[%217, %c0_61], %216 {strides = array<i32>} : memref<64x128xf32, #tpu.memory_space<vmem>>, vector<8x128xf32>,
    %c7_i32 = arith.constant 7 : i32
    %c8_i32_62 = arith.constant 8 : i32
    %219 = arith.muli %c7_i32, %c8_i32_62 : i32
    %220 = tpu.assume_multiple %219, 8 : i32
    %221 = arith.index_cast %220 : i32 to index
    %c0_63 = arith.constant 0 : index
    %222 = vector.load %arg7[%221, %c0_63] : memref<64x384xf32, #tpu.memory_space<vmem>>, vector<8x384xf32>
    %223 = arith.truncf %216 : vector<8x128xf32> to vector<8x128xbf16>
    %cst_64 = arith.constant dense<0.000000e+00> : vector<8x384xf32>
    %224 = tpu.matmul %223, %4, %cst_64 {dimension_numbers = #tpu.dot_dimension_numbers<[1], [0], [0], [1], [0, 0, 1, 1], [], []>} : vector<8x128xbf16>, vector<128x384xbf16>, vector<8x384xf32> -> vector<8x384xf32>
    %225 = vector.extract_strided_slice %222 {offsets = [0, 0], sizes = [8, 256], strides = [1, 1]} : vector<8x384xf32> to vector<8x256xf32>
    %226 = vector.extract_strided_slice %224 {offsets = [0, 0], sizes = [8, 256], strides = [1, 1]} : vector<8x384xf32> to vector<8x256xf32>
    %227 = arith.addf %225, %226 : vector<8x256xf32>
    %228 = arith.negf %227 : vector<8x256xf32>
    %229 = math.exp %228 : vector<8x256xf32>
    %cst_65 = arith.constant 1.000000e+00 : f32
    %230 = vector.broadcast %cst_65 : f32 to vector<8x256xf32>
    %231 = arith.addf %230, %229 : vector<8x256xf32>
    %232 = arith.divf %230, %231 : vector<8x256xf32>
    %233 = vector.extract_strided_slice %232 {offsets = [0, 0], sizes = [8, 128], strides = [1, 1]} : vector<8x256xf32> to vector<8x128xf32>
    %234 = vector.extract_strided_slice %232 {offsets = [0, 128], sizes = [8, 128], strides = [1, 1]} : vector<8x256xf32> to vector<8x128xf32>
    %235 = vector.extract_strided_slice %222 {offsets = [0, 256], sizes = [8, 128], strides = [1, 1]} : vector<8x384xf32> to vector<8x128xf32>
    %236 = vector.extract_strided_slice %224 {offsets = [0, 256], sizes = [8, 128], strides = [1, 1]} : vector<8x384xf32> to vector<8x128xf32>
    %237 = arith.addf %236, %18 : vector<8x128xf32>
    %238 = arith.mulf %233, %237 : vector<8x128xf32>
    %239 = arith.addf %235, %238 : vector<8x128xf32>
    %240 = math.tanh %239 : vector<8x128xf32>
    %241 = arith.subf %216, %240 : vector<8x128xf32>
    %242 = arith.mulf %234, %241 : vector<8x128xf32>
    %243 = arith.addf %240, %242 : vector<8x128xf32>
    %244 = arith.index_cast %220 : i32 to index
    %c0_66 = arith.constant 0 : index
    %245 = vector.load %arg6[%244, %c0_66] : memref<64x128xf32, #tpu.memory_space<vmem>>, vector<8x128xf32>
    tpu.vector_store %arg6[%244, %c0_66], %243 {strides = array<i32>} : memref<64x128xf32, #tpu.memory_space<vmem>>, vector<8x128xf32>,
    %c8_i32_67 = arith.constant 8 : i32
    %246 = arith.truncf %243 : vector<8x128xf32> to vector<8x128xbf16>
    %cst_68 = arith.constant dense<0.000000e+00> : vector<8x128xf32>
    %247 = tpu.matmul %246, %12, %cst_68 {dimension_numbers = #tpu.dot_dimension_numbers<[1], [0], [0], [1], [0, 0, 1, 1], [], []>} : vector<8x128xbf16>, vector<128x128xbf16>, vector<8x128xf32> -> vector<8x128xf32>
    %248 = vector.broadcast %23 : vector<1x128xf32> to vector<8x128xf32>
    %249 = arith.addf %247, %248 : vector<8x128xf32>
    %cst_69 = arith.constant 0.000000e+00 : f32
    %250 = vector.broadcast %cst_69 : f32 to vector<8x128xf32>
    %251 = arith.cmpf ogt, %249, %250 : vector<8x128xf32>
    %cst_70 = arith.constant 2.000000e-01 : f32
    %252 = vector.broadcast %cst_70 : f32 to vector<8x128xf32>
    %253 = arith.mulf %252, %249 : vector<8x128xf32>
    %254 = arith.select %251, %249, %253 : vector<8x128xi1>, vector<8x128xf32>
    %c0_71 = arith.constant 0 : index
    %c0_72 = arith.constant 0 : index
    %255 = vector.load %arg6[%c0_71, %c0_72] : memref<64x128xf32, #tpu.memory_space<vmem>>, vector<64x128xf32>
    %256 = arith.truncf %255 : vector<64x128xf32> to vector<64x128xbf16>
    %cst_73 = arith.constant dense<0.000000e+00> : vector<64x128xf32>
    %257 = tpu.matmul %256, %11, %cst_73 {dimension_numbers = #tpu.dot_dimension_numbers<[1], [0], [0], [1], [0, 0, 1, 1], [], []>} : vector<64x128xbf16>, vector<128x128xbf16>, vector<64x128xf32> -> vector<64x128xf32>
    %258 = vector.broadcast %22 : vector<1x128xf32> to vector<64x128xf32>
    %259 = arith.addf %257, %258 : vector<64x128xf32>
    %cst_74 = arith.constant 0.000000e+00 : f32
    %260 = vector.broadcast %cst_74 : f32 to vector<64x128xf32>
    %261 = arith.cmpf ogt, %259, %260 : vector<64x128xf32>
    %cst_75 = arith.constant 2.000000e-01 : f32
    %262 = vector.broadcast %cst_75 : f32 to vector<64x128xf32>
    %263 = arith.mulf %262, %259 : vector<64x128xf32>
    %264 = arith.select %261, %259, %263 : vector<64x128xi1>, vector<64x128xf32>
    %265 = arith.truncf %264 : vector<64x128xf32> to vector<64x128xbf16>
    %cst_76 = arith.constant dense<0.000000e+00> : vector<64x384xf32>
    %266 = tpu.matmul %265, %6, %cst_76 {dimension_numbers = #tpu.dot_dimension_numbers<[1], [0], [0], [1], [0, 0, 1, 1], [], []>} : vector<64x128xbf16>, vector<128x384xbf16>, vector<64x384xf32> -> vector<64x384xf32>
    %267 = vector.broadcast %15 : vector<1x384xf32> to vector<64x384xf32>
    %268 = arith.addf %266, %267 : vector<64x384xf32>
    %c0_77 = arith.constant 0 : index
    %c0_78 = arith.constant 0 : index
    %269 = vector.load %arg7[%c0_77, %c0_78] : memref<64x384xf32, #tpu.memory_space<vmem>>, vector<64x384xf32>
    tpu.vector_store %arg7[%c0_77, %c0_78], %268 {strides = array<i32>} : memref<64x384xf32, #tpu.memory_space<vmem>>, vector<64x384xf32>,
    %cst_79 = arith.constant 0.000000e+00 : f32
    %270 = vector.broadcast %cst_79 : f32 to vector<8x128xf32>
    %c0_i32_80 = arith.constant 0 : i32
    %c8_i32_81 = arith.constant 8 : i32
    %271 = arith.muli %c0_i32_80, %c8_i32_81 : i32
    %272 = tpu.assume_multiple %271, 8 : i32
    %273 = arith.index_cast %272 : i32 to index
    %c0_82 = arith.constant 0 : index
    %274 = vector.load %arg7[%273, %c0_82] : memref<64x384xf32, #tpu.memory_space<vmem>>, vector<8x384xf32>
    %275 = arith.truncf %254 : vector<8x128xf32> to vector<8x128xbf16>
    %cst_83 = arith.constant dense<0.000000e+00> : vector<8x384xf32>
    %276 = tpu.matmul %275, %8, %cst_83 {dimension_numbers = #tpu.dot_dimension_numbers<[1], [0], [0], [1], [0, 0, 1, 1], [], []>} : vector<8x128xbf16>, vector<128x384xbf16>, vector<8x384xf32> -> vector<8x384xf32>
    %277 = vector.extract_strided_slice %274 {offsets = [0, 0], sizes = [8, 256], strides = [1, 1]} : vector<8x384xf32> to vector<8x256xf32>
    %278 = vector.extract_strided_slice %276 {offsets = [0, 0], sizes = [8, 256], strides = [1, 1]} : vector<8x384xf32> to vector<8x256xf32>
    %279 = arith.addf %277, %278 : vector<8x256xf32>
    %280 = arith.negf %279 : vector<8x256xf32>
    %281 = math.exp %280 : vector<8x256xf32>
    %cst_84 = arith.constant 1.000000e+00 : f32
    %282 = vector.broadcast %cst_84 : f32 to vector<8x256xf32>
    %283 = arith.addf %282, %281 : vector<8x256xf32>
    %284 = arith.divf %282, %283 : vector<8x256xf32>
    %285 = vector.extract_strided_slice %284 {offsets = [0, 0], sizes = [8, 128], strides = [1, 1]} : vector<8x256xf32> to vector<8x128xf32>
    %286 = vector.extract_strided_slice %284 {offsets = [0, 128], sizes = [8, 128], strides = [1, 1]} : vector<8x256xf32> to vector<8x128xf32>
    %287 = vector.extract_strided_slice %274 {offsets = [0, 256], sizes = [8, 128], strides = [1, 1]} : vector<8x384xf32> to vector<8x128xf32>
    %288 = vector.extract_strided_slice %276 {offsets = [0, 256], sizes = [8, 128], strides = [1, 1]} : vector<8x384xf32> to vector<8x128xf32>
    %289 = arith.addf %288, %21 : vector<8x128xf32>
    %290 = arith.mulf %285, %289 : vector<8x128xf32>
    %291 = arith.addf %287, %290 : vector<8x128xf32>
    %292 = math.tanh %291 : vector<8x128xf32>
    %293 = arith.subf %254, %292 : vector<8x128xf32>
    %294 = arith.mulf %286, %293 : vector<8x128xf32>
    %295 = arith.addf %292, %294 : vector<8x128xf32>
    %296 = arith.addf %270, %295 : vector<8x128xf32>
    %c1_i32_85 = arith.constant 1 : i32
    %c8_i32_86 = arith.constant 8 : i32
    %297 = arith.muli %c1_i32_85, %c8_i32_86 : i32
    %298 = tpu.assume_multiple %297, 8 : i32
    %299 = arith.index_cast %298 : i32 to index
    %c0_87 = arith.constant 0 : index
    %300 = vector.load %arg7[%299, %c0_87] : memref<64x384xf32, #tpu.memory_space<vmem>>, vector<8x384xf32>
    %301 = arith.truncf %295 : vector<8x128xf32> to vector<8x128xbf16>
    %cst_88 = arith.constant dense<0.000000e+00> : vector<8x384xf32>
    %302 = tpu.matmul %301, %8, %cst_88 {dimension_numbers = #tpu.dot_dimension_numbers<[1], [0], [0], [1], [0, 0, 1, 1], [], []>} : vector<8x128xbf16>, vector<128x384xbf16>, vector<8x384xf32> -> vector<8x384xf32>
    %303 = vector.extract_strided_slice %300 {offsets = [0, 0], sizes = [8, 256], strides = [1, 1]} : vector<8x384xf32> to vector<8x256xf32>
    %304 = vector.extract_strided_slice %302 {offsets = [0, 0], sizes = [8, 256], strides = [1, 1]} : vector<8x384xf32> to vector<8x256xf32>
    %305 = arith.addf %303, %304 : vector<8x256xf32>
    %306 = arith.negf %305 : vector<8x256xf32>
    %307 = math.exp %306 : vector<8x256xf32>
    %cst_89 = arith.constant 1.000000e+00 : f32
    %308 = vector.broadcast %cst_89 : f32 to vector<8x256xf32>
    %309 = arith.addf %308, %307 : vector<8x256xf32>
    %310 = arith.divf %308, %309 : vector<8x256xf32>
    %311 = vector.extract_strided_slice %310 {offsets = [0, 0], sizes = [8, 128], strides = [1, 1]} : vector<8x256xf32> to vector<8x128xf32>
    %312 = vector.extract_strided_slice %310 {offsets = [0, 128], sizes = [8, 128], strides = [1, 1]} : vector<8x256xf32> to vector<8x128xf32>
    %313 = vector.extract_strided_slice %300 {offsets = [0, 256], sizes = [8, 128], strides = [1, 1]} : vector<8x384xf32> to vector<8x128xf32>
    %314 = vector.extract_strided_slice %302 {offsets = [0, 256], sizes = [8, 128], strides = [1, 1]} : vector<8x384xf32> to vector<8x128xf32>
    %315 = arith.addf %314, %21 : vector<8x128xf32>
    %316 = arith.mulf %311, %315 : vector<8x128xf32>
    %317 = arith.addf %313, %316 : vector<8x128xf32>
    %318 = math.tanh %317 : vector<8x128xf32>
    %319 = arith.subf %295, %318 : vector<8x128xf32>
    %320 = arith.mulf %312, %319 : vector<8x128xf32>
    %321 = arith.addf %318, %320 : vector<8x128xf32>
    %322 = arith.addf %296, %321 : vector<8x128xf32>
    %c2_i32_90 = arith.constant 2 : i32
    %c8_i32_91 = arith.constant 8 : i32
    %323 = arith.muli %c2_i32_90, %c8_i32_91 : i32
    %324 = tpu.assume_multiple %323, 8 : i32
    %325 = arith.index_cast %324 : i32 to index
    %c0_92 = arith.constant 0 : index
    %326 = vector.load %arg7[%325, %c0_92] : memref<64x384xf32, #tpu.memory_space<vmem>>, vector<8x384xf32>
    %327 = arith.truncf %321 : vector<8x128xf32> to vector<8x128xbf16>
    %cst_93 = arith.constant dense<0.000000e+00> : vector<8x384xf32>
    %328 = tpu.matmul %327, %8, %cst_93 {dimension_numbers = #tpu.dot_dimension_numbers<[1], [0], [0], [1], [0, 0, 1, 1], [], []>} : vector<8x128xbf16>, vector<128x384xbf16>, vector<8x384xf32> -> vector<8x384xf32>
    %329 = vector.extract_strided_slice %326 {offsets = [0, 0], sizes = [8, 256], strides = [1, 1]} : vector<8x384xf32> to vector<8x256xf32>
    %330 = vector.extract_strided_slice %328 {offsets = [0, 0], sizes = [8, 256], strides = [1, 1]} : vector<8x384xf32> to vector<8x256xf32>
    %331 = arith.addf %329, %330 : vector<8x256xf32>
    %332 = arith.negf %331 : vector<8x256xf32>
    %333 = math.exp %332 : vector<8x256xf32>
    %cst_94 = arith.constant 1.000000e+00 : f32
    %334 = vector.broadcast %cst_94 : f32 to vector<8x256xf32>
    %335 = arith.addf %334, %333 : vector<8x256xf32>
    %336 = arith.divf %334, %335 : vector<8x256xf32>
    %337 = vector.extract_strided_slice %336 {offsets = [0, 0], sizes = [8, 128], strides = [1, 1]} : vector<8x256xf32> to vector<8x128xf32>
    %338 = vector.extract_strided_slice %336 {offsets = [0, 128], sizes = [8, 128], strides = [1, 1]} : vector<8x256xf32> to vector<8x128xf32>
    %339 = vector.extract_strided_slice %326 {offsets = [0, 256], sizes = [8, 128], strides = [1, 1]} : vector<8x384xf32> to vector<8x128xf32>
    %340 = vector.extract_strided_slice %328 {offsets = [0, 256], sizes = [8, 128], strides = [1, 1]} : vector<8x384xf32> to vector<8x128xf32>
    %341 = arith.addf %340, %21 : vector<8x128xf32>
    %342 = arith.mulf %337, %341 : vector<8x128xf32>
    %343 = arith.addf %339, %342 : vector<8x128xf32>
    %344 = math.tanh %343 : vector<8x128xf32>
    %345 = arith.subf %321, %344 : vector<8x128xf32>
    %346 = arith.mulf %338, %345 : vector<8x128xf32>
    %347 = arith.addf %344, %346 : vector<8x128xf32>
    %348 = arith.addf %322, %347 : vector<8x128xf32>
    %c3_i32_95 = arith.constant 3 : i32
    %c8_i32_96 = arith.constant 8 : i32
    %349 = arith.muli %c3_i32_95, %c8_i32_96 : i32
    %350 = tpu.assume_multiple %349, 8 : i32
    %351 = arith.index_cast %350 : i32 to index
    %c0_97 = arith.constant 0 : index
    %352 = vector.load %arg7[%351, %c0_97] : memref<64x384xf32, #tpu.memory_space<vmem>>, vector<8x384xf32>
    %353 = arith.truncf %347 : vector<8x128xf32> to vector<8x128xbf16>
    %cst_98 = arith.constant dense<0.000000e+00> : vector<8x384xf32>
    %354 = tpu.matmul %353, %8, %cst_98 {dimension_numbers = #tpu.dot_dimension_numbers<[1], [0], [0], [1], [0, 0, 1, 1], [], []>} : vector<8x128xbf16>, vector<128x384xbf16>, vector<8x384xf32> -> vector<8x384xf32>
    %355 = vector.extract_strided_slice %352 {offsets = [0, 0], sizes = [8, 256], strides = [1, 1]} : vector<8x384xf32> to vector<8x256xf32>
    %356 = vector.extract_strided_slice %354 {offsets = [0, 0], sizes = [8, 256], strides = [1, 1]} : vector<8x384xf32> to vector<8x256xf32>
    %357 = arith.addf %355, %356 : vector<8x256xf32>
    %358 = arith.negf %357 : vector<8x256xf32>
    %359 = math.exp %358 : vector<8x256xf32>
    %cst_99 = arith.constant 1.000000e+00 : f32
    %360 = vector.broadcast %cst_99 : f32 to vector<8x256xf32>
    %361 = arith.addf %360, %359 : vector<8x256xf32>
    %362 = arith.divf %360, %361 : vector<8x256xf32>
    %363 = vector.extract_strided_slice %362 {offsets = [0, 0], sizes = [8, 128], strides = [1, 1]} : vector<8x256xf32> to vector<8x128xf32>
    %364 = vector.extract_strided_slice %362 {offsets = [0, 128], sizes = [8, 128], strides = [1, 1]} : vector<8x256xf32> to vector<8x128xf32>
    %365 = vector.extract_strided_slice %352 {offsets = [0, 256], sizes = [8, 128], strides = [1, 1]} : vector<8x384xf32> to vector<8x128xf32>
    %366 = vector.extract_strided_slice %354 {offsets = [0, 256], sizes = [8, 128], strides = [1, 1]} : vector<8x384xf32> to vector<8x128xf32>
    %367 = arith.addf %366, %21 : vector<8x128xf32>
    %368 = arith.mulf %363, %367 : vector<8x128xf32>
    %369 = arith.addf %365, %368 : vector<8x128xf32>
    %370 = math.tanh %369 : vector<8x128xf32>
    %371 = arith.subf %347, %370 : vector<8x128xf32>
    %372 = arith.mulf %364, %371 : vector<8x128xf32>
    %373 = arith.addf %370, %372 : vector<8x128xf32>
    %374 = arith.addf %348, %373 : vector<8x128xf32>
    %c4_i32_100 = arith.constant 4 : i32
    %c8_i32_101 = arith.constant 8 : i32
    %375 = arith.muli %c4_i32_100, %c8_i32_101 : i32
    %376 = tpu.assume_multiple %375, 8 : i32
    %377 = arith.index_cast %376 : i32 to index
    %c0_102 = arith.constant 0 : index
    %378 = vector.load %arg7[%377, %c0_102] : memref<64x384xf32, #tpu.memory_space<vmem>>, vector<8x384xf32>
    %379 = arith.truncf %373 : vector<8x128xf32> to vector<8x128xbf16>
    %cst_103 = arith.constant dense<0.000000e+00> : vector<8x384xf32>
    %380 = tpu.matmul %379, %8, %cst_103 {dimension_numbers = #tpu.dot_dimension_numbers<[1], [0], [0], [1], [0, 0, 1, 1], [], []>} : vector<8x128xbf16>, vector<128x384xbf16>, vector<8x384xf32> -> vector<8x384xf32>
    %381 = vector.extract_strided_slice %378 {offsets = [0, 0], sizes = [8, 256], strides = [1, 1]} : vector<8x384xf32> to vector<8x256xf32>
    %382 = vector.extract_strided_slice %380 {offsets = [0, 0], sizes = [8, 256], strides = [1, 1]} : vector<8x384xf32> to vector<8x256xf32>
    %383 = arith.addf %381, %382 : vector<8x256xf32>
    %384 = arith.negf %383 : vector<8x256xf32>
    %385 = math.exp %384 : vector<8x256xf32>
    %cst_104 = arith.constant 1.000000e+00 : f32
    %386 = vector.broadcast %cst_104 : f32 to vector<8x256xf32>
    %387 = arith.addf %386, %385 : vector<8x256xf32>
    %388 = arith.divf %386, %387 : vector<8x256xf32>
    %389 = vector.extract_strided_slice %388 {offsets = [0, 0], sizes = [8, 128], strides = [1, 1]} : vector<8x256xf32> to vector<8x128xf32>
    %390 = vector.extract_strided_slice %388 {offsets = [0, 128], sizes = [8, 128], strides = [1, 1]} : vector<8x256xf32> to vector<8x128xf32>
    %391 = vector.extract_strided_slice %378 {offsets = [0, 256], sizes = [8, 128], strides = [1, 1]} : vector<8x384xf32> to vector<8x128xf32>
    %392 = vector.extract_strided_slice %380 {offsets = [0, 256], sizes = [8, 128], strides = [1, 1]} : vector<8x384xf32> to vector<8x128xf32>
    %393 = arith.addf %392, %21 : vector<8x128xf32>
    %394 = arith.mulf %389, %393 : vector<8x128xf32>
    %395 = arith.addf %391, %394 : vector<8x128xf32>
    %396 = math.tanh %395 : vector<8x128xf32>
    %397 = arith.subf %373, %396 : vector<8x128xf32>
    %398 = arith.mulf %390, %397 : vector<8x128xf32>
    %399 = arith.addf %396, %398 : vector<8x128xf32>
    %400 = arith.addf %374, %399 : vector<8x128xf32>
    %c5_i32_105 = arith.constant 5 : i32
    %c8_i32_106 = arith.constant 8 : i32
    %401 = arith.muli %c5_i32_105, %c8_i32_106 : i32
    %402 = tpu.assume_multiple %401, 8 : i32
    %403 = arith.index_cast %402 : i32 to index
    %c0_107 = arith.constant 0 : index
    %404 = vector.load %arg7[%403, %c0_107] : memref<64x384xf32, #tpu.memory_space<vmem>>, vector<8x384xf32>
    %405 = arith.truncf %399 : vector<8x128xf32> to vector<8x128xbf16>
    %cst_108 = arith.constant dense<0.000000e+00> : vector<8x384xf32>
    %406 = tpu.matmul %405, %8, %cst_108 {dimension_numbers = #tpu.dot_dimension_numbers<[1], [0], [0], [1], [0, 0, 1, 1], [], []>} : vector<8x128xbf16>, vector<128x384xbf16>, vector<8x384xf32> -> vector<8x384xf32>
    %407 = vector.extract_strided_slice %404 {offsets = [0, 0], sizes = [8, 256], strides = [1, 1]} : vector<8x384xf32> to vector<8x256xf32>
    %408 = vector.extract_strided_slice %406 {offsets = [0, 0], sizes = [8, 256], strides = [1, 1]} : vector<8x384xf32> to vector<8x256xf32>
    %409 = arith.addf %407, %408 : vector<8x256xf32>
    %410 = arith.negf %409 : vector<8x256xf32>
    %411 = math.exp %410 : vector<8x256xf32>
    %cst_109 = arith.constant 1.000000e+00 : f32
    %412 = vector.broadcast %cst_109 : f32 to vector<8x256xf32>
    %413 = arith.addf %412, %411 : vector<8x256xf32>
    %414 = arith.divf %412, %413 : vector<8x256xf32>
    %415 = vector.extract_strided_slice %414 {offsets = [0, 0], sizes = [8, 128], strides = [1, 1]} : vector<8x256xf32> to vector<8x128xf32>
    %416 = vector.extract_strided_slice %414 {offsets = [0, 128], sizes = [8, 128], strides = [1, 1]} : vector<8x256xf32> to vector<8x128xf32>
    %417 = vector.extract_strided_slice %404 {offsets = [0, 256], sizes = [8, 128], strides = [1, 1]} : vector<8x384xf32> to vector<8x128xf32>
    %418 = vector.extract_strided_slice %406 {offsets = [0, 256], sizes = [8, 128], strides = [1, 1]} : vector<8x384xf32> to vector<8x128xf32>
    %419 = arith.addf %418, %21 : vector<8x128xf32>
    %420 = arith.mulf %415, %419 : vector<8x128xf32>
    %421 = arith.addf %417, %420 : vector<8x128xf32>
    %422 = math.tanh %421 : vector<8x128xf32>
    %423 = arith.subf %399, %422 : vector<8x128xf32>
    %424 = arith.mulf %416, %423 : vector<8x128xf32>
    %425 = arith.addf %422, %424 : vector<8x128xf32>
    %426 = arith.addf %400, %425 : vector<8x128xf32>
    %c6_i32_110 = arith.constant 6 : i32
    %c8_i32_111 = arith.constant 8 : i32
    %427 = arith.muli %c6_i32_110, %c8_i32_111 : i32
    %428 = tpu.assume_multiple %427, 8 : i32
    %429 = arith.index_cast %428 : i32 to index
    %c0_112 = arith.constant 0 : index
    %430 = vector.load %arg7[%429, %c0_112] : memref<64x384xf32, #tpu.memory_space<vmem>>, vector<8x384xf32>
    %431 = arith.truncf %425 : vector<8x128xf32> to vector<8x128xbf16>
    %cst_113 = arith.constant dense<0.000000e+00> : vector<8x384xf32>
    %432 = tpu.matmul %431, %8, %cst_113 {dimension_numbers = #tpu.dot_dimension_numbers<[1], [0], [0], [1], [0, 0, 1, 1], [], []>} : vector<8x128xbf16>, vector<128x384xbf16>, vector<8x384xf32> -> vector<8x384xf32>
    %433 = vector.extract_strided_slice %430 {offsets = [0, 0], sizes = [8, 256], strides = [1, 1]} : vector<8x384xf32> to vector<8x256xf32>
    %434 = vector.extract_strided_slice %432 {offsets = [0, 0], sizes = [8, 256], strides = [1, 1]} : vector<8x384xf32> to vector<8x256xf32>
    %435 = arith.addf %433, %434 : vector<8x256xf32>
    %436 = arith.negf %435 : vector<8x256xf32>
    %437 = math.exp %436 : vector<8x256xf32>
    %cst_114 = arith.constant 1.000000e+00 : f32
    %438 = vector.broadcast %cst_114 : f32 to vector<8x256xf32>
    %439 = arith.addf %438, %437 : vector<8x256xf32>
    %440 = arith.divf %438, %439 : vector<8x256xf32>
    %441 = vector.extract_strided_slice %440 {offsets = [0, 0], sizes = [8, 128], strides = [1, 1]} : vector<8x256xf32> to vector<8x128xf32>
    %442 = vector.extract_strided_slice %440 {offsets = [0, 128], sizes = [8, 128], strides = [1, 1]} : vector<8x256xf32> to vector<8x128xf32>
    %443 = vector.extract_strided_slice %430 {offsets = [0, 256], sizes = [8, 128], strides = [1, 1]} : vector<8x384xf32> to vector<8x128xf32>
    %444 = vector.extract_strided_slice %432 {offsets = [0, 256], sizes = [8, 128], strides = [1, 1]} : vector<8x384xf32> to vector<8x128xf32>
    %445 = arith.addf %444, %21 : vector<8x128xf32>
    %446 = arith.mulf %441, %445 : vector<8x128xf32>
    %447 = arith.addf %443, %446 : vector<8x128xf32>
    %448 = math.tanh %447 : vector<8x128xf32>
    %449 = arith.subf %425, %448 : vector<8x128xf32>
    %450 = arith.mulf %442, %449 : vector<8x128xf32>
    %451 = arith.addf %448, %450 : vector<8x128xf32>
    %452 = arith.addf %426, %451 : vector<8x128xf32>
    %c7_i32_115 = arith.constant 7 : i32
    %c8_i32_116 = arith.constant 8 : i32
    %453 = arith.muli %c7_i32_115, %c8_i32_116 : i32
    %454 = tpu.assume_multiple %453, 8 : i32
    %455 = arith.index_cast %454 : i32 to index
    %c0_117 = arith.constant 0 : index
    %456 = vector.load %arg7[%455, %c0_117] : memref<64x384xf32, #tpu.memory_space<vmem>>, vector<8x384xf32>
    %457 = arith.truncf %451 : vector<8x128xf32> to vector<8x128xbf16>
    %cst_118 = arith.constant dense<0.000000e+00> : vector<8x384xf32>
    %458 = tpu.matmul %457, %8, %cst_118 {dimension_numbers = #tpu.dot_dimension_numbers<[1], [0], [0], [1], [0, 0, 1, 1], [], []>} : vector<8x128xbf16>, vector<128x384xbf16>, vector<8x384xf32> -> vector<8x384xf32>
    %459 = vector.extract_strided_slice %456 {offsets = [0, 0], sizes = [8, 256], strides = [1, 1]} : vector<8x384xf32> to vector<8x256xf32>
    %460 = vector.extract_strided_slice %458 {offsets = [0, 0], sizes = [8, 256], strides = [1, 1]} : vector<8x384xf32> to vector<8x256xf32>
    %461 = arith.addf %459, %460 : vector<8x256xf32>
    %462 = arith.negf %461 : vector<8x256xf32>
    %463 = math.exp %462 : vector<8x256xf32>
    %cst_119 = arith.constant 1.000000e+00 : f32
    %464 = vector.broadcast %cst_119 : f32 to vector<8x256xf32>
    %465 = arith.addf %464, %463 : vector<8x256xf32>
    %466 = arith.divf %464, %465 : vector<8x256xf32>
    %467 = vector.extract_strided_slice %466 {offsets = [0, 0], sizes = [8, 128], strides = [1, 1]} : vector<8x256xf32> to vector<8x128xf32>
    %468 = vector.extract_strided_slice %466 {offsets = [0, 128], sizes = [8, 128], strides = [1, 1]} : vector<8x256xf32> to vector<8x128xf32>
    %469 = vector.extract_strided_slice %456 {offsets = [0, 256], sizes = [8, 128], strides = [1, 1]} : vector<8x384xf32> to vector<8x128xf32>
    %470 = vector.extract_strided_slice %458 {offsets = [0, 256], sizes = [8, 128], strides = [1, 1]} : vector<8x384xf32> to vector<8x128xf32>
    %471 = arith.addf %470, %21 : vector<8x128xf32>
    %472 = arith.mulf %467, %471 : vector<8x128xf32>
    %473 = arith.addf %469, %472 : vector<8x128xf32>
    %474 = math.tanh %473 : vector<8x128xf32>
    %475 = arith.subf %451, %474 : vector<8x128xf32>
    %476 = arith.mulf %468, %475 : vector<8x128xf32>
    %477 = arith.addf %474, %476 : vector<8x128xf32>
    %478 = arith.addf %452, %477 : vector<8x128xf32>
    %c8_i32_120 = arith.constant 8 : i32
    %cst_121 = arith.constant 1.250000e-01 : f32
    %479 = vector.broadcast %cst_121 : f32 to vector<8x128xf32>
    %480 = arith.mulf %478, %479 : vector<8x128xf32>
    %481 = arith.truncf %480 : vector<8x128xf32> to vector<8x128xbf16>
    %cst_122 = arith.constant dense<0.000000e+00> : vector<8x128xf32>
    %482 = tpu.matmul %481, %13, %cst_122 {dimension_numbers = #tpu.dot_dimension_numbers<[1], [0], [0], [1], [0, 0, 1, 1], [], []>} : vector<8x128xbf16>, vector<128x128xbf16>, vector<8x128xf32> -> vector<8x128xf32>
    %483 = vector.broadcast %24 : vector<1x128xf32> to vector<8x128xf32>
    %484 = arith.addf %482, %483 : vector<8x128xf32>
    %cst_123 = arith.constant 0.000000e+00 : f32
    %485 = vector.broadcast %cst_123 : f32 to vector<8x128xf32>
    %486 = arith.cmpf ogt, %484, %485 : vector<8x128xf32>
    %cst_124 = arith.constant 2.000000e-01 : f32
    %487 = vector.broadcast %cst_124 : f32 to vector<8x128xf32>
    %488 = arith.mulf %487, %484 : vector<8x128xf32>
    %489 = arith.select %486, %484, %488 : vector<8x128xi1>, vector<8x128xf32>
    %490 = tpu.iota {dimensions = array<i32: 0>} : vector<8x1xi32>
    %c2_i32_125 = arith.constant 2 : i32
    %491 = vector.broadcast %c2_i32_125 : i32 to vector<8x1xi32>
    %492 = arith.cmpi slt, %490, %491 : vector<8x1xi32>
    %493 = arith.extui %492 : vector<8x1xi1> to vector<8x1xi32>
    %494 = arith.sitofp %493 : vector<8x1xi32> to vector<8x1xf32>
    %cst_126 = arith.constant dense<0.000000e+00> : vector<128xf32>
    %495 = vector.multi_reduction <add>, %0, %cst_126 [0] : vector<8x128xf32> to vector<128xf32>
    %496 = vector.shape_cast %495 : vector<128xf32> to vector<1x128xf32>
    %497 = arith.mulf %0, %0 : vector<8x128xf32>
    %cst_127 = arith.constant dense<0.000000e+00> : vector<128xf32>
    %498 = vector.multi_reduction <add>, %497, %cst_127 [0] : vector<8x128xf32> to vector<128xf32>
    %499 = vector.shape_cast %498 : vector<128xf32> to vector<1x128xf32>
    %cst_128 = arith.constant 2.000000e+00 : f32
    %500 = vector.broadcast %cst_128 : f32 to vector<8x128xf32>
    %501 = arith.mulf %500, %489 : vector<8x128xf32>
    %502 = vector.broadcast %496 : vector<1x128xf32> to vector<8x128xf32>
    %503 = arith.mulf %501, %502 : vector<8x128xf32>
    %504 = vector.broadcast %499 : vector<1x128xf32> to vector<8x128xf32>
    %505 = arith.subf %504, %503 : vector<8x128xf32>
    %cst_129 = arith.constant 2.000000e+00 : f32
    %506 = vector.broadcast %cst_129 : f32 to vector<8x128xf32>
    %507 = arith.mulf %506, %489 : vector<8x128xf32>
    %508 = arith.mulf %507, %489 : vector<8x128xf32>
    %509 = arith.addf %505, %508 : vector<8x128xf32>
    %cst_130 = arith.constant 0.000000e+00 : f32
    %510 = vector.broadcast %cst_130 : f32 to vector<8x128xf32>
    %511 = arith.maximumf %509, %510 : vector<8x128xf32>
    %512 = math.sqrt %511 : vector<8x128xf32>
    %513 = vector.broadcast %494 : vector<8x1xf32> to vector<8x128xf32>
    %514 = arith.mulf %512, %513 : vector<8x128xf32>
    %515 = vector.shape_cast %514 : vector<8x128xf32> to vector<1x8x128xf32>
    %cst_131 = arith.constant dense<0.000000e+00> : vector<1xf32>
    %516 = vector.multi_reduction <add>, %515, %cst_131 [1, 2] : vector<1x8x128xf32> to vector<1xf32>
    %517 = vector.shape_cast %516 : vector<1xf32> to vector<1x1x1xf32>
    %518 = vector.extract %517[0, 0, 0] : f32 from vector<1x1x1xf32>
    %cst_132 = arith.constant 6.400000e+01 : f32
    %519 = arith.divf %518, %cst_132 : f32
    %c0_133 = arith.constant 0 : index
    %c0_134 = arith.constant 0 : index
    %520 = memref.load %arg4[%c0_133, %c0_134] : memref<1x1xf32, #tpu.memory_space<smem>>
    memref.store %519, %arg4[%c0_133, %c0_134] : memref<1x1xf32, #tpu.memory_space<smem>>
    %521 = arith.mulf %0, %0 : vector<8x128xf32>
    %cst_135 = arith.constant dense<0.000000e+00> : vector<8xf32>
    %522 = vector.multi_reduction <add>, %521, %cst_135 [1] : vector<8x128xf32> to vector<8xf32>
    %523 = vector.shape_cast %522 : vector<8xf32> to vector<8x1xf32>
    %cst_136 = arith.constant 1.000000e-24 : f32
    %524 = vector.broadcast %cst_136 : f32 to vector<8x1xf32>
    %525 = arith.maximumf %523, %524 : vector<8x1xf32>
    %526 = math.rsqrt %525 : vector<8x1xf32>
    %527 = arith.mulf %489, %489 : vector<8x128xf32>
    %cst_137 = arith.constant dense<0.000000e+00> : vector<8xf32>
    %528 = vector.multi_reduction <add>, %527, %cst_137 [1] : vector<8x128xf32> to vector<8xf32>
    %529 = vector.shape_cast %528 : vector<8xf32> to vector<8x1xf32>
    %cst_138 = arith.constant 1.000000e-24 : f32
    %530 = vector.broadcast %cst_138 : f32 to vector<8x1xf32>
    %531 = arith.maximumf %529, %530 : vector<8x1xf32>
    %532 = math.rsqrt %531 : vector<8x1xf32>
    %533 = arith.mulf %0, %489 : vector<8x128xf32>
    %cst_139 = arith.constant dense<0.000000e+00> : vector<8xf32>
    %534 = vector.multi_reduction <add>, %533, %cst_139 [1] : vector<8x128xf32> to vector<8xf32>
    %535 = vector.shape_cast %534 : vector<8xf32> to vector<8x1xf32>
    %536 = arith.mulf %535, %526 : vector<8x1xf32>
    %537 = arith.mulf %536, %532 : vector<8x1xf32>
    %538 = arith.mulf %537, %494 : vector<8x1xf32>
    %539 = vector.shape_cast %538 : vector<8x1xf32> to vector<1x8x1xf32>
    %cst_140 = arith.constant dense<0.000000e+00> : vector<1xf32>
    %540 = vector.multi_reduction <add>, %539, %cst_140 [1, 2] : vector<1x8x1xf32> to vector<1xf32>
    %541 = vector.shape_cast %540 : vector<1xf32> to vector<1x1x1xf32>
    %542 = vector.extract %541[0, 0, 0] : f32 from vector<1x1x1xf32>
    %cst_141 = arith.constant 2.000000e+00 : f32
    %543 = arith.divf %542, %cst_141 : f32
    %c0_142 = arith.constant 0 : index
    %c0_143 = arith.constant 0 : index
    %544 = memref.load %arg5[%c0_142, %c0_143] : memref<1x1xf32, #tpu.memory_space<smem>>
    memref.store %543, %arg5[%c0_142, %c0_143] : memref<1x1xf32, #tpu.memory_space<smem>>
    return
  }
}

</mosaic_0001>

<bundles_post_ra>
// kernel: tpu_custom_call.1
= control target key start
LH: loop header
LB: loop body
LE: loop exit
PB: predicated region body
PF: predicated region fallthrough
CT: control target
= control target key end

     0   :  { %11 = vsyncpa [#allocation5], 0  ;;  %s5755_s0 = inlined_call_operand.hbm [shape: bf16[64,128], index: 0, kind: input, shape index: {}]   ;;  %s5756_s1 = inlined_call_operand.hbm [shape: f32[8,128], index: 1, kind: input, shape index: {}]   ;;  %s5757_s2 = inlined_call_operand.hbm [shape: bf16[5,128,384], index: 2, kind: input, shape index: {}]   ;;  %s5758_s3 = inlined_call_operand.hbm [shape: f32[8,384], index: 3, kind: input, shape index: {}]   ;;  %s5759_s4 = inlined_call_operand.hbm [shape: f32[1,1], index: 4, kind: output, shape index: {0}]   ;;  %s5760_s5 = inlined_call_operand.hbm [shape: f32[1,1], index: 5, kind: output, shape index: {1}]  }
   0x1   :  { %12 = vsyncpa [#allocation8], 0 }
   0x2   :  { %13 = vsyncpa [#allocation11], 0 }
   0x3   :  { %14 = vsyncpa [#allocation6], 0 }
   0x4   :  { %15 = vsyncpa [#allocation14], 0  ;;  %s4624_s18 = smov [#allocation7]   ;;  %s4625_s20 = smov [#allocation4]  }
   0x5   :  { %s34_s19 = sshll.u32 %s4624_s18, 4  ;;  %s21_s21 = sshll.u32 %s4625_s20, 4  ;;  %s35_s19 = int_to_ptr.vmem [resolvable:$true] %s34_s19  ;;  %s4667_s21 = int_to_ptr.vmem [resolvable:$true] %s21_s21 }
   0x6   :  { %s4506_s24 = scalar_lea.hbm %s5756_s1, 128 }
   0x7   :  { %p4507_p0 = scmp.ne.s32.totalorder %s5756_s1, %s4506_s24  ;;  %p4510_p1 = scmp.lt.u32.totalorder %s4506_s24, %s5756_s1 }
   0x9   :  { %p4512_p2 = pnand %p4510_p1, %p4507_p0 }
   0xb   :  { %4515 = shalt.err (!%p4512_p2)
}
   0xc   :  { %s4516_s29 = scalar_lea.vmem %s35_s19, 128  ;;  %p4521_p4 = scmp.lt.s32.totalorder %s35_s19, %s35_s19 }
   0xd   :  { %p4517_p3 = scmp.ne.s32.totalorder %s35_s19, %s4516_s29  ;;  %p4522_p5 = scmp.lt.s32.totalorder %s4516_s29, %s4516_s29 }
   0xf   :  { %p4523_p6 = por %p4522_p5, %p4521_p4 }
  0x11   :  { %p4524_p7 = pnand %p4523_p6, %p4517_p3 }
  0x13   :  { %4527 = shalt.err (!%p4524_p7)
}
  0x14   :  { %37 = dma.hbm_to_vmem [thread:$0]  %s5756_s1, 128, %s35_s19, [#allocation8]  }
  0x15   :  { %s4528_s9 = scalar_lea.hbm %s5755_s0, 512 }
  0x16   :  { %p4529_p8 = scmp.ne.s32.totalorder %s5755_s0, %s4528_s9  ;;  %p4532_p9 = scmp.lt.u32.totalorder %s4528_s9, %s5755_s0 }
  0x18   :  { %p4534_p10 = pnand %p4532_p9, %p4529_p8 }
  0x1a   :  { %4537 = shalt.err (!%p4534_p10)
}
  0x1b   :  { %s4538_s14 = scalar_lea.vmem %s4667_s21, 512  ;;  %p4543_p12 = scmp.lt.s32.totalorder %s4667_s21, %s4667_s21 }
  0x1c   :  { %p4539_p11 = scmp.ne.s32.totalorder %s4667_s21, %s4538_s14  ;;  %p4544_p13 = scmp.lt.s32.totalorder %s4538_s14, %s4538_s14 }
  0x1e   :  { %p4545_p0 = por %p4544_p13, %p4543_p12 }
  0x20   :  { %p4546_p1 = pnand %p4545_p0, %p4539_p11 }
  0x22   :  { %4549 = shalt.err (!%p4546_p1)
}
  0x23   :  { %s4626_s1 = smov 64   ;;  %s4627_s15 = smov 4  }
  0x24   :  { %27 = dma.hbm_to_vmem [thread:$0]  %s5755_s0, 512, %s4667_s21, [#allocation5], %s4626_s1, %s4626_s1, %s4627_s15  }
  0x25   :  { %s4628_s18 = smov [#allocation9]   ;;  %s4550_s23 = scalar_lea.hbm %s5757_s2, 15360 }
  0x26   :  { %s43_s19 = sshll.u32 %s4628_s18, 4  ;;  %p4551_p2 = scmp.ne.s32.totalorder %s5757_s2, %s4550_s23  ;;  %s44_s19 = int_to_ptr.vmem [resolvable:$true] %s43_s19 }
  0x27   :  { %p4554_p3 = scmp.lt.u32.totalorder %s4550_s23, %s5757_s2 }
  0x29   :  { %p4556_p4 = pnand %p4554_p3, %p4551_p2 }
  0x2b   :  { %4559 = shalt.err (!%p4556_p4)
}
  0x2c   :  { %s4560_s28 = scalar_lea.vmem %s44_s19, 15360  ;;  %p4565_p6 = scmp.lt.s32.totalorder %s44_s19, %s44_s19 }
  0x2d   :  { %p4561_p5 = scmp.ne.s32.totalorder %s44_s19, %s4560_s28  ;;  %p4566_p7 = scmp.lt.s32.totalorder %s4560_s28, %s4560_s28 }
  0x2f   :  { %p4567_p8 = por %p4566_p7, %p4565_p6 }
  0x31   :  { %p4568_p9 = pnand %p4567_p8, %p4561_p5 }
  0x33   :  { %4571 = shalt.err (!%p4568_p9)
}
  0x34   :  { %s4629_s0 = smov 192   ;;  %s4630_s21 = smov 12  }
  0x35   :  { %49 = dma.hbm_to_vmem [thread:$0]  %s5757_s2, 15360, %s44_s19, [#allocation8], %s4629_s0, %s4629_s0, %s4630_s21  }
  0x36   :  { %s4631_s6 = smov [#allocation10]   ;;  %s4572_s10 = scalar_lea.hbm %s5758_s3, 384 }
  0x37   :  { %s56_s7 = sshll.u32 %s4631_s6, 4  ;;  %p4573_p10 = scmp.ne.s32.totalorder %s5758_s3, %s4572_s10  ;;  %s57_s7 = int_to_ptr.vmem [resolvable:$true] %s56_s7 }
  0x38   :  { %p4576_p11 = scmp.lt.u32.totalorder %s4572_s10, %s5758_s3 }
  0x3a   :  { %p4578_p12 = pnand %p4576_p11, %p4573_p10 }
  0x3c   :  { %4581 = shalt.err (!%p4578_p12)
}
  0x3d   :  { %s4582_s1 = scalar_lea.vmem %s57_s7, 384  ;;  %p4587_p0 = scmp.lt.s32.totalorder %s57_s7, %s57_s7 }
  0x3e   :  { %p4583_p13 = scmp.ne.s32.totalorder %s57_s7, %s4582_s1  ;;  %p4588_p1 = scmp.lt.s32.totalorder %s4582_s1, %s4582_s1 }
  0x40   :  { %p4589_p2 = por %p4588_p1, %p4587_p0 }
  0x42   :  { %p4590_p3 = pnand %p4589_p2, %p4583_p13 }
  0x44   :  { %4593 = shalt.err (!%p4590_p3)
}
  0x45   :  { %59 = dma.hbm_to_vmem [thread:$0]  %s5758_s3, 384, %s57_s7, [#allocation11]  }
  0x46   :  { %4614 = dma.done.wait [#allocation5], 512  }
  0x47   :  { %4615 = vsyncadd [#allocation5], 4294966784 }
  0x48   :  { %4616 = dma.done.wait [#allocation8], 15488  }
  0x49   :  { %4617 = vsyncadd [#allocation8], 4294951808 }
  0x4a   :  { %4618 = dma.done.wait [#allocation11], 384  }
  0x4b   :  { %4619 = vsyncadd [#allocation11], 4294966912  ;;  %v5764_v0 = vmov 0   ;;  %v4127_v1 = vld [vmem:[#allocation9 + $0x4] ss:$12 sps:$4 sm:$0xff]   ;;  %v4153_v12 = vld [vmem:[#allocation4] sm:$0xff]   ;;  %v255_v56 = vlaneseq }
  0x4c   :  { %454 = vmatprep.mubr.bf16.mxu0 %v5764_v0  ;;  %v4129_v2 = vld [vmem:[#allocation9] ss:$12 sps:$4 sm:$0xff]   ;;  %422 = vmatprep.subr.bf16.mxu0 %v4127_v1  ;;  %v4130_v3 = vld [vmem:[#allocation9 + $0x1c] ss:$12 sps:$4 sm:$0xff]   ;;  %v4132_v4 = vld [vmem:[#allocation9 + $0x18] ss:$12 sps:$4 sm:$0xff]  }
  0x4d   :  { %423 = vmatpush1.bf16.msra.mxu0 %v4129_v2  ;;  %v4133_v5 = vld [vmem:[#allocation9 + $0x34] ss:$12 sps:$4 sm:$0xff]   ;;  %v4135_v6 = vld [vmem:[#allocation9 + $0x30] ss:$12 sps:$4 sm:$0xff]   ;;  %v4136_v7 = vld [vmem:[#allocation9 + $0x4c] ss:$12 sps:$4 sm:$0xff]   ;;  %3694 = vmatprep.mubr.bf16.mxu1 %v4153_v12 }
  0x4e   :  { %424 = vmatprep.subr.bf16.mxu0 %v4130_v3  ;;  %v4147_v8 = vld [vmem:[#allocation9 + $0x8] ss:$12 sps:$4 sm:$0xff]   ;;  %v4139_v10 = vld [vmem:[#allocation9 + $0x64] ss:$12 sps:$4 sm:$0xff]   ;;  %v4151_v11 = vld [vmem:[#allocation9 + $0x20] ss:$12 sps:$4 sm:$0xff]  }
  0x4f   :  { %v4138_v9 = vld [vmem:[#allocation9 + $0x48] ss:$12 sps:$4 sm:$0xff]   ;;  %3678 = vmatprep.subr.bf16.mxu1 %v4147_v8  ;;  %v4154_v13 = vld [vmem:[#allocation9 + $0x38] ss:$12 sps:$4 sm:$0xff]   ;;  %v4141_v14 = vld [vmem:[#allocation9 + $0x60] ss:$12 sps:$4 sm:$0xff]  }
  0x50   :  { %3679 = vmatpush3.bf16.msra.mxu1 %v4147_v8  ;;  %v4142_v15 = vld [vmem:[#allocation9 + $0x7c] ss:$12 sps:$4 sm:$0xff]   ;;  %v4144_v17 = vld [vmem:[#allocation9 + $0x78] ss:$12 sps:$4 sm:$0xff]   ;;  %v4145_v18 = vld [vmem:[#allocation9 + $0x94] ss:$12 sps:$4 sm:$0xff]  }
  0x51   :  { %425 = vmatpush1.bf16.msra.mxu0 %v4132_v4  ;;  %3680 = vmatprep.subr.bf16.mxu1 %v4151_v11  ;;  %v4158_v16 = vld [vmem:[#allocation9 + $0x50] ss:$12 sps:$4 sm:$0xff]   ;;  %v4163_v19 = vld [vmem:[#allocation9 + $0x68] ss:$12 sps:$4 sm:$0xff]   ;;  %v4149_v21 = vld [vmem:[#allocation9 + $0xac] ss:$12 sps:$4 sm:$0xff]  }
  0x52   :  { %426 = vmatprep.subr.bf16.mxu0 %v4133_v5  ;;  %v4148_v20 = vld [vmem:[#allocation9 + $0x90] ss:$12 sps:$4 sm:$0xff]   ;;  %v4167_v22 = vld [vmem:[#allocation9 + $0x80] ss:$12 sps:$4 sm:$0xff]   ;;  %v4152_v23 = vld [vmem:[#allocation9 + $0xa8] ss:$12 sps:$4 sm:$0xff]  }
  0x53   :  { %v4723_v24 = vld [vmem:[#allocation9 + $0xc4] ss:$12 sps:$4 sm:$0xff]   ;;  %v4725_v26 = vld [vmem:[#allocation9 + $0xc0] ss:$12 sps:$4 sm:$0xff]   ;;  %v4728_v27 = vld [vmem:[#allocation9 + $0xdc] ss:$12 sps:$4 sm:$0xff]  }
  0x54   :  { %3681 = vmatpush3.bf16.msra.mxu1 %v4151_v11  ;;  %v4172_v25 = vld [vmem:[#allocation9 + $0x98] ss:$12 sps:$4 sm:$0xff]   ;;  %v4176_v28 = vld [vmem:[#allocation9 + $0xb0] ss:$12 sps:$4 sm:$0xff]   ;;  %v4735_v30 = vld [vmem:[#allocation9 + $0xf4] ss:$12 sps:$4 sm:$0xff]  }
  0x55   :  { %427 = vmatpush1.bf16.msra.mxu0 %v4135_v6  ;;  %3682 = vmatprep.subr.bf16.mxu1 %v4154_v13  ;;  %v4731_v29 = vld [vmem:[#allocation9 + $0xd8] ss:$12 sps:$4 sm:$0xff]   ;;  %v4738_v32 = vld [vmem:[#allocation9 + $0xf0] ss:$12 sps:$4 sm:$0xff]   ;;  %v4743_v34 = vld [vmem:[#allocation9 + $0x108] ss:$12 sps:$4 sm:$0xff]  }
  0x56   :  { %428 = vmatprep.subr.bf16.mxu0 %v4136_v7  ;;  %v4162_v31 = vld [vmem:[#allocation4 + $0x8] sm:$0xff]   ;;  %v4741_v33 = vld [vmem:[#allocation9 + $0x10c] ss:$12 sps:$4 sm:$0xff]   ;;  %v5766_v36 = vmov 0.0   ;;  %v4746_v37 = vld [vmem:[#allocation9 + $0xc8] ss:$12 sps:$4 sm:$0xff]  }
  0x57   :  { %v4171_v35 = vld [vmem:[#allocation4 + $0x10] sm:$0xff]   ;;  %v4748_v38 = vld [vmem:[#allocation9 + $0x124] ss:$12 sps:$4 sm:$0xff]   ;;  %v4768_v45 = vld [vmem:[#allocation9 + $0x154] ss:$12 sps:$4 sm:$0xff]   ;;  %vm4634_vm0 = vmmov 0  }
  0x58   :  { %3683 = vmatpush3.bf16.msra.mxu1 %v4154_v13  ;;  %v4752_v39 = vld [vmem:[#allocation9 + $0xe0] ss:$12 sps:$4 sm:$0xff]   ;;  %v4758_v41 = vld [vmem:[#allocation9 + $0x13c] ss:$12 sps:$4 sm:$0xff]   ;;  %v4762_v42 = vld [vmem:[#allocation9 + $0xf8] ss:$12 sps:$4 sm:$0xff]  }
  0x59   :  { %429 = vmatpush1.bf16.msra.mxu0 %v4138_v9  ;;  %3684 = vmatprep.subr.bf16.mxu1 %v4158_v16  ;;  %v4755_v40 = vld [vmem:[#allocation9 + $0x120] ss:$12 sps:$4 sm:$0xff]   ;;  %v4180_v43 = vld [vmem:[#allocation4 + $0x18] sm:$0xff]   ;;  %v4765_v44 = vld [vmem:[#allocation9 + $0x138] ss:$12 sps:$4 sm:$0xff]   ;;  %v4850_v57 = vshrl.u32 %v255_v56, 7 }
  0x5a   :  { %430 = vmatprep.subr.bf16.mxu0 %v4139_v10  ;;  %v4773_v46 = vld [vmem:[#allocation9 + $0x110] ss:$12 sps:$4 sm:$0xff]   ;;  %v4781_v48 = vld [vmem:[#allocation9 + $0x16c] ss:$12 sps:$4 sm:$0xff]   ;;  %v4785_v49 = vld [vmem:[#allocation9 + $0x128] ss:$12 sps:$4 sm:$0xff]  }
  0x5b   :  { %v4776_v47 = vld [vmem:[#allocation9 + $0x150] ss:$12 sps:$4 sm:$0xff]   ;;  %v4788_v50 = vld [vmem:[#allocation9 + $0x168] ss:$12 sps:$4 sm:$0xff]   ;;  %v4796_v52 = vld [vmem:[#allocation9 + $0x140] ss:$12 sps:$4 sm:$0xff]  }
  0x5c   :  { %3685 = vmatpush3.bf16.msra.mxu1 %v4158_v16  ;;  %v4790_v51 = vld [vmem:[#allocation7] sm:$0xff]  ;;  %5770 = vst [vmem:[#allocation20_spill] sm:$0xff] %v4850_v57  ;;  %v5763_v58 = vsub.s32 0, %v4850_v57  ;;  %v238_v59 = vld [vmem:[#allocation10] ss:$8 sm:$0x7] }
  0x5d   :  { %431 = vmatpush1.bf16.msra.mxu0 %v4141_v14  ;;  %3686 = vmatprep.subr.bf16.mxu1 %v4163_v19  ;;  %v590_v53 = vpack.c.bf16 %v4790_v51, %v4790_v51  ;;  %v4804_v54 = vld [vmem:[#allocation9 + $0x158] ss:$12 sps:$4 sm:$0xff]   ;;  %v4809_v55 = vld [vmem:[#allocation9 + $0x170] ss:$12 sps:$4 sm:$0xff]   ;;  %v5762_v60 = vsub.s32 1, %v4850_v57  ;;  %v5761_v5 = vsub.s32 2, %v4850_v57 }
  0x5e   :  { %432 = vmatprep.subr.bf16.mxu0 %v4142_v15  ;;  %v258_v62 = vrot.slane %v238_v59, %v5763_v58  ;;  %vm3272_vm14 = vcmask 7168   ;;  %s4594_s19 = scalar_lea.hbm %s5759_s4, 16 }
  0x5f   :  { %v262_v1 = vrot.slane %v238_v59, %v5762_v60  ;;  %v4865_v7 = vrot.slane %v238_v59, %v5761_v5  ;;  %p4595_p4 = scmp.ne.s32.totalorder %s5759_s4, %s4594_s19  ;;  %p4598_p5 = scmp.lt.u32.totalorder %s4594_s19, %s5759_s4 }
  0x60   :  { %3687 = vmatpush3.bf16.msra.mxu1 %v4163_v19 }
  0x61   :  { %433 = vmatpush1.bf16.msra.mxu0 %v4144_v17  ;;  %3688 = vmatprep.subr.bf16.mxu1 %v4167_v22  ;;  %p4600_p6 = pnand %p4598_p5, %p4595_p4 }
  0x62   :  { %434 = vmatprep.subr.bf16.mxu0 %v4145_v18 }
  0x64   :  { %3689 = vmatpush3.bf16.msra.mxu1 %v4167_v22 }
  0x65   :  { %435 = vmatpush1.bf16.msra.mxu0 %v4148_v20  ;;  %3690 = vmatprep.subr.bf16.mxu1 %v4172_v25 }
  0x66   :  { %436 = vmatprep.subr.bf16.mxu0 %v4149_v21 }
  0x68   :  { %3691 = vmatpush3.bf16.msra.mxu1 %v4172_v25 }
  0x69   :  { %437 = vmatpush1.bf16.msra.mxu0 %v4152_v23  ;;  %3692 = vmatprep.subr.bf16.mxu1 %v4176_v28 }
  0x6a   :  { %719 = vmatprep.subr.bf16.mxu0 %v4723_v24 }
  0x6c   :  { %455 = vmatmul.mubr.bf16.vlgmr.msra.gmra.mrb[0].mxu0 %v4153_v12  ;;  %3693 = vmatpush3.bf16.msra.mxu1 %v4176_v28 }
  0x6d   :  { %720 = vmatpush1.bf16.msra.mxu0 %v4725_v26  ;;  %464 = vmatprep.mubr.bf16.mxu0 %v5764_v0 }
  0x6e   :  { %721 = vmatprep.subr.bf16.mxu0 %v4728_v27  ;;  %3702 = vmatprep.subr.bf16.mxu1 %v5766_v36 }
  0x6f   :  { %3695 = vmatmul.mubr.bf16.vlgmr.msra.gmra.mrb[0].mxu1 %v4162_v31 }
  0x70   :  { %3703 = vmatpush3.bf16.msra.mxu1 %v4746_v37  ;;  %3698 = vmatprep.mubr.bf16.mxu1 %v4171_v35 }
  0x71   :  { %722 = vmatpush1.bf16.msra.mxu0 %v4731_v29  ;;  %3704 = vmatprep.subr.bf16.mxu1 %v5766_v36 }
  0x72   :  { %723 = vmatprep.subr.bf16.mxu0 %v4735_v30 }
  0x74   :  { %465 = vmatmul.mubr.bf16.gmra.mrb[4].mxu0 %v4162_v31  ;;  %3705 = vmatpush3.bf16.msra.mxu1 %v4752_v39 }
  0x75   :  { %724 = vmatpush1.bf16.msra.mxu0 %v4738_v32  ;;  %474 = vmatprep.mubr.bf16.mxu0 %v5764_v0 }
  0x76   :  { %725 = vmatprep.subr.bf16.mxu0 %v4741_v33  ;;  %3706 = vmatprep.subr.bf16.mxu1 %v5766_v36 }
  0x77   :  { %3699 = vmatmul.mubr.bf16.gmra.mrb[4].mxu1 %v4180_v43 }
  0x78   :  { %3707 = vmatpush3.bf16.msra.mxu1 %v4762_v42  ;;  %3718 = vmatprep.mubr.msk.bf16.mxu1 %vm4634_vm0, %v5766_v36 }
  0x79   :  { %726 = vmatpush1.bf16.msra.mxu0 %v4743_v34  ;;  %3708 = vmatprep.subr.bf16.mxu1 %v5766_v36 }
  0x7a   :  { %727 = vmatprep.subr.bf16.mxu0 %v4748_v38 }
  0x7c   :  { %475 = vmatmul.mubr.bf16.gmra.mrb[8].mxu0 %v4171_v35  ;;  %3709 = vmatpush3.bf16.msra.mxu1 %v4773_v46 }
  0x7d   :  { %728 = vmatpush1.bf16.msra.mxu0 %v4755_v40  ;;  %484 = vmatprep.mubr.bf16.mxu0 %v5764_v0 }
  0x7e   :  { %729 = vmatprep.subr.bf16.mxu0 %v4758_v41  ;;  %3710 = vmatprep.subr.bf16.mxu1 %v5766_v36 }
  0x80   :  { %3711 = vmatpush3.bf16.msra.mxu1 %v4785_v49 }
  0x81   :  { %730 = vmatpush1.bf16.msra.mxu0 %v4765_v44  ;;  %3712 = vmatprep.subr.bf16.mxu1 %v5766_v36 }
  0x82   :  { %731 = vmatprep.subr.bf16.mxu0 %v4768_v45 }
  0x84   :  { %485 = vmatmul.mubr.bf16.gmra.mrb[12].mxu0 %v4180_v43  ;;  %3713 = vmatpush3.bf16.msra.mxu1 %v4796_v52 }
  0x85   :  { %732 = vmatpush1.bf16.msra.mxu0 %v4776_v47  ;;  %751 = vmatprep.mubr.bf16.mxu0 %v5764_v0 }
  0x86   :  { %733 = vmatprep.subr.bf16.mxu0 %v4781_v48  ;;  %3714 = vmatprep.subr.bf16.mxu1 %v5766_v36 }
  0x88   :  { %3715 = vmatpush3.bf16.msra.mxu1 %v4804_v54 }
  0x89   :  { %734 = vmatpush1.bf16.msra.mxu0 %v4788_v50  ;;  %3716 = vmatprep.subr.bf16.mxu1 %v5766_v36 }
  0x8a   :  { %829 = vmatprep.subr.bf16.mxu0 %v4723_v24 }
  0x8c   :  { %752 = vmatmul.mubr.bf16.vlgmr.msra.gmra.mrb[16].mxu0 %v590_v53  ;;  %3717 = vmatpush3.bf16.msra.mxu1 %v4809_v55 }
  0x8d   :  { %830 = vmatpush1.bf16.msra.mxu0 %v4725_v26  ;;  %861 = vmatprep.mubr.bf16.mxu0 %v5764_v0 }
  0x8e   :  { %831 = vmatprep.subr.bf16.mxu0 %v4728_v27  ;;  %3722 = vmatprep.subr.bf16.mxu1 %v5766_v36 }
  0x8f   :  { %3719 = vmatmul.mubr.bf16.vlgmr.msra.gmra.mrb[8].mxu1 %v590_v53 }
  0x90   :  { %3723 = vmatpush3.bf16.msra.mxu1 %v4746_v37  ;;  %3738 = vmatprep.mubr.msk.bf16.mxu1 %vm4634_vm0, %v5766_v36 }
  0x91   :  { %832 = vmatpush1.bf16.msra.mxu0 %v4731_v29  ;;  %3724 = vmatprep.subr.bf16.mxu1 %v5766_v36 }
  0x92   :  { %833 = vmatprep.subr.bf16.mxu0 %v4735_v30 }
  0x94   :  { %3725 = vmatpush3.bf16.msra.mxu1 %v4752_v39 }
  0x95   :  { %834 = vmatpush1.bf16.msra.mxu0 %v4738_v32  ;;  %3726 = vmatprep.subr.bf16.mxu1 %v5766_v36 }
  0x96   :  { %835 = vmatprep.subr.bf16.mxu0 %v4741_v33 }
  0x98   :  { %3727 = vmatpush3.bf16.msra.mxu1 %v4762_v42 }
  0x99   :  { %836 = vmatpush1.bf16.msra.mxu0 %v4743_v34  ;;  %3728 = vmatprep.subr.bf16.mxu1 %v5766_v36 }
  0x9a   :  { %837 = vmatprep.subr.bf16.mxu0 %v4748_v38 }
  0x9c   :  { %3729 = vmatpush3.bf16.msra.mxu1 %v4773_v46 }
  0x9d   :  { %838 = vmatpush1.bf16.msra.mxu0 %v4755_v40  ;;  %3730 = vmatprep.subr.bf16.mxu1 %v5766_v36 }
  0x9e   :  { %839 = vmatprep.subr.bf16.mxu0 %v4758_v41 }
  0xa0   :  { %3731 = vmatpush3.bf16.msra.mxu1 %v4785_v49 }
  0xa1   :  { %840 = vmatpush1.bf16.msra.mxu0 %v4765_v44  ;;  %3732 = vmatprep.subr.bf16.mxu1 %v5766_v36 }
  0xa2   :  { %841 = vmatprep.subr.bf16.mxu0 %v4768_v45 }
  0xa4   :  { %3733 = vmatpush3.bf16.msra.mxu1 %v4796_v52 }
  0xa5   :  { %842 = vmatpush1.bf16.msra.mxu0 %v4776_v47  ;;  %3734 = vmatprep.subr.bf16.mxu1 %v5766_v36 }
  0xa6   :  { %843 = vmatprep.subr.bf16.mxu0 %v4781_v48 }
  0xa8   :  { %3735 = vmatpush3.bf16.msra.mxu1 %v4804_v54 }
  0xa9   :  { %844 = vmatpush1.bf16.msra.mxu0 %v4788_v50  ;;  %3736 = vmatprep.subr.bf16.mxu1 %v5766_v36 }
  0xaa   :  { %940 = vmatprep.subr.bf16.mxu0 %v4723_v24 }
  0xac   :  { %3737 = vmatpush3.bf16.msra.mxu1 %v4809_v55 }
  0xad   :  { %3742 = vmatprep.subr.bf16.mxu1 %v5766_v36 }
 0x13f   :  { %v456_v61 = vpop.f32.mrb[0].mxu0 }
 0x140   :  { %v458_v63 = vpop.f32.mrb[1].mxu0  ;;  %v457_v5 = vadd.f32 %v456_v61, %v258_v62 }
 0x141   :  { %v460_v2 = vpop.f32.mrb[2].mxu0  ;;  %v459_v60 = vadd.f32 %v458_v63, %v262_v1 }
 0x142   :  { %v4858_v3 = vadd.f32 %v460_v2, %v258_v62  ;;  %v462_v4 = vpop.f32.mrb[3].mxu0  ;;  %v3696_v13 = vpop.f32.mrb[0].mxu1 }
 0x143   :  { %v4861_v6 = vadd.f32 %v462_v4, %v262_v1  ;;  %v4874_v16 = vadd.f32 %v3696_v13, %v4865_v7  ;;  %v529_v17 = vpop.f32.mrb[1].mxu1 }
 0x144   :  { %v3697_v19 = vpop.f32.mrb[2].mxu1 }
 0x145   :  { %v4879_v20 = vadd.f32 %v3697_v19, %v4865_v7  ;;  %v532_v21 = vpop.f32.mrb[3].mxu1 }
 0x146   :  { %v4882_v22 = vadd.f32 %v532_v21, %v4865_v7 }
 0x147   :  { %v466_v8 = vpop.f32.mrb[4].mxu0 }
 0x148   :  { %v4867_v9 = vadd.f32 %v466_v8, %v258_v62  ;;  %v468_v10 = vpop.f32.mrb[5].mxu0 }
 0x149   :  { %v4869_v11 = vadd.f32 %v468_v10, %v262_v1  ;;  %v470_v12 = vpop.f32.mrb[6].mxu0 }
 0x14a   :  { %v4871_v14 = vadd.f32 %v470_v12, %v258_v62  ;;  %v472_v15 = vpop.f32.mrb[7].mxu0  ;;  %v3700_v43 = vpop.f32.mrb[4].mxu1 }
 0x14b   :  { %v4876_v18 = vadd.f32 %v472_v15, %v262_v1  ;;  %v4891_v59 = vadd.f32 %v3700_v43, %v4865_v7  ;;  %v545_v2 = vpop.f32.mrb[5].mxu1 }
 0x14c   :  { %v4896_v8 = vadd.f32 %v545_v2, %v4865_v7  ;;  %v3701_v10 = vpop.f32.mrb[6].mxu1 }
 0x14d   :  { %5771 = vst [vmem:[#allocation21_spill] sm:$0xff] %v4891_v59  ;;  %v4899_v12 = vadd.f32 %v3701_v10, %v4865_v7  ;;  %v548_v13 = vpop.f32.mrb[7].mxu1 }
 0x14e   :  { %v4902_v15 = vadd.f32 %v548_v13, %v4865_v7 }
 0x14f   :  { %v476_v23 = vpop.f32.mrb[8].mxu0  ;;  %5772 = vst [vmem:[#allocation22_spill] sm:$0xff] %v4899_v12 }
 0x150   :  { %v4884_v25 = vadd.f32 %v476_v23, %v258_v62  ;;  %v478_v28 = vpop.f32.mrb[9].mxu0 }
 0x151   :  { %v4886_v31 = vadd.f32 %v478_v28, %v262_v1  ;;  %v480_v35 = vpop.f32.mrb[10].mxu0 }
 0x152   :  { %v4888_v53 = vadd.f32 %v480_v35, %v258_v62  ;;  %v482_v56 = vpop.f32.mrb[11].mxu0 }
 0x153   :  { %v4893_v4 = vadd.f32 %v482_v56, %v262_v1 }
 0x157   :  { %v486_v19 = vpop.f32.mrb[12].mxu0 }
 0x158   :  { %v4904_v21 = vadd.f32 %v486_v19, %v258_v62  ;;  %v488_v23 = vpop.f32.mrb[13].mxu0 }
 0x159   :  { %v4906_v28 = vadd.f32 %v488_v23, %v262_v1  ;;  %v490_v35 = vpop.f32.mrb[14].mxu0 }
 0x15a   :  { %5773 = vst [vmem:[#allocation23_spill] sm:$0xff] %v4904_v21  ;;  %v4908_v43 = vadd.f32 %v490_v35, %v258_v62  ;;  %v492_v56 = vpop.f32.mrb[15].mxu0 }
 0x15b   :  { %5774 = vst [vmem:[#allocation24_spill] sm:$0xff] %v4906_v28  ;;  %v4910_v2 = vadd.f32 %v492_v56, %v262_v1  ;;  %v4912_v56 = vld [vmem:[#allocation10 + $0x2] ss:$0 sm:$0xff] }
 0x15c   :  { %5775 = vst [vmem:[#allocation25_spill] sm:$0xff] %v4908_v43 }
 0x15f   :  { %v753_v10 = vpop.f32.mrb[16].mxu0 }
 0x160   :  { %v800_v58 = vadd.f32 %v753_v10, %v457_v5  ;;  %v755_v0 = vpop.f32.mrb[17].mxu0 }
 0x161   :  { %v801_v36 = vadd.f32 %v755_v0, %v459_v60  ;;  %v757_v13 = vpop.f32.mrb[18].mxu0  ;;  %v530_v0 = vadd.f32 %v529_v17, %v4865_v7  ;;  %v5776_v7 = vmov 0.0   ;;  %v5777_v17 = vmov 0  }
 0x162   :  { %v3375_v57 = vmul.f32 -1.442695, %v800_v58  ;;  %v758_v12 = vpop.f32.mrb[19].mxu0  ;;  %v794_v19 = vpop.f32.mrb[8].mxu1 }
 0x163   :  { %v3720_v59 = vpop.f32.mrb[9].mxu1  ;;  %v3376_v28 = vmul.f32 -1.442695, %v801_v36  ;;  %v814_v61 = vadd.f32 %v794_v19, %v4912_v56 }
 0x164   :  { %4291 = vpow2.f32 %v3375_v57  ;;  %v797_v23 = vpop.f32.mrb[10].mxu1 }
 0x165   :  { %v3721_v21 = vpop.f32.mrb[11].mxu1  ;;  %4293 = vpow2.f32 %v3376_v28 }
 0x16e   :  { %v4292_v35 = vpop.eup %4291 }
 0x16f   :  { %v808_v43 = vadd.f32 1.0, %v4292_v35  ;;  %v4294_v62 = vpop.eup %4293 }
 0x170   :  { %v809_v60 = vadd.f32 1.0, %v4294_v62 }
 0x171   :  { %4295 = vrcp.f32 %v808_v43 }
 0x17b   :  { %v4296_v63 = vpop.eup %4295 }
 0x17c   :  { %v815_v58 = vmul.f32 %v4296_v63, %v814_v61 }
 0x17e   :  { %v816_v57 = vadd.f32 %v815_v58, %v530_v0 }
 0x180   :  { %4297 = vtanh.f32 %v816_v57 }
 0x181   :  { %4299 = vrcp.f32 %v809_v60 }
 0x18a   :  { %v4298_v1 = vpop.eup %4297 }
 0x18b   :  { %v818_v36 = vsub.f32 %v4790_v51, %v4298_v1  ;;  %v4300_v5 = vpop.eup %4299 }
 0x18d   :  { %v819_v59 = vmul.f32 %v4300_v5, %v818_v36 }
 0x18f   :  { %v4917_v12 = vadd.f32 %v4298_v1, %v819_v59 }
 0x191   :  { %v828_v21 = vpack.c.bf16 %v4917_v12, %v4917_v12 }
 0x193   :  { %862 = vmatmul.mubr.bf16.vlgmr.msra.gmra.mrb[20].mxu0 %v828_v21  ;;  %3739 = vmatmul.mubr.bf16.vlgmr.msra.gmra.mrb[12].mxu1 %v828_v21 }
 0x194   :  { %941 = vmatpush1.bf16.msra.mxu0 %v4725_v26  ;;  %3743 = vmatpush3.bf16.msra.mxu1 %v4746_v37 }
 0x195   :  { %942 = vmatprep.subr.bf16.mxu0 %v4728_v27  ;;  %3744 = vmatprep.subr.bf16.mxu1 %v5776_v7 }
 0x196   :  { %972 = vmatprep.mubr.bf16.mxu0 %v5777_v17  ;;  %3758 = vmatprep.mubr.msk.bf16.mxu1 %vm4634_vm0, %v5776_v7 }
 0x198   :  { %943 = vmatpush1.bf16.msra.mxu0 %v4731_v29  ;;  %3745 = vmatpush3.bf16.msra.mxu1 %v4752_v39 }
 0x199   :  { %944 = vmatprep.subr.bf16.mxu0 %v4735_v30  ;;  %3746 = vmatprep.subr.bf16.mxu1 %v5776_v7 }
 0x19c   :  { %945 = vmatpush1.bf16.msra.mxu0 %v4738_v32  ;;  %3747 = vmatpush3.bf16.msra.mxu1 %v4762_v42 }
 0x19d   :  { %946 = vmatprep.subr.bf16.mxu0 %v4741_v33  ;;  %3748 = vmatprep.subr.bf16.mxu1 %v5776_v7 }
 0x1a0   :  { %947 = vmatpush1.bf16.msra.mxu0 %v4743_v34  ;;  %3749 = vmatpush3.bf16.msra.mxu1 %v4773_v46 }
 0x1a1   :  { %948 = vmatprep.subr.bf16.mxu0 %v4748_v38  ;;  %3750 = vmatprep.subr.bf16.mxu1 %v5776_v7 }
 0x1a4   :  { %949 = vmatpush1.bf16.msra.mxu0 %v4755_v40  ;;  %3751 = vmatpush3.bf16.msra.mxu1 %v4785_v49 }
 0x1a5   :  { %950 = vmatprep.subr.bf16.mxu0 %v4758_v41  ;;  %3752 = vmatprep.subr.bf16.mxu1 %v5776_v7 }
 0x1a8   :  { %951 = vmatpush1.bf16.msra.mxu0 %v4765_v44  ;;  %3753 = vmatpush3.bf16.msra.mxu1 %v4796_v52 }
 0x1a9   :  { %952 = vmatprep.subr.bf16.mxu0 %v4768_v45  ;;  %3754 = vmatprep.subr.bf16.mxu1 %v5776_v7 }
 0x1ac   :  { %953 = vmatpush1.bf16.msra.mxu0 %v4776_v47  ;;  %3755 = vmatpush3.bf16.msra.mxu1 %v4804_v54 }
 0x1ad   :  { %954 = vmatprep.subr.bf16.mxu0 %v4781_v48  ;;  %3756 = vmatprep.subr.bf16.mxu1 %v5776_v7 }
 0x1b0   :  { %955 = vmatpush1.bf16.msra.mxu0 %v4788_v50  ;;  %3757 = vmatpush3.bf16.msra.mxu1 %v4809_v55 }
 0x1b1   :  { %1051 = vmatprep.subr.bf16.mxu0 %v4723_v24  ;;  %3762 = vmatprep.subr.bf16.mxu1 %v5776_v7 }
 0x266   :  { %v863_v51 = vpop.f32.mrb[20].mxu0  ;;  %v904_v28 = vpop.f32.mrb[12].mxu1 }
 0x267   :  { %v910_v43 = vadd.f32 %v863_v51, %v4858_v3  ;;  %v865_v10 = vpop.f32.mrb[21].mxu0  ;;  %v3740_v13 = vpop.f32.mrb[13].mxu1  ;;  %v924_v1 = vadd.f32 %v904_v28, %v4912_v56 }
 0x268   :  { %v911_v19 = vadd.f32 %v865_v10, %v4861_v6  ;;  %v867_v23 = vpop.f32.mrb[22].mxu0  ;;  %v907_v35 = vpop.f32.mrb[14].mxu1 }
 0x269   :  { %v3377_v61 = vmul.f32 -1.442695, %v910_v43  ;;  %v868_v62 = vpop.f32.mrb[23].mxu0  ;;  %v3741_v63 = vpop.f32.mrb[15].mxu1 }
 0x26a   :  { %v3378_v0 = vmul.f32 -1.442695, %v911_v19 }
 0x26b   :  { %4301 = vpow2.f32 %v3377_v61 }
 0x26c   :  { %4303 = vpow2.f32 %v3378_v0 }
 0x275   :  { %v4302_v58 = vpop.eup %4301 }
 0x276   :  { %v918_v60 = vadd.f32 1.0, %v4302_v58  ;;  %v4304_v57 = vpop.eup %4303 }
 0x277   :  { %v919_v59 = vadd.f32 1.0, %v4304_v57 }
 0x278   :  { %4305 = vrcp.f32 %v918_v60 }
 0x282   :  { %v4306_v36 = vpop.eup %4305 }
 0x283   :  { %v925_v3 = vmul.f32 %v4306_v36, %v924_v1 }
 0x285   :  { %v926_v5 = vadd.f32 %v925_v3, %v4882_v22 }
 0x287   :  { %4307 = vtanh.f32 %v926_v5 }
 0x288   :  { %4309 = vrcp.f32 %v919_v59 }
 0x291   :  { %v4308_v6 = vpop.eup %4307 }
 0x292   :  { %v928_v21 = vsub.f32 %v4917_v12, %v4308_v6  ;;  %v4310_v51 = vpop.eup %4309 }
 0x294   :  { %v929_v43 = vmul.f32 %v4310_v51, %v928_v21 }
 0x296   :  { %v4961_v10 = vadd.f32 %v4308_v6, %v929_v43 }
 0x298   :  { %v939_v13 = vpack.c.bf16 %v4961_v10, %v4961_v10 }
 0x29a   :  { %973 = vmatmul.mubr.bf16.vlgmr.msra.gmra.mrb[24].mxu0 %v939_v13  ;;  %3759 = vmatmul.mubr.bf16.vlgmr.msra.gmra.mrb[16].mxu1 %v939_v13 }
 0x29b   :  { %1052 = vmatpush1.bf16.msra.mxu0 %v4725_v26  ;;  %3763 = vmatpush3.bf16.msra.mxu1 %v4746_v37 }
 0x29c   :  { %1053 = vmatprep.subr.bf16.mxu0 %v4728_v27  ;;  %3764 = vmatprep.subr.bf16.mxu1 %v5776_v7 }
 0x29d   :  { %1083 = vmatprep.mubr.bf16.mxu0 %v5777_v17  ;;  %3778 = vmatprep.mubr.msk.bf16.mxu1 %vm4634_vm0, %v5776_v7 }
 0x29f   :  { %1054 = vmatpush1.bf16.msra.mxu0 %v4731_v29  ;;  %3765 = vmatpush3.bf16.msra.mxu1 %v4752_v39 }
 0x2a0   :  { %1055 = vmatprep.subr.bf16.mxu0 %v4735_v30  ;;  %3766 = vmatprep.subr.bf16.mxu1 %v5776_v7 }
 0x2a3   :  { %1056 = vmatpush1.bf16.msra.mxu0 %v4738_v32  ;;  %3767 = vmatpush3.bf16.msra.mxu1 %v4762_v42 }
 0x2a4   :  { %1057 = vmatprep.subr.bf16.mxu0 %v4741_v33  ;;  %3768 = vmatprep.subr.bf16.mxu1 %v5776_v7 }
 0x2a7   :  { %1058 = vmatpush1.bf16.msra.mxu0 %v4743_v34  ;;  %3769 = vmatpush3.bf16.msra.mxu1 %v4773_v46 }
 0x2a8   :  { %1059 = vmatprep.subr.bf16.mxu0 %v4748_v38  ;;  %3770 = vmatprep.subr.bf16.mxu1 %v5776_v7 }
 0x2ab   :  { %1060 = vmatpush1.bf16.msra.mxu0 %v4755_v40  ;;  %3771 = vmatpush3.bf16.msra.mxu1 %v4785_v49 }
 0x2ac   :  { %1061 = vmatprep.subr.bf16.mxu0 %v4758_v41  ;;  %3772 = vmatprep.subr.bf16.mxu1 %v5776_v7 }
 0x2af   :  { %1062 = vmatpush1.bf16.msra.mxu0 %v4765_v44  ;;  %3773 = vmatpush3.bf16.msra.mxu1 %v4796_v52 }
 0x2b0   :  { %1063 = vmatprep.subr.bf16.mxu0 %v4768_v45  ;;  %3774 = vmatprep.subr.bf16.mxu1 %v5776_v7 }
 0x2b3   :  { %1064 = vmatpush1.bf16.msra.mxu0 %v4776_v47  ;;  %3775 = vmatpush3.bf16.msra.mxu1 %v4804_v54 }
 0x2b4   :  { %1065 = vmatprep.subr.bf16.mxu0 %v4781_v48  ;;  %3776 = vmatprep.subr.bf16.mxu1 %v5776_v7 }
 0x2b7   :  { %1066 = vmatpush1.bf16.msra.mxu0 %v4788_v50  ;;  %3777 = vmatpush3.bf16.msra.mxu1 %v4809_v55 }
 0x2b8   :  { %1162 = vmatprep.subr.bf16.mxu0 %v4723_v24  ;;  %3782 = vmatprep.subr.bf16.mxu1 %v5776_v7 }
 0x36d   :  { %v974_v22 = vpop.f32.mrb[24].mxu0  ;;  %v1015_v28 = vpop.f32.mrb[16].mxu1 }
 0x36e   :  { %v1021_v19 = vadd.f32 %v974_v22, %v4867_v9  ;;  %v976_v23 = vpop.f32.mrb[25].mxu0  ;;  %v3760_v35 = vpop.f32.mrb[17].mxu1  ;;  %v1035_v5 = vadd.f32 %v1015_v28, %v4912_v56 }
 0x36f   :  { %v1022_v61 = vadd.f32 %v976_v23, %v4869_v11  ;;  %v978_v62 = vpop.f32.mrb[26].mxu0  ;;  %v1018_v63 = vpop.f32.mrb[18].mxu1 }
 0x370   :  { %v3379_v0 = vmul.f32 -1.442695, %v1021_v19  ;;  %v979_v58 = vpop.f32.mrb[27].mxu0  ;;  %v3761_v60 = vpop.f32.mrb[19].mxu1 }
 0x371   :  { %v3380_v57 = vmul.f32 -1.442695, %v1022_v61 }
 0x372   :  { %4311 = vpow2.f32 %v3379_v0 }
 0x373   :  { %4313 = vpow2.f32 %v3380_v57 }
 0x37c   :  { %v4312_v1 = vpop.eup %4311 }
 0x37d   :  { %v1029_v36 = vadd.f32 1.0, %v4312_v1  ;;  %v4314_v3 = vpop.eup %4313 }
 0x37e   :  { %v1030_v21 = vadd.f32 1.0, %v4314_v3 }
 0x37f   :  { %4315 = vrcp.f32 %v1029_v36 }
 0x389   :  { %v4316_v59 = vpop.eup %4315 }
 0x38a   :  { %v1036_v9 = vmul.f32 %v4316_v59, %v1035_v5 }
 0x38c   :  { %v1037_v6 = vadd.f32 %v1036_v9, %v4874_v16 }
 0x38e   :  { %4317 = vtanh.f32 %v1037_v6 }
 0x38f   :  { %4319 = vrcp.f32 %v1030_v21 }
 0x398   :  { %v4318_v11 = vpop.eup %4317 }
 0x399   :  { %v1039_v51 = vsub.f32 %v4961_v10, %v4318_v11  ;;  %v4320_v43 = vpop.eup %4319 }
 0x39b   :  { %v1040_v13 = vmul.f32 %v4320_v43, %v1039_v51  ;;  %v5064_v51 = vld [vmem:[#allocation9 + $0xd8] ss:$12 sps:$4 sm:$0xff]   ;;  %v5068_v43 = vld [vmem:[#allocation9 + $0xf4] ss:$12 sps:$4 sm:$0xff]  }
 0x39d   :  { %v5005_v22 = vadd.f32 %v4318_v11, %v1040_v13  ;;  %v5053_v11 = vld [vmem:[#allocation9 + $0xc0] ss:$12 sps:$4 sm:$0xff]  }
 0x39f   :  { %v1050_v19 = vpack.c.bf16 %v5005_v22, %v5005_v22 }
 0x3a1   :  { %1084 = vmatmul.mubr.bf16.vlgmr.msra.gmra.mrb[28].mxu0 %v1050_v19  ;;  %3779 = vmatmul.mubr.bf16.vlgmr.msra.gmra.mrb[20].mxu1 %v1050_v19 }
 0x3a2   :  { %1163 = vmatpush1.bf16.msra.mxu0 %v4725_v26  ;;  %3783 = vmatpush3.bf16.msra.mxu1 %v4746_v37 }
 0x3a3   :  { %1164 = vmatprep.subr.bf16.mxu0 %v4728_v27  ;;  %3784 = vmatprep.subr.bf16.mxu1 %v5776_v7 }
 0x3a4   :  { %1194 = vmatprep.mubr.bf16.mxu0 %v5777_v17  ;;  %3798 = vmatprep.mubr.msk.bf16.mxu1 %vm4634_vm0, %v5776_v7 }
 0x3a6   :  { %1165 = vmatpush1.bf16.msra.mxu0 %v4731_v29  ;;  %3785 = vmatpush3.bf16.msra.mxu1 %v4752_v39 }
 0x3a7   :  { %1166 = vmatprep.subr.bf16.mxu0 %v4735_v30  ;;  %3786 = vmatprep.subr.bf16.mxu1 %v5776_v7 }
 0x3aa   :  { %1167 = vmatpush1.bf16.msra.mxu0 %v4738_v32  ;;  %3787 = vmatpush3.bf16.msra.mxu1 %v4762_v42 }
 0x3ab   :  { %1168 = vmatprep.subr.bf16.mxu0 %v4741_v33  ;;  %3788 = vmatprep.subr.bf16.mxu1 %v5776_v7 }
 0x3ae   :  { %1169 = vmatpush1.bf16.msra.mxu0 %v4743_v34  ;;  %3789 = vmatpush3.bf16.msra.mxu1 %v4773_v46 }
 0x3af   :  { %1170 = vmatprep.subr.bf16.mxu0 %v4748_v38  ;;  %3790 = vmatprep.subr.bf16.mxu1 %v5776_v7 }
 0x3b2   :  { %1171 = vmatpush1.bf16.msra.mxu0 %v4755_v40  ;;  %3791 = vmatpush3.bf16.msra.mxu1 %v4785_v49 }
 0x3b3   :  { %1172 = vmatprep.subr.bf16.mxu0 %v4758_v41  ;;  %3792 = vmatprep.subr.bf16.mxu1 %v5776_v7 }
 0x3b6   :  { %1173 = vmatpush1.bf16.msra.mxu0 %v4765_v44  ;;  %3793 = vmatpush3.bf16.msra.mxu1 %v4796_v52 }
 0x3b7   :  { %1174 = vmatprep.subr.bf16.mxu0 %v4768_v45  ;;  %3794 = vmatprep.subr.bf16.mxu1 %v5776_v7 }
 0x3ba   :  { %1175 = vmatpush1.bf16.msra.mxu0 %v4776_v47  ;;  %3795 = vmatpush3.bf16.msra.mxu1 %v4804_v54 }
 0x3bb   :  { %1176 = vmatprep.subr.bf16.mxu0 %v4781_v48  ;;  %3796 = vmatprep.subr.bf16.mxu1 %v5776_v7 }
 0x3be   :  { %1177 = vmatpush1.bf16.msra.mxu0 %v4788_v50  ;;  %3797 = vmatpush3.bf16.msra.mxu1 %v4809_v55 }
 0x3bf   :  { %1273 = vmatprep.subr.bf16.mxu0 %v4723_v24  ;;  %3802 = vmatprep.subr.bf16.mxu1 %v5776_v7 }
 0x474   :  { %v1085_v26 = vpop.f32.mrb[28].mxu0  ;;  %v1126_v27 = vpop.f32.mrb[20].mxu1 }
 0x475   :  { %v1132_v29 = vadd.f32 %v1085_v26, %v4871_v14  ;;  %v1087_v30 = vpop.f32.mrb[29].mxu0  ;;  %v3780_v16 = vpop.f32.mrb[21].mxu1  ;;  %v1146_v57 = vadd.f32 %v1126_v27, %v4912_v56 }
 0x476   :  { %v1133_v28 = vadd.f32 %v1087_v30, %v4876_v18  ;;  %v1089_v23 = vpop.f32.mrb[30].mxu0  ;;  %v1129_v35 = vpop.f32.mrb[22].mxu1 }
 0x477   :  { %v3381_v61 = vmul.f32 -1.442695, %v1132_v29  ;;  %v1090_v62 = vpop.f32.mrb[31].mxu0  ;;  %v3781_v63 = vpop.f32.mrb[23].mxu1 }
 0x478   :  { %v3382_v0 = vmul.f32 -1.442695, %v1133_v28  ;;  %v5108_v63 = vld [vmem:[#allocation9 + $0xc8] ss:$12 sps:$4 sm:$0xff]  }
 0x479   :  { %4321 = vpow2.f32 %v3381_v61 }
 0x47a   :  { %4323 = vpow2.f32 %v3382_v0  ;;  %v5122_v0 = vld [vmem:[#allocation9 + $0xf0] ss:$12 sps:$4 sm:$0xff]  }
 0x483   :  { %v4322_v58 = vpop.eup %4321 }
 0x484   :  { %v1140_v60 = vadd.f32 1.0, %v4322_v58  ;;  %v4324_v24 = vpop.eup %4323  ;;  %v5125_v58 = vld [vmem:[#allocation9 + $0xf8] ss:$12 sps:$4 sm:$0xff]  }
 0x485   :  { %v1141_v3 = vadd.f32 1.0, %v4324_v24  ;;  %v5132_v24 = vld [vmem:[#allocation9 + $0x108] ss:$12 sps:$4 sm:$0xff]  }
 0x486   :  { %4325 = vrcp.f32 %v1140_v60  ;;  %v5128_v60 = vld [vmem:[#allocation9 + $0x10c] ss:$12 sps:$4 sm:$0xff]  }
 0x490   :  { %v4326_v1 = vpop.eup %4325 }
 0x491   :  { %v1147_v14 = vmul.f32 %v4326_v1, %v1146_v57  ;;  %v5135_v57 = vld [vmem:[#allocation9 + $0x110] ss:$12 sps:$4 sm:$0xff]  }
 0x492   :  { %v5138_v1 = vld [vmem:[#allocation9 + $0x124] ss:$12 sps:$4 sm:$0xff]  }
 0x493   :  { %v1148_v36 = vadd.f32 %v1147_v14, %v4879_v20  ;;  %v5057_v20 = vld [vmem:[#allocation9 + $0xdc] ss:$12 sps:$4 sm:$0xff]   ;;  %v5142_v14 = vld [vmem:[#allocation9 + $0x120] ss:$12 sps:$4 sm:$0xff]  }
 0x495   :  { %4327 = vtanh.f32 %v1148_v36  ;;  %v5146_v36 = vld [vmem:[#allocation9 + $0x13c] ss:$12 sps:$4 sm:$0xff]  }
 0x496   :  { %4329 = vrcp.f32 %v1141_v3  ;;  %v5150_v3 = vld [vmem:[#allocation9 + $0x138] ss:$12 sps:$4 sm:$0xff]  }
 0x49f   :  { %v4328_v18 = vpop.eup %4327 }
 0x4a0   :  { %v1150_v5 = vsub.f32 %v5005_v22, %v4328_v18  ;;  %v4330_v59 = vpop.eup %4329 }
 0x4a2   :  { %v1151_v9 = vmul.f32 %v4330_v59, %v1150_v5  ;;  %v5158_v5 = vld [vmem:[#allocation9 + $0x150] ss:$12 sps:$4 sm:$0xff]  }
 0x4a4   :  { %v5049_v6 = vadd.f32 %v4328_v18, %v1151_v9  ;;  %v5154_v18 = vld [vmem:[#allocation9 + $0x154] ss:$12 sps:$4 sm:$0xff]  }
 0x4a6   :  { %v1161_v21 = vpack.c.bf16 %v5049_v6, %v5049_v6 }
 0x4a8   :  { %1195 = vmatmul.mubr.bf16.vlgmr.msra.gmra.mrb[32].mxu0 %v1161_v21  ;;  %3799 = vmatmul.mubr.bf16.vlgmr.msra.gmra.mrb[24].mxu1 %v1161_v21 }
 0x4a9   :  { %1274 = vmatpush1.bf16.msra.mxu0 %v5053_v11  ;;  %3803 = vmatpush3.bf16.msra.mxu1 %v4746_v37 }
 0x4aa   :  { %1275 = vmatprep.subr.bf16.mxu0 %v5057_v20  ;;  %3804 = vmatprep.subr.bf16.mxu1 %v5776_v7 }
 0x4ab   :  { %1305 = vmatprep.mubr.bf16.mxu0 %v5777_v17  ;;  %3818 = vmatprep.mubr.msk.bf16.mxu1 %vm4634_vm0, %v5776_v7 }
 0x4ad   :  { %1276 = vmatpush1.bf16.msra.mxu0 %v5064_v51  ;;  %3805 = vmatpush3.bf16.msra.mxu1 %v4752_v39 }
 0x4ae   :  { %1277 = vmatprep.subr.bf16.mxu0 %v5068_v43  ;;  %3806 = vmatprep.subr.bf16.mxu1 %v5776_v7 }
 0x4b1   :  { %1278 = vmatpush1.bf16.msra.mxu0 %v4738_v32  ;;  %3807 = vmatpush3.bf16.msra.mxu1 %v4762_v42  ;;  %v5094_v32 = vld [vmem:[#allocation9 + $0xc4] ss:$12 sps:$4 sm:$0xff]  }
 0x4b2   :  { %1279 = vmatprep.subr.bf16.mxu0 %v4741_v33  ;;  %3808 = vmatprep.subr.bf16.mxu1 %v5776_v7 }
 0x4b5   :  { %1280 = vmatpush1.bf16.msra.mxu0 %v4743_v34  ;;  %3809 = vmatpush3.bf16.msra.mxu1 %v4773_v46 }
 0x4b6   :  { %1281 = vmatprep.subr.bf16.mxu0 %v4748_v38  ;;  %3810 = vmatprep.subr.bf16.mxu1 %v5776_v7 }
 0x4b9   :  { %1282 = vmatpush1.bf16.msra.mxu0 %v4755_v40  ;;  %3811 = vmatpush3.bf16.msra.mxu1 %v4785_v49 }
 0x4ba   :  { %1283 = vmatprep.subr.bf16.mxu0 %v4758_v41  ;;  %3812 = vmatprep.subr.bf16.mxu1 %v5776_v7 }
 0x4bd   :  { %1284 = vmatpush1.bf16.msra.mxu0 %v4765_v44  ;;  %3813 = vmatpush3.bf16.msra.mxu1 %v4796_v52 }
 0x4be   :  { %1285 = vmatprep.subr.bf16.mxu0 %v4768_v45  ;;  %3814 = vmatprep.subr.bf16.mxu1 %v5776_v7 }
 0x4c1   :  { %1286 = vmatpush1.bf16.msra.mxu0 %v4776_v47  ;;  %3815 = vmatpush3.bf16.msra.mxu1 %v4804_v54 }
 0x4c2   :  { %1287 = vmatprep.subr.bf16.mxu0 %v4781_v48  ;;  %3816 = vmatprep.subr.bf16.mxu1 %v5776_v7 }
 0x4c5   :  { %1288 = vmatpush1.bf16.msra.mxu0 %v4788_v50  ;;  %3817 = vmatpush3.bf16.msra.mxu1 %v4809_v55 }
 0x4c6   :  { %1384 = vmatprep.subr.bf16.mxu0 %v5094_v32  ;;  %3822 = vmatprep.subr.bf16.mxu1 %v5776_v7 }
 0x57b   :  { %v1196_v33 = vpop.f32.mrb[32].mxu0  ;;  %v1237_v34 = vpop.f32.mrb[24].mxu1 }
 0x57c   :  { %v1243_v37 = vadd.f32 %v1196_v33, %v4884_v25  ;;  %v1198_v38 = vpop.f32.mrb[33].mxu0  ;;  %v3800_v39 = vpop.f32.mrb[25].mxu1  ;;  %v1257_v27 = vadd.f32 %v1237_v34, %v4912_v56 }
 0x57d   :  { %v1244_v40 = vadd.f32 %v1198_v38, %v4886_v31  ;;  %v1200_v41 = vpop.f32.mrb[34].mxu0  ;;  %v1240_v42 = vpop.f32.mrb[26].mxu1 }
 0x57e   :  { %v3383_v44 = vmul.f32 -1.442695, %v1243_v37  ;;  %v1201_v45 = vpop.f32.mrb[35].mxu0  ;;  %v3801_v46 = vpop.f32.mrb[27].mxu1 }
 0x57f   :  { %v3384_v47 = vmul.f32 -1.442695, %v1244_v40 }
 0x580   :  { %4331 = vpow2.f32 %v3383_v44 }
 0x581   :  { %4333 = vpow2.f32 %v3384_v47 }
 0x58a   :  { %v4332_v13 = vpop.eup %4331 }
 0x58b   :  { %v1251_v19 = vadd.f32 1.0, %v4332_v13  ;;  %v4334_v26 = vpop.eup %4333 }
 0x58c   :  { %v1252_v16 = vadd.f32 1.0, %v4334_v26  ;;  %v4480_v26 = vld [vmem:[#allocation9 + $0x168] ss:$12 sps:$4 sm:$0xff]  }
 0x58d   :  { %4335 = vrcp.f32 %v1251_v19 }
 0x597   :  { %v4336_v29 = vpop.eup %4335 }
 0x598   :  { %v1258_v25 = vmul.f32 %v4336_v29, %v1257_v27  ;;  %v4197_v27 = vld [vmem:[#allocation9 + $0x300] ss:$12 sps:$4 sm:$0xff]  }
 0x59a   :  { %v1259_v30 = vadd.f32 %v1258_v25, %v4896_v8  ;;  %v5117_v8 = vld [vmem:[#allocation9 + $0xe0] ss:$12 sps:$4 sm:$0xff]  }
 0x59c   :  { %4337 = vtanh.f32 %v1259_v30  ;;  %v5778_v30 = vld [vmem:[#allocation23_spill] sm:$0xff] }
 0x59d   :  { %4339 = vrcp.f32 %v1252_v16 }
 0x5a6   :  { %v4338_v31 = vpop.eup %4337 }
 0x5a7   :  { %v1261_v28 = vsub.f32 %v5049_v6, %v4338_v31  ;;  %v4340_v23 = vpop.eup %4339 }
 0x5a9   :  { %v1262_v35 = vmul.f32 %v4340_v23, %v1261_v28  ;;  %v5779_v23 = vld [vmem:[#allocation24_spill] sm:$0xff] }
 0x5ab   :  { %v5103_v61 = vadd.f32 %v4338_v31, %v1262_v35 }
 0x5ad   :  { %v1272_v62 = vpack.c.bf16 %v5103_v61, %v5103_v61 }
 0x5af   :  { %1306 = vmatmul.mubr.bf16.vlgmr.msra.gmra.mrb[36].mxu0 %v1272_v62  ;;  %3819 = vmatmul.mubr.bf16.vlgmr.msra.gmra.mrb[28].mxu1 %v1272_v62 }
 0x5b0   :  { %1385 = vmatpush1.bf16.msra.mxu0 %v5053_v11  ;;  %3823 = vmatpush3.bf16.msra.mxu1 %v5108_v63 }
 0x5b1   :  { %1386 = vmatprep.subr.bf16.mxu0 %v5057_v20  ;;  %3824 = vmatprep.subr.bf16.mxu1 %v5776_v7 }
 0x5b2   :  { %1416 = vmatprep.mubr.bf16.mxu0 %v5777_v17  ;;  %3838 = vmatprep.mubr.msk.bf16.mxu1 %vm4634_vm0, %v5776_v7 }
 0x5b4   :  { %1387 = vmatpush1.bf16.msra.mxu0 %v5064_v51  ;;  %3825 = vmatpush3.bf16.msra.mxu1 %v5117_v8 }
 0x5b5   :  { %1388 = vmatprep.subr.bf16.mxu0 %v5068_v43  ;;  %3826 = vmatprep.subr.bf16.mxu1 %v5776_v7 }
 0x5b8   :  { %1389 = vmatpush1.bf16.msra.mxu0 %v5122_v0  ;;  %3827 = vmatpush3.bf16.msra.mxu1 %v5125_v58 }
 0x5b9   :  { %1390 = vmatprep.subr.bf16.mxu0 %v5128_v60  ;;  %3828 = vmatprep.subr.bf16.mxu1 %v5776_v7 }
 0x5bc   :  { %1391 = vmatpush1.bf16.msra.mxu0 %v5132_v24  ;;  %3829 = vmatpush3.bf16.msra.mxu1 %v5135_v57 }
 0x5bd   :  { %1392 = vmatprep.subr.bf16.mxu0 %v5138_v1  ;;  %3830 = vmatprep.subr.bf16.mxu1 %v5776_v7 }
 0x5c0   :  { %1393 = vmatpush1.bf16.msra.mxu0 %v5142_v14  ;;  %3831 = vmatpush3.bf16.msra.mxu1 %v4785_v49 }
 0x5c1   :  { %1394 = vmatprep.subr.bf16.mxu0 %v5146_v36  ;;  %3832 = vmatprep.subr.bf16.mxu1 %v5776_v7 }
 0x5c4   :  { %1395 = vmatpush1.bf16.msra.mxu0 %v5150_v3  ;;  %3833 = vmatpush3.bf16.msra.mxu1 %v4796_v52 }
 0x5c5   :  { %1396 = vmatprep.subr.bf16.mxu0 %v5154_v18  ;;  %3834 = vmatprep.subr.bf16.mxu1 %v5776_v7 }
 0x5c8   :  { %1397 = vmatpush1.bf16.msra.mxu0 %v5158_v5  ;;  %3835 = vmatpush3.bf16.msra.mxu1 %v4804_v54 }
 0x5c9   :  { %1398 = vmatprep.subr.bf16.mxu0 %v4781_v48  ;;  %3836 = vmatprep.subr.bf16.mxu1 %v5776_v7 }
 0x5cc   :  { %1399 = vmatpush1.bf16.msra.mxu0 %v4788_v50  ;;  %3837 = vmatpush3.bf16.msra.mxu1 %v4809_v55 }
 0x5cd   :  { %3842 = vmatprep.subr.bf16.mxu1 %v5776_v7  ;;  %1495 = vmatprep.subr.bf16.mxu0 %v5094_v32 }
 0x682   :  { %v1307_v49 = vpop.f32.mrb[36].mxu0  ;;  %v1348_v52 = vpop.f32.mrb[28].mxu1 }
 0x683   :  { %v1354_v59 = vadd.f32 %v1307_v49, %v4888_v53  ;;  %v1309_v9 = vpop.f32.mrb[37].mxu0  ;;  %v3820_v21 = vpop.f32.mrb[29].mxu1  ;;  %v1368_v40 = vadd.f32 %v1348_v52, %v4912_v56 }
 0x684   :  { %v1355_v54 = vadd.f32 %v1309_v9, %v4893_v4  ;;  %v1311_v33 = vpop.f32.mrb[38].mxu0  ;;  %v1351_v48 = vpop.f32.mrb[30].mxu1 }
 0x685   :  { %v3385_v34 = vmul.f32 -1.442695, %v1354_v59  ;;  %v1312_v37 = vpop.f32.mrb[39].mxu0  ;;  %v3821_v38 = vpop.f32.mrb[31].mxu1  ;;  %v4195_v33 = vld [vmem:[#allocation9 + $0x304] ss:$12 sps:$4 sm:$0xff]  }
 0x686   :  { %v3386_v50 = vmul.f32 -1.442695, %v1355_v54  ;;  %v4198_v37 = vld [vmem:[#allocation9 + $0x31c] ss:$12 sps:$4 sm:$0xff]  }
 0x687   :  { %4341 = vpow2.f32 %v3385_v34  ;;  %v4200_v34 = vld [vmem:[#allocation9 + $0x318] ss:$12 sps:$4 sm:$0xff]   ;;  %v4203_v38 = vld [vmem:[#allocation9 + $0x330] ss:$12 sps:$4 sm:$0xff]  }
 0x688   :  { %4343 = vpow2.f32 %v3386_v50  ;;  %v4201_v50 = vld [vmem:[#allocation9 + $0x334] ss:$12 sps:$4 sm:$0xff]  }
 0x691   :  { %v4342_v55 = vpop.eup %4341 }
 0x692   :  { %v1362_v39 = vadd.f32 1.0, %v4342_v55  ;;  %v4344_v32 = vpop.eup %4343  ;;  %v4206_v55 = vld [vmem:[#allocation9 + $0x348] ss:$12 sps:$4 sm:$0xff]  }
 0x693   :  { %v1363_v44 = vadd.f32 1.0, %v4344_v32  ;;  %v4212_v32 = vld [vmem:[#allocation9 + $0x378] ss:$12 sps:$4 sm:$0xff]  }
 0x694   :  { %4345 = vrcp.f32 %v1362_v39  ;;  %v4207_v39 = vld [vmem:[#allocation9 + $0x364] ss:$12 sps:$4 sm:$0xff]  }
 0x69e   :  { %v4346_v41 = vpop.eup %4345 }
 0x69f   :  { %v1369_v53 = vmul.f32 %v4346_v41, %v1368_v40  ;;  %v4210_v40 = vld [vmem:[#allocation9 + $0x37c] ss:$12 sps:$4 sm:$0xff]  }
 0x6a0   :  { %v4215_v41 = vld [vmem:[#allocation9 + $0x390] ss:$12 sps:$4 sm:$0xff]  }
 0x6a1   :  { %v1370_v42 = vadd.f32 %v1369_v53, %v4902_v15  ;;  %v4475_v15 = vld [vmem:[#allocation9 + $0x128] ss:$12 sps:$4 sm:$0xff]  }
 0x6a2   :  { %v4213_v53 = vld [vmem:[#allocation9 + $0x394] ss:$12 sps:$4 sm:$0xff]  }
 0x6a3   :  { %4347 = vtanh.f32 %v1370_v42  ;;  %v4218_v42 = vld [vmem:[#allocation9 + $0x3a8] ss:$12 sps:$4 sm:$0xff]  }
 0x6a4   :  { %4349 = vrcp.f32 %v1363_v44  ;;  %v4216_v44 = vld [vmem:[#allocation9 + $0x3ac] ss:$12 sps:$4 sm:$0xff]  }
 0x6ad   :  { %v4348_v4 = vpop.eup %4347 }
 0x6ae   :  { %v1372_v45 = vsub.f32 %v5103_v61, %v4348_v4  ;;  %v4350_v46 = vpop.eup %4349 }
 0x6b0   :  { %v1373_v47 = vmul.f32 %v4350_v46, %v1372_v45  ;;  %v4219_v46 = vld [vmem:[#allocation9 + $0x188] ss:$12 sps:$4 sm:$0xff]  }
 0x6b2   :  { %v5173_v13 = vadd.f32 %v4348_v4, %v1373_v47  ;;  %v1700_v4 = vpack.c.bf16 %v5049_v6, %v5005_v22  ;;  %v4220_v47 = vld [vmem:[#allocation9 + $0x1a0] ss:$12 sps:$4 sm:$0xff]   ;;  %v4228_v6 = vld [vmem:[#allocation9 + $0x218] ss:$12 sps:$4 sm:$0xff]  }
 0x6b3   :  { %v4224_v22 = vld [vmem:[#allocation9 + $0x200] ss:$12 sps:$4 sm:$0xff]  }
 0x6b4   :  { %v1383_v19 = vpack.c.bf16 %v5173_v13, %v5173_v13  ;;  %v1701_v45 = vpack.c.bf16 %v5173_v13, %v5103_v61  ;;  %v4232_v61 = vld [vmem:[#allocation9 + $0x230] ss:$12 sps:$4 sm:$0xff]  }
 0x6b6   :  { %1417 = vmatmul.mubr.bf16.vlgmr.msra.gmra.mrb[40].mxu0 %v1383_v19  ;;  %3839 = vmatmul.mubr.bf16.vlgmr.msra.gmra.mrb[32].mxu1 %v1383_v19  ;;  %v4221_v19 = vld [vmem:[#allocation9 + $0x1b8] ss:$12 sps:$4 sm:$0xff]  }
 0x6b7   :  { %3843 = vmatpush3.bf16.msra.mxu1 %v5108_v63  ;;  %1496 = vmatpush1.bf16.msra.mxu0 %v5053_v11  ;;  %v4476_v11 = vld [vmem:[#allocation9 + $0x140] ss:$12 sps:$4 sm:$0xff]  }
 0x6b8   :  { %3844 = vmatprep.subr.bf16.mxu1 %v5776_v7  ;;  %1497 = vmatprep.subr.bf16.mxu0 %v5057_v20  ;;  %v4477_v20 = vld [vmem:[#allocation9 + $0x158] ss:$12 sps:$4 sm:$0xff]  }
 0x6b9   :  { %1527 = vmatprep.mubr.bf16.mxu0 %v5777_v17  ;;  %3858 = vmatprep.mubr.msk.bf16.mxu1 %vm4634_vm0, %v5776_v7 }
 0x6bb   :  { %3845 = vmatpush3.bf16.msra.mxu1 %v5117_v8  ;;  %1498 = vmatpush1.bf16.msra.mxu0 %v5064_v51  ;;  %v4478_v51 = vld [vmem:[#allocation9 + $0x16c] ss:$12 sps:$4 sm:$0xff]  }
 0x6bc   :  { %3846 = vmatprep.subr.bf16.mxu1 %v5776_v7  ;;  %1499 = vmatprep.subr.bf16.mxu0 %v5068_v43  ;;  %v4479_v43 = vld [vmem:[#allocation9 + $0x170] ss:$12 sps:$4 sm:$0xff]  }
 0x6bf   :  { %3847 = vmatpush3.bf16.msra.mxu1 %v5125_v58  ;;  %1500 = vmatpush1.bf16.msra.mxu0 %v5122_v0 }
 0x6c0   :  { %3848 = vmatprep.subr.bf16.mxu1 %v5776_v7  ;;  %1501 = vmatprep.subr.bf16.mxu0 %v5128_v60 }
 0x6c3   :  { %3849 = vmatpush3.bf16.msra.mxu1 %v5135_v57  ;;  %1502 = vmatpush1.bf16.msra.mxu0 %v5132_v24 }
 0x6c4   :  { %3850 = vmatprep.subr.bf16.mxu1 %v5776_v7  ;;  %1503 = vmatprep.subr.bf16.mxu0 %v5138_v1 }
 0x6c7   :  { %3851 = vmatpush3.bf16.msra.mxu1 %v4475_v15  ;;  %1504 = vmatpush1.bf16.msra.mxu0 %v5142_v14  ;;  %v4222_v15 = vld [vmem:[#allocation9 + $0x1d0] ss:$12 sps:$4 sm:$0xff]  }
 0x6c8   :  { %3852 = vmatprep.subr.bf16.mxu1 %v5776_v7  ;;  %1505 = vmatprep.subr.bf16.mxu0 %v5146_v36 }
 0x6cb   :  { %3853 = vmatpush3.bf16.msra.mxu1 %v4476_v11  ;;  %1506 = vmatpush1.bf16.msra.mxu0 %v5150_v3  ;;  %v4223_v11 = vld [vmem:[#allocation9 + $0x1e8] ss:$12 sps:$4 sm:$0xff]  }
 0x6cc   :  { %3854 = vmatprep.subr.bf16.mxu1 %v5776_v7  ;;  %1507 = vmatprep.subr.bf16.mxu0 %v5154_v18  ;;  %v5780_v18 = vld [vmem:[#allocation21_spill] sm:$0xff] }
 0x6cf   :  { %3855 = vmatpush3.bf16.msra.mxu1 %v4477_v20  ;;  %1508 = vmatpush1.bf16.msra.mxu0 %v5158_v5  ;;  %v4227_v20 = vld [vmem:[#allocation9 + $0x184] ss:$12 sps:$4 sm:$0xff]  }
 0x6d0   :  { %3856 = vmatprep.subr.bf16.mxu1 %v5776_v7  ;;  %1509 = vmatprep.subr.bf16.mxu0 %v4478_v51 }
 0x6d3   :  { %3857 = vmatpush3.bf16.msra.mxu1 %v4479_v43  ;;  %1510 = vmatpush1.bf16.msra.mxu0 %v4480_v26  ;;  %v5781_v43 = vld [vmem:[#allocation25_spill] sm:$0xff] }
 0x6d4   :  { %3862 = vmatprep.subr.bf16.mxu0 %v5776_v7  ;;  %3882 = vmatprep.subr.bf16.mxu1 %v4197_v27 }
 0x789   :  { %v1418_v29 = vpop.f32.mrb[40].mxu0  ;;  %v1459_v25 = vpop.f32.mrb[32].mxu1 }
 0x78a   :  { %v1465_v16 = vadd.f32 %v1418_v29, %v5778_v30  ;;  %v1420_v31 = vpop.f32.mrb[41].mxu0  ;;  %v3840_v28 = vpop.f32.mrb[33].mxu1  ;;  %v1479_v14 = vadd.f32 %v1459_v25, %v4912_v56  ;;  %v1699_v56 = vpack.c.bf16 %v4961_v10, %v4917_v12  ;;  %v4204_v12 = vld [vmem:[#allocation9 + $0x34c] ss:$12 sps:$4 sm:$0xff]  }
 0x78b   :  { %v1466_v35 = vadd.f32 %v1420_v31, %v5779_v23  ;;  %v1422_v62 = vpop.f32.mrb[42].mxu0  ;;  %v1462_v63 = vpop.f32.mrb[34].mxu1  ;;  %v4209_v10 = vld [vmem:[#allocation9 + $0x360] ss:$12 sps:$4 sm:$0xff]  }
 0x78c   :  { %v3387_v8 = vmul.f32 -1.442695, %v1465_v16  ;;  %v1423_v0 = vpop.f32.mrb[43].mxu0  ;;  %v3841_v58 = vpop.f32.mrb[35].mxu1 }
 0x78d   :  { %v3388_v60 = vmul.f32 -1.442695, %v1466_v35  ;;  %v4481_v0 = vld [vmem:[#allocation10 + $0x2] ss:$0 sm:$0xff] }
 0x78e   :  { %4351 = vpow2.f32 %v3387_v8 }
 0x78f   :  { %4353 = vpow2.f32 %v3388_v60 }
 0x798   :  { %v4352_v24 = vpop.eup %4351 }
 0x799   :  { %v1473_v57 = vadd.f32 1.0, %v4352_v24  ;;  %v4354_v1 = vpop.eup %4353 }
 0x79a   :  { %v1474_v49 = vadd.f32 1.0, %v4354_v1  ;;  %v5782_v1 = vld [vmem:[#allocation22_spill] sm:$0xff] }
 0x79b   :  { %4355 = vrcp.f32 %v1473_v57  ;;  %v5232_v57 = vld [vmem:[#allocation10 + $0x12] ss:$0 sm:$0xff] }
 0x7a5   :  { %v4356_v36 = vpop.eup %4355 }
 0x7a6   :  { %v1480_v3 = vmul.f32 %v4356_v36, %v1479_v14 }
 0x7a8   :  { %v1481_v5 = vadd.f32 %v1480_v3, %v5780_v18 }
 0x7aa   :  { %4357 = vtanh.f32 %v1481_v5 }
 0x7ab   :  { %4359 = vrcp.f32 %v1474_v49 }
 0x7b4   :  { %v4358_v52 = vpop.eup %4357 }
 0x7b5   :  { %v1483_v59 = vsub.f32 %v5173_v13, %v4358_v52  ;;  %v4360_v9 = vpop.eup %4359 }
 0x7b7   :  { %v1484_v21 = vmul.f32 %v4360_v9, %v1483_v59 }
 0x7b9   :  { %v5210_v54 = vadd.f32 %v4358_v52, %v1484_v21 }
 0x7bb   :  { %v1494_v48 = vpack.c.bf16 %v5210_v54, %v5210_v54 }
 0x7bd   :  { %1528 = vmatmul.mubr.bf16.vlgmr.msra.gmra.mrb[44].mxu0 %v1494_v48  ;;  %3859 = vmatmul.mubr.bf16.vlgmr.msra.gmra.mrb[36].mxu1 %v1494_v48 }
 0x7be   :  { %3883 = vmatpush3.bf16.msra.mxu1 %v4197_v27  ;;  %3898 = vmatprep.mubr.bf16.mxu1 %v1699_v56 }
 0x7bf   :  { %3884 = vmatprep.subr.bf16.mxu1 %v4200_v34  ;;  %3863 = vmatpush3.bf16.msra.mxu0 %v4195_v33 }
 0x7c0   :  { %3864 = vmatprep.subr.bf16.mxu0 %v5776_v7  ;;  %3878 = vmatprep.mubr.msk.bf16.mxu0 %vm4634_vm0, %v5776_v7 }
 0x7c2   :  { %3885 = vmatpush3.bf16.msra.mxu1 %v4200_v34 }
 0x7c3   :  { %3886 = vmatprep.subr.bf16.mxu1 %v4203_v38  ;;  %3865 = vmatpush3.bf16.msra.mxu0 %v4198_v37 }
 0x7c4   :  { %3866 = vmatprep.subr.bf16.mxu0 %v5776_v7 }
 0x7c6   :  { %3887 = vmatpush3.bf16.msra.mxu1 %v4203_v38 }
 0x7c7   :  { %3888 = vmatprep.subr.bf16.mxu1 %v4206_v55  ;;  %3867 = vmatpush3.bf16.msra.mxu0 %v4201_v50 }
 0x7c8   :  { %3868 = vmatprep.subr.bf16.mxu0 %v5776_v7 }
 0x7ca   :  { %3889 = vmatpush3.bf16.msra.mxu1 %v4206_v55 }
 0x7cb   :  { %3890 = vmatprep.subr.bf16.mxu1 %v4209_v10  ;;  %3869 = vmatpush3.bf16.msra.mxu0 %v4204_v12 }
 0x7cc   :  { %3870 = vmatprep.subr.bf16.mxu0 %v5776_v7 }
 0x7ce   :  { %3891 = vmatpush3.bf16.msra.mxu1 %v4209_v10 }
 0x7cf   :  { %3892 = vmatprep.subr.bf16.mxu1 %v4212_v32  ;;  %3871 = vmatpush3.bf16.msra.mxu0 %v4207_v39 }
 0x7d0   :  { %3872 = vmatprep.subr.bf16.mxu0 %v5776_v7 }
 0x7d2   :  { %3893 = vmatpush3.bf16.msra.mxu1 %v4212_v32 }
 0x7d3   :  { %3894 = vmatprep.subr.bf16.mxu1 %v4215_v41  ;;  %3873 = vmatpush3.bf16.msra.mxu0 %v4210_v40 }
 0x7d4   :  { %3874 = vmatprep.subr.bf16.mxu0 %v5776_v7 }
 0x7d6   :  { %3895 = vmatpush3.bf16.msra.mxu1 %v4215_v41 }
 0x7d7   :  { %3896 = vmatprep.subr.bf16.mxu1 %v4218_v42  ;;  %3875 = vmatpush3.bf16.msra.mxu0 %v4213_v53  ;;  %v4225_v53 = vld [vmem:[#allocation9 + $0x180] ss:$12 sps:$4 sm:$0xff]  }
 0x7d8   :  { %3876 = vmatprep.subr.bf16.mxu0 %v5776_v7 }
 0x7da   :  { %3897 = vmatpush3.bf16.msra.mxu1 %v4218_v42 }
 0x7db   :  { %3877 = vmatpush3.bf16.msra.mxu0 %v4216_v44  ;;  %3906 = vmatprep.subr.bf16.mxu1 %v4219_v46 }
 0x7dc   :  { %1972 = vmatprep.subr.bf16.mxu0 %v4227_v20  ;;  %v4241_v20 = vld [vmem:[#allocation9 + $0x1e4] ss:$12 sps:$4 sm:$0xff]  }
 0x7dd   :  { %3899 = vmatmul.mubr.bf16.vlgmr.msra.gmra.mrb[40].mxu1 %v1700_v4  ;;  %v4231_v4 = vld [vmem:[#allocation9 + $0x19c] ss:$12 sps:$4 sm:$0xff]  }
 0x7de   :  { %3902 = vmatprep.mubr.bf16.mxu1 %v1701_v45  ;;  %3907 = vmatpush3.bf16.msra.mxu1 %v4219_v46  ;;  %v4229_v45 = vld [vmem:[#allocation9 + $0x198] ss:$12 sps:$4 sm:$0xff]   ;;  %v4235_v46 = vld [vmem:[#allocation9 + $0x1b4] ss:$12 sps:$4 sm:$0xff]  }
 0x7df   :  { %3908 = vmatprep.subr.bf16.mxu1 %v4220_v47 }
 0x7e2   :  { %3909 = vmatpush3.bf16.msra.mxu1 %v4220_v47  ;;  %v4233_v47 = vld [vmem:[#allocation9 + $0x1b0] ss:$12 sps:$4 sm:$0xff]  }
 0x7e3   :  { %3910 = vmatprep.subr.bf16.mxu1 %v4221_v19 }
 0x7e6   :  { %3911 = vmatpush3.bf16.msra.mxu1 %v4221_v19  ;;  %v5242_v19 = vld [vmem:[#allocation9 + $0x248] ss:$12 sps:$4 sm:$0xff]  }
 0x7e7   :  { %3912 = vmatprep.subr.bf16.mxu1 %v4222_v15 }
 0x7ea   :  { %3913 = vmatpush3.bf16.msra.mxu1 %v4222_v15  ;;  %v4238_v15 = vld [vmem:[#allocation9 + $0x1cc] ss:$12 sps:$4 sm:$0xff]  }
 0x7eb   :  { %3914 = vmatprep.subr.bf16.mxu1 %v4223_v11 }
 0x7ee   :  { %3915 = vmatpush3.bf16.msra.mxu1 %v4223_v11  ;;  %v4236_v11 = vld [vmem:[#allocation9 + $0x1c8] ss:$12 sps:$4 sm:$0xff]  }
 0x7ef   :  { %3916 = vmatprep.subr.bf16.mxu1 %v4224_v22 }
 0x7f2   :  { %3917 = vmatpush3.bf16.msra.mxu1 %v4224_v22  ;;  %v4239_v22 = vld [vmem:[#allocation9 + $0x1e0] ss:$12 sps:$4 sm:$0xff]  }
 0x7f3   :  { %3918 = vmatprep.subr.bf16.mxu1 %v4228_v6 }
 0x7f6   :  { %3919 = vmatpush3.bf16.msra.mxu1 %v4228_v6  ;;  %v5249_v6 = vld [vmem:[#allocation9 + $0x278] ss:$12 sps:$4 sm:$0xff]  }
 0x7f7   :  { %3920 = vmatprep.subr.bf16.mxu1 %v4232_v61 }
 0x7fa   :  { %3921 = vmatpush3.bf16.msra.mxu1 %v4232_v61  ;;  %v4244_v61 = vld [vmem:[#allocation9 + $0x1fc] ss:$12 sps:$4 sm:$0xff]  }
 0x7fb   :  { %3930 = vmatprep.subr.bf16.mxu1 %v5776_v7 }
 0x890   :  { %v1529_v13 = vpop.f32.mrb[44].mxu0  ;;  %v1570_v51 = vpop.f32.mrb[36].mxu1 }
 0x891   :  { %v1576_v26 = vadd.f32 %v1529_v13, %v5781_v43  ;;  %v1531_v27 = vpop.f32.mrb[45].mxu0  ;;  %v3860_v29 = vpop.f32.mrb[37].mxu1  ;;  %v1590_v58 = vadd.f32 %v4481_v0, %v1570_v51  ;;  %v4242_v13 = vld [vmem:[#allocation9 + $0x1f8] ss:$12 sps:$4 sm:$0xff]   ;;  %v4247_v51 = vld [vmem:[#allocation9 + $0x214] ss:$12 sps:$4 sm:$0xff]  }
 0x892   :  { %v1577_v25 = vadd.f32 %v1531_v27, %v4910_v2  ;;  %v1533_v30 = vpop.f32.mrb[46].mxu0  ;;  %v1573_v16 = vpop.f32.mrb[38].mxu1  ;;  %v4245_v43 = vld [vmem:[#allocation9 + $0x210] ss:$12 sps:$4 sm:$0xff]   ;;  %v4248_v27 = vld [vmem:[#allocation9 + $0x228] ss:$12 sps:$4 sm:$0xff]  }
 0x893   :  { %v3389_v31 = vmul.f32 -1.442695, %v1576_v26  ;;  %v1534_v28 = vpop.f32.mrb[47].mxu0  ;;  %v3861_v23 = vpop.f32.mrb[39].mxu1  ;;  %v4250_v26 = vld [vmem:[#allocation9 + $0x22c] ss:$12 sps:$4 sm:$0xff]  }
 0x894   :  { %v3390_v35 = vmul.f32 -1.442695, %v1577_v25  ;;  %v5254_v29 = vld [vmem:[#allocation9 + $0x244] ss:$12 sps:$4 sm:$0xff]   ;;  %v5256_v25 = vld [vmem:[#allocation9 + $0x240] ss:$12 sps:$4 sm:$0xff]  }
 0x895   :  { %4361 = vpow2.f32 %v3389_v31  ;;  %v5259_v30 = vld [vmem:[#allocation9 + $0x25c] ss:$12 sps:$4 sm:$0xff]   ;;  %v5265_v16 = vld [vmem:[#allocation9 + $0x258] ss:$12 sps:$4 sm:$0xff]   ;;  %v5271_v28 = vld [vmem:[#allocation9 + $0x274] ss:$12 sps:$4 sm:$0xff]  }
 0x896   :  { %4363 = vpow2.f32 %v3390_v35  ;;  %v5267_v31 = vld [vmem:[#allocation9 + $0x290] ss:$12 sps:$4 sm:$0xff]   ;;  %v5277_v35 = vld [vmem:[#allocation9 + $0x2a8] ss:$12 sps:$4 sm:$0xff]  }
 0x897   :  { %v5273_v23 = vld [vmem:[#allocation9 + $0x270] ss:$12 sps:$4 sm:$0xff]  }
 0x898   :  { %v5291_v0 = vld [vmem:[#allocation9 + $0x2a4] ss:$12 sps:$4 sm:$0xff]  }
 0x89f   :  { %v4362_v62 = vpop.eup %4361 }
 0x8a0   :  { %v1584_v63 = vadd.f32 1.0, %v4362_v62  ;;  %v4364_v8 = vpop.eup %4363  ;;  %v5281_v62 = vld [vmem:[#allocation9 + $0x28c] ss:$12 sps:$4 sm:$0xff]  }
 0x8a1   :  { %v1585_v14 = vadd.f32 1.0, %v4364_v8  ;;  %v5287_v8 = vld [vmem:[#allocation9 + $0x2c0] ss:$12 sps:$4 sm:$0xff]  }
 0x8a2   :  { %4365 = vrcp.f32 %v1584_v63  ;;  %v5283_v63 = vld [vmem:[#allocation9 + $0x288] ss:$12 sps:$4 sm:$0xff]  }
 0x8ac   :  { %v4366_v60 = vpop.eup %4365 }
 0x8ad   :  { %v1591_v24 = vmul.f32 %v4366_v60, %v1590_v58  ;;  %v5293_v58 = vld [vmem:[#allocation9 + $0x2a0] ss:$12 sps:$4 sm:$0xff]   ;;  %v5297_v60 = vld [vmem:[#allocation9 + $0x2d8] ss:$12 sps:$4 sm:$0xff]  }
 0x8af   :  { %v1592_v2 = vadd.f32 %v1591_v24, %v5782_v1  ;;  %v5300_v24 = vld [vmem:[#allocation9 + $0x2bc] ss:$12 sps:$4 sm:$0xff]   ;;  %v5302_v1 = vld [vmem:[#allocation9 + $0x2b8] ss:$12 sps:$4 sm:$0xff]  }
 0x8b0   :  { %v3900_v36 = vpop.f32.mrb[40].mxu1 }
 0x8b1   :  { %4367 = vtanh.f32 %v1592_v2  ;;  %v1778_v3 = vadd.f32 %v3900_v36, %v5232_v57  ;;  %v1769_v18 = vpop.f32.mrb[41].mxu1  ;;  %v5305_v2 = vld [vmem:[#allocation9 + $0x2f0] ss:$12 sps:$4 sm:$0xff]  }
 0x8b2   :  { %v1770_v5 = vadd.f32 %v1769_v18, %v5232_v57  ;;  %v3901_v49 = vpop.f32.mrb[42].mxu1  ;;  %4369 = vrcp.f32 %v1585_v14  ;;  %v5311_v14 = vld [vmem:[#allocation9 + $0x2d4] ss:$12 sps:$4 sm:$0xff]   ;;  %v5313_v36 = vld [vmem:[#allocation9 + $0x2d0] ss:$12 sps:$4 sm:$0xff]  }
 0x8b3   :  { %v1810_v52 = vmul.f32 0.2, %v1778_v3  ;;  %v1781_v59 = vadd.f32 %v3901_v49, %v5232_v57  ;;  %v1772_v9 = vpop.f32.mrb[43].mxu1  ;;  %vm1802_vm1 = vcmp.gt.f32.partialorder %v1778_v3, 0.0  ;;  %v5320_v18 = vld [vmem:[#allocation9 + $0x2e8] ss:$12 sps:$4 sm:$0xff]  }
 0x8b4   :  { %v1808_v21 = vmul.f32 0.2, %v1770_v5  ;;  %v1773_v33 = vadd.f32 %v1772_v9, %v5232_v57  ;;  %vm1800_vm2 = vcmp.gt.f32.partialorder %v1770_v5, 0.0 }
 0x8b5   :  { %vm1803_vm3 = vcmp.gt.f32.partialorder %v1781_v59, 0.0  ;;  %v1811_v48 = vmul.f32 0.2, %v1781_v59  ;;  %v1818_v56 = vsel %vm1802_vm1, %v1778_v3, %v1810_v52  ;;  %v5318_v3 = vld [vmem:[#allocation9 + $0x2ec] ss:$12 sps:$4 sm:$0xff]  }
 0x8b6   :  { %vm1801_vm4 = vcmp.gt.f32.partialorder %v1773_v33, 0.0  ;;  %v1809_v34 = vmul.f32 0.2, %v1773_v33  ;;  %v1816_v50 = vsel %vm1800_vm2, %v1770_v5, %v1808_v21 }
 0x8b7   :  { %v1819_v37 = vsel %vm1803_vm3, %v1781_v59, %v1811_v48 }
 0x8b8   :  { %v1825_v38 = vpack.c.bf16 %v1819_v37, %v1818_v56  ;;  %v1817_v55 = vsel %vm1801_vm4, %v1773_v33, %v1809_v34 }
 0x8b9   :  { %v1824_v12 = vpack.c.bf16 %v1817_v55, %v1816_v50  ;;  %v244_v50 = vld [vmem:[#allocation10 + $0x3] ss:$0 sm:$0xff] }
 0x8bb   :  { %v4368_v10 = vpop.eup %4367 }
 0x8bc   :  { %v1594_v39 = vsub.f32 %v5210_v54, %v4368_v10  ;;  %v4370_v32 = vpop.eup %4369 }
 0x8be   :  { %v1595_v40 = vmul.f32 %v4370_v32, %v1594_v39 }
 0x8c0   :  { %v1596_v41 = vadd.f32 %v4368_v10, %v1595_v40 }
 0x8c2   :  { %v1599_v42 = vpack.c.bf16 %v1596_v41, %v1596_v41  ;;  %v1702_v44 = vpack.c.bf16 %v1596_v41, %v5210_v54  ;;  %v5245_v54 = vld [vmem:[#allocation9 + $0x260] ss:$12 sps:$4 sm:$0xff]  }
 0x8c4   :  { %3879 = vmatmul.mubr.bf16.vlgmr.msra.gmra.mrb[48].mxu0 %v1599_v42  ;;  %3903 = vmatmul.mubr.bf16.gmra.mrb[44].mxu1 %v1702_v44 }
 0x8c5   :  { %1973 = vmatpush1.bf16.msra.mxu0 %v4225_v53  ;;  %3922 = vmatprep.mubr.bf16.mxu1 %v1824_v12 }
 0x8c6   :  { %1974 = vmatprep.subr.bf16.mxu0 %v4231_v4  ;;  %2004 = vmatprep.mubr.bf16.mxu0 %v5777_v17 }
 0x8c9   :  { %1975 = vmatpush1.bf16.msra.mxu0 %v4229_v45 }
 0x8ca   :  { %1976 = vmatprep.subr.bf16.mxu0 %v4235_v46 }
 0x8cc   :  { %3923 = vmatmul.mubr.bf16.vlgmr.msra.gmra.mrb[48].mxu1 %v1825_v38 }
 0x8cd   :  { %1977 = vmatpush1.bf16.msra.mxu0 %v4233_v47  ;;  %3931 = vmatpush3.bf16.msra.mxu1 %v5242_v19 }
 0x8ce   :  { %1978 = vmatprep.subr.bf16.mxu0 %v4238_v15  ;;  %3932 = vmatprep.subr.bf16.mxu1 %v5776_v7 }
 0x8d1   :  { %1979 = vmatpush1.bf16.msra.mxu0 %v4236_v11  ;;  %3933 = vmatpush3.bf16.msra.mxu1 %v5245_v54 }
 0x8d2   :  { %1980 = vmatprep.subr.bf16.mxu0 %v4241_v20  ;;  %3934 = vmatprep.subr.bf16.mxu1 %v5776_v7 }
 0x8d5   :  { %1981 = vmatpush1.bf16.msra.mxu0 %v4239_v22  ;;  %3935 = vmatpush3.bf16.msra.mxu1 %v5249_v6 }
 0x8d6   :  { %1982 = vmatprep.subr.bf16.mxu0 %v4244_v61  ;;  %3936 = vmatprep.subr.bf16.mxu1 %v5776_v7 }
 0x8d9   :  { %1983 = vmatpush1.bf16.msra.mxu0 %v4242_v13  ;;  %3937 = vmatpush3.bf16.msra.mxu1 %v5267_v31 }
 0x8da   :  { %1984 = vmatprep.subr.bf16.mxu0 %v4247_v51  ;;  %3938 = vmatprep.subr.bf16.mxu1 %v5776_v7 }
 0x8dd   :  { %1985 = vmatpush1.bf16.msra.mxu0 %v4245_v43  ;;  %3939 = vmatpush3.bf16.msra.mxu1 %v5277_v35 }
 0x8de   :  { %1986 = vmatprep.subr.bf16.mxu0 %v4250_v26  ;;  %3940 = vmatprep.subr.bf16.mxu1 %v5776_v7 }
 0x8e1   :  { %1987 = vmatpush1.bf16.msra.mxu0 %v4248_v27  ;;  %3941 = vmatpush3.bf16.msra.mxu1 %v5287_v8 }
 0x8e2   :  { %2266 = vmatprep.subr.bf16.mxu0 %v5254_v29  ;;  %3942 = vmatprep.subr.bf16.mxu1 %v5776_v7 }
 0x8e4   :  { %2005 = vmatmul.mubr.bf16.vlgmr.msra.gmra.mrb[52].mxu0 %v1824_v12 }
 0x8e5   :  { %2014 = vmatprep.mubr.bf16.mxu0 %v5777_v17  ;;  %2267 = vmatpush1.bf16.msra.mxu0 %v5256_v25 }
 0x8e6   :  { %2268 = vmatprep.subr.bf16.mxu0 %v5259_v30  ;;  %3943 = vmatpush3.bf16.msra.mxu1 %v5297_v60 }
 0x8e7   :  { %3944 = vmatprep.subr.bf16.mxu1 %v5776_v7 }
 0x8e9   :  { %2269 = vmatpush1.bf16.msra.mxu0 %v5265_v16 }
 0x8ea   :  { %2270 = vmatprep.subr.bf16.mxu0 %v5271_v28  ;;  %3945 = vmatpush3.bf16.msra.mxu1 %v5305_v2 }
 0x8eb   :  { %3950 = vmatprep.subr.bf16.mxu1 %v5776_v7 }
 0x8ec   :  { %2015 = vmatmul.mubr.bf16.gmra.mrb[56].mxu0 %v1825_v38 }
 0x8ed   :  { %2024 = vmatprep.mubr.bf16.mxu0 %v5777_v17  ;;  %2271 = vmatpush1.bf16.msra.mxu0 %v5273_v23 }
 0x8ee   :  { %2272 = vmatprep.subr.bf16.mxu0 %v5281_v62 }
 0x8f1   :  { %2273 = vmatpush1.bf16.msra.mxu0 %v5283_v63 }
 0x8f2   :  { %2274 = vmatprep.subr.bf16.mxu0 %v5291_v0 }
 0x8f5   :  { %2275 = vmatpush1.bf16.msra.mxu0 %v5293_v58 }
 0x8f6   :  { %2276 = vmatprep.subr.bf16.mxu0 %v5300_v24 }
 0x8f9   :  { %2277 = vmatpush1.bf16.msra.mxu0 %v5302_v1 }
 0x8fa   :  { %2278 = vmatprep.subr.bf16.mxu0 %v5311_v14 }
 0x8fd   :  { %2279 = vmatpush1.bf16.msra.mxu0 %v5313_v36 }
 0x8fe   :  { %2280 = vmatprep.subr.bf16.mxu0 %v5318_v3 }
 0x901   :  { %2281 = vmatpush1.bf16.msra.mxu0 %v5320_v18 }
 0x902   :  { %2373 = vmatprep.subr.bf16.mxu0 %v5254_v29 }
 0x997   :  { %v1682_v5 = vpop.f32.mrb[48].mxu0  ;;  %v3904_v49 = vpop.f32.mrb[44].mxu1 }
 0x998   :  { %v1794_v52 = vadd.f32 %v3904_v49, %v5232_v57  ;;  %v3880_v59 = vpop.f32.mrb[49].mxu0  ;;  %v1785_v9 = vpop.f32.mrb[45].mxu1  ;;  %v1683_v32 = vadd.f32 %v1682_v5, %v244_v50  ;;  %v240_v50 = vld [vmem:[#allocation10 + $0x1] ss:$8 sm:$0x7] }
 0x999   :  { %v1786_v21 = vadd.f32 %v1785_v9, %v5232_v57  ;;  %v1685_v33 = vpop.f32.mrb[50].mxu0  ;;  %v3905_v48 = vpop.f32.mrb[46].mxu1 }
 0x99a   :  { %v1814_v34 = vmul.f32 0.2, %v1794_v52  ;;  %v1797_v56 = vadd.f32 %v3905_v48, %v5232_v57  ;;  %v3881_v37 = vpop.f32.mrb[51].mxu0  ;;  %v1788_v38 = vpop.f32.mrb[47].mxu1  ;;  %vm1806_vm5 = vcmp.gt.f32.partialorder %v1794_v52, 0.0  ;;  %vm1688_vm9 = vcmp.gt.f32.partialorder %v1683_v32, 0.0 }
 0x99b   :  { %v1812_v55 = vmul.f32 0.2, %v1786_v21  ;;  %v1789_v12 = vadd.f32 %v1788_v38, %v5232_v57  ;;  %vm1804_vm6 = vcmp.gt.f32.partialorder %v1786_v21, 0.0  ;;  %v1689_v57 = vmul.f32 0.2, %v1683_v32 }
 0x99c   :  { %vm1807_vm7 = vcmp.gt.f32.partialorder %v1797_v56, 0.0  ;;  %v1815_v10 = vmul.f32 0.2, %v1797_v56  ;;  %v1822_v41 = vsel %vm1806_vm5, %v1794_v52, %v1814_v34 }
 0x99d   :  { %vm1805_vm8 = vcmp.gt.f32.partialorder %v1789_v12, 0.0  ;;  %v1813_v39 = vmul.f32 0.2, %v1789_v12  ;;  %v1820_v44 = vsel %vm1804_vm6, %v1786_v21, %v1812_v55  ;;  %v5340_v11 = vsel %vm1688_vm9, %v1683_v32, %v1689_v57 }
 0x99e   :  { %v1823_v53 = vsel %vm1807_vm7, %v1797_v56, %v1815_v10  ;;  %v2137_v20 = vpack.c.bf16 %v5340_v11, %v5340_v11  ;;  %v5788_v10 = vld [vmem:[#allocation20_spill] sm:$0xff] }
 0x99f   :  { %v5329_v40 = vpop.f32.mrb[48].mxu1  ;;  %v1821_v4 = vsel %vm1805_vm8, %v1789_v12, %v1813_v39  ;;  %v1827_v45 = vpack.c.bf16 %v1823_v53, %v1822_v41  ;;  %v5789_v39 = vsub.s32 0, %v5788_v10  ;;  %vm3213_vm11 = vcmp.lt.s32.totalorder %v5788_v10, 2 }
 0x9a0   :  { %v5331_v42 = vpop.f32.mrb[49].mxu1  ;;  %v1826_v47 = vpack.c.bf16 %v1821_v4, %v1820_v44  ;;  %v5791_v44 = vsub.s32 1, %v5788_v10 }
 0x9a1   :  { %v5333_v46 = vpop.f32.mrb[50].mxu1  ;;  %v5416_v32 = vrot.slane %v240_v50, %v5789_v39 }
 0x9a2   :  { %v5335_v15 = vpop.f32.mrb[51].mxu1  ;;  %2025 = vmatmul.mubr.bf16.gmra.mrb[60].mxu0 %v1826_v47  ;;  %3926 = vmatprep.mubr.bf16.mxu1 %v1826_v47  ;;  %v5422_v4 = vrot.slane %v240_v50, %v5791_v44  ;;  %v5426_v44 = vld [vmem:[#allocation10 + $0xa] ss:$0 sm:$0xff] }
 0x9a3   :  { %3927 = vmatmul.mubr.bf16.gmra.mrb[52].mxu1 %v1827_v45  ;;  %2034 = vmatprep.mubr.bf16.mxu0 %v5777_v17 }
 0x9a4   :  { %3946 = vmatprep.mubr.msk.bf16.mxu1 %vm4634_vm0, %v5776_v7 }
 0x9aa   :  { %2035 = vmatmul.mubr.bf16.gmra.mrb[64].mxu0 %v1827_v45 }
 0x9ab   :  { %3947 = vmatmul.mubr.bf16.vlgmr.msra.gmra.mrb[56].mxu1 %v2137_v20  ;;  %2298 = vmatprep.mubr.bf16.mxu0 %v5777_v17 }
 0x9ac   :  { %3951 = vmatpush3.bf16.msra.mxu1 %v5242_v19  ;;  %3966 = vmatprep.mubr.msk.bf16.mxu1 %vm4634_vm0, %v5776_v7 }
 0x9ad   :  { %3952 = vmatprep.subr.bf16.mxu1 %v5776_v7 }
 0x9b0   :  { %3953 = vmatpush3.bf16.msra.mxu1 %v5245_v54 }
 0x9b1   :  { %3954 = vmatprep.subr.bf16.mxu1 %v5776_v7 }
 0x9b2   :  { %2299 = vmatmul.mubr.bf16.vlgmr.msra.gmra.mrb[68].mxu0 %v2137_v20 }
 0x9b3   :  { %2374 = vmatpush1.bf16.msra.mxu0 %v5256_v25  ;;  %2405 = vmatprep.mubr.bf16.mxu0 %v5777_v17 }
 0x9b4   :  { %2375 = vmatprep.subr.bf16.mxu0 %v5259_v30  ;;  %3955 = vmatpush3.bf16.msra.mxu1 %v5249_v6 }
 0x9b5   :  { %3956 = vmatprep.subr.bf16.mxu1 %v5776_v7 }
 0x9b7   :  { %v2006_v22 = vpop.f32.mrb[52].mxu0  ;;  %2376 = vmatpush1.bf16.msra.mxu0 %v5265_v16 }
 0x9b8   :  { %v2008_v61 = vpop.f32.mrb[53].mxu0  ;;  %2377 = vmatprep.subr.bf16.mxu0 %v5271_v28  ;;  %3957 = vmatpush3.bf16.msra.mxu1 %v5267_v31  ;;  %v2007_v47 = vadd.f32 %v2006_v22, %v5416_v32 }
 0x9b9   :  { %v5357_v13 = vpop.f32.mrb[54].mxu0  ;;  %3958 = vmatprep.subr.bf16.mxu1 %v5776_v7  ;;  %v2009_v57 = vadd.f32 %v2008_v61, %v5422_v4 }
 0x9ba   :  { %v5361_v51 = vpop.f32.mrb[55].mxu0 }
 0x9bb   :  { %2378 = vmatpush1.bf16.msra.mxu0 %v5273_v23 }
 0x9bc   :  { %2379 = vmatprep.subr.bf16.mxu0 %v5281_v62  ;;  %3959 = vmatpush3.bf16.msra.mxu1 %v5277_v35 }
 0x9bd   :  { %3960 = vmatprep.subr.bf16.mxu1 %v5776_v7 }
 0x9bf   :  { %v5368_v43 = vpop.f32.mrb[56].mxu0  ;;  %2380 = vmatpush1.bf16.msra.mxu0 %v5283_v63 }
 0x9c0   :  { %v5370_v26 = vpop.f32.mrb[57].mxu0  ;;  %2381 = vmatprep.subr.bf16.mxu0 %v5291_v0  ;;  %3961 = vmatpush3.bf16.msra.mxu1 %v5287_v8 }
 0x9c1   :  { %v5373_v27 = vpop.f32.mrb[58].mxu0  ;;  %3962 = vmatprep.subr.bf16.mxu1 %v5776_v7 }
 0x9c2   :  { %v5377_v5 = vpop.f32.mrb[59].mxu0 }
 0x9c3   :  { %2382 = vmatpush1.bf16.msra.mxu0 %v5293_v58 }
 0x9c4   :  { %2383 = vmatprep.subr.bf16.mxu0 %v5300_v24  ;;  %3963 = vmatpush3.bf16.msra.mxu1 %v5297_v60 }
 0x9c5   :  { %3964 = vmatprep.subr.bf16.mxu1 %v5776_v7 }
 0x9c7   :  { %2384 = vmatpush1.bf16.msra.mxu0 %v5302_v1 }
 0x9c8   :  { %2385 = vmatprep.subr.bf16.mxu0 %v5311_v14  ;;  %3965 = vmatpush3.bf16.msra.mxu1 %v5305_v2 }
 0x9c9   :  { %3970 = vmatprep.subr.bf16.mxu1 %v5776_v7 }
 0x9cb   :  { %2386 = vmatpush1.bf16.msra.mxu0 %v5313_v36 }
 0x9cc   :  { %2387 = vmatprep.subr.bf16.mxu0 %v5318_v3 }
 0x9cf   :  { %2388 = vmatpush1.bf16.msra.mxu0 %v5320_v18 }
 0x9d0   :  { %2480 = vmatprep.subr.bf16.mxu0 %v5254_v29 }
 0xa75   :  { %v5392_v49 = vpop.f32.mrb[60].mxu0 }
 0xa76   :  { %v5394_v52 = vpop.f32.mrb[61].mxu0  ;;  %v5396_v59 = vpop.f32.mrb[52].mxu1 }
 0xa77   :  { %5783 = vst [vmem:[#allocation23_spill] sm:$0xff] %v5396_v59  ;;  %v5398_v9 = vpop.f32.mrb[62].mxu0  ;;  %v5400_v21 = vpop.f32.mrb[53].mxu1 }
 0xa78   :  { %v5402_v33 = vpop.f32.mrb[63].mxu0  ;;  %v5404_v48 = vpop.f32.mrb[54].mxu1 }
 0xa79   :  { %5784 = vst [vmem:[#allocation24_spill] sm:$0xff] %v5404_v48  ;;  %v5406_v34 = vpop.f32.mrb[55].mxu1 }
 0xa7d   :  { %v5408_v56 = vpop.f32.mrb[64].mxu0 }
 0xa7e   :  { %5785 = vst [vmem:[#allocation21_spill] sm:$0xff] %v5408_v56  ;;  %v5410_v37 = vpop.f32.mrb[65].mxu0  ;;  %v2341_v38 = vpop.f32.mrb[56].mxu1 }
 0xa7f   :  { %5786 = vst [vmem:[#allocation25_spill] sm:$0xff] %v5410_v37  ;;  %v5412_v55 = vpop.f32.mrb[66].mxu0  ;;  %v3948_v12 = vpop.f32.mrb[57].mxu1 }
 0xa80   :  { %5787 = vst [vmem:[#allocation22_spill] sm:$0xff] %v5412_v55  ;;  %v5418_v41 = vpop.f32.mrb[67].mxu0  ;;  %v2344_v53 = vpop.f32.mrb[58].mxu1 }
 0xa81   :  { %5790 = vst [vmem:[#allocation20_spill] sm:$0xff] %v5418_v41  ;;  %v3949_v45 = vpop.f32.mrb[59].mxu1 }
 0xa82   :  { %v5792_v45 = vsub.s32 2, %v5788_v10 }
 0xa84   :  { %v5430_v22 = vrot.slane %v240_v50, %v5792_v45 }
 0xa85   :  { %v2300_v20 = vpop.f32.mrb[68].mxu0 }
 0xa86   :  { %v2347_v48 = vadd.f32 %v2300_v20, %v2007_v47  ;;  %v2302_v55 = vpop.f32.mrb[69].mxu0  ;;  %v2361_v47 = vadd.f32 %v2341_v38, %v5426_v44 }
 0xa87   :  { %v2348_v12 = vadd.f32 %v2302_v55, %v2009_v57  ;;  %v2304_v59 = vpop.f32.mrb[70].mxu0 }
 0xa88   :  { %v3455_v37 = vmul.f32 -1.442695, %v2347_v48  ;;  %v2305_v39 = vpop.f32.mrb[71].mxu0  ;;  %v2080_v59 = vadd.f32 %v5331_v42, %v5430_v22  ;;  %v2011_v42 = vadd.f32 %v5357_v13, %v5416_v32 }
 0xa89   :  { %v3456_v56 = vmul.f32 -1.442695, %v2348_v12 }
 0xa8a   :  { %4371 = vpow2.f32 %v3455_v37 }
 0xa8b   :  { %4373 = vpow2.f32 %v3456_v56 }
 0xa94   :  { %v4372_v41 = vpop.eup %4371 }
 0xa95   :  { %v2355_v53 = vadd.f32 1.0, %v4372_v41  ;;  %v4374_v61 = vpop.eup %4373 }
 0xa96   :  { %v2356_v55 = vadd.f32 1.0, %v4374_v61 }
 0xa97   :  { %4375 = vrcp.f32 %v2355_v53 }
 0xaa1   :  { %v4376_v20 = vpop.eup %4375 }
 0xaa2   :  { %v2362_v48 = vmul.f32 %v4376_v20, %v2361_v47 }
 0xaa4   :  { %v2363_v37 = vadd.f32 %v2362_v48, %v2080_v59 }
 0xaa6   :  { %4377 = vtanh.f32 %v2363_v37 }
 0xaa7   :  { %4379 = vrcp.f32 %v2356_v55 }
 0xab0   :  { %v4378_v56 = vpop.eup %4377 }
 0xab1   :  { %v2365_v41 = vsub.f32 %v5340_v11, %v4378_v56  ;;  %v4380_v57 = vpop.eup %4379  ;;  %v2013_v11 = vadd.f32 %v5361_v51, %v5422_v4 }
 0xab3   :  { %v2366_v12 = vmul.f32 %v4380_v57, %v2365_v41 }
 0xab5   :  { %v5436_v39 = vadd.f32 %v4378_v56, %v2366_v12 }
 0xab7   :  { %v2372_v50 = vpack.c.bf16 %v5436_v39, %v5436_v39 }
 0xab9   :  { %2406 = vmatmul.mubr.bf16.vlgmr.msra.gmra.mrb[72].mxu0 %v2372_v50  ;;  %3967 = vmatmul.mubr.bf16.vlgmr.msra.gmra.mrb[60].mxu1 %v2372_v50 }
 0xaba   :  { %2481 = vmatpush1.bf16.msra.mxu0 %v5256_v25  ;;  %3971 = vmatpush3.bf16.msra.mxu1 %v5242_v19 }
 0xabb   :  { %2482 = vmatprep.subr.bf16.mxu0 %v5259_v30  ;;  %3972 = vmatprep.subr.bf16.mxu1 %v5776_v7 }
 0xabc   :  { %2512 = vmatprep.mubr.bf16.mxu0 %v5777_v17  ;;  %3986 = vmatprep.mubr.msk.bf16.mxu1 %vm4634_vm0, %v5776_v7 }
 0xabe   :  { %2483 = vmatpush1.bf16.msra.mxu0 %v5265_v16  ;;  %3973 = vmatpush3.bf16.msra.mxu1 %v5245_v54 }
 0xabf   :  { %2484 = vmatprep.subr.bf16.mxu0 %v5271_v28  ;;  %3974 = vmatprep.subr.bf16.mxu1 %v5776_v7 }
 0xac2   :  { %2485 = vmatpush1.bf16.msra.mxu0 %v5273_v23  ;;  %3975 = vmatpush3.bf16.msra.mxu1 %v5249_v6 }
 0xac3   :  { %2486 = vmatprep.subr.bf16.mxu0 %v5281_v62  ;;  %3976 = vmatprep.subr.bf16.mxu1 %v5776_v7 }
 0xac6   :  { %2487 = vmatpush1.bf16.msra.mxu0 %v5283_v63  ;;  %3977 = vmatpush3.bf16.msra.mxu1 %v5267_v31 }
 0xac7   :  { %2488 = vmatprep.subr.bf16.mxu0 %v5291_v0  ;;  %3978 = vmatprep.subr.bf16.mxu1 %v5776_v7 }
 0xaca   :  { %2489 = vmatpush1.bf16.msra.mxu0 %v5293_v58  ;;  %3979 = vmatpush3.bf16.msra.mxu1 %v5277_v35 }
 0xacb   :  { %2490 = vmatprep.subr.bf16.mxu0 %v5300_v24  ;;  %3980 = vmatprep.subr.bf16.mxu1 %v5776_v7 }
 0xace   :  { %2491 = vmatpush1.bf16.msra.mxu0 %v5302_v1  ;;  %3981 = vmatpush3.bf16.msra.mxu1 %v5287_v8 }
 0xacf   :  { %2492 = vmatprep.subr.bf16.mxu0 %v5311_v14  ;;  %3982 = vmatprep.subr.bf16.mxu1 %v5776_v7 }
 0xad2   :  { %2493 = vmatpush1.bf16.msra.mxu0 %v5313_v36  ;;  %3983 = vmatpush3.bf16.msra.mxu1 %v5297_v60 }
 0xad3   :  { %2494 = vmatprep.subr.bf16.mxu0 %v5318_v3  ;;  %3984 = vmatprep.subr.bf16.mxu1 %v5776_v7 }
 0xad6   :  { %2495 = vmatpush1.bf16.msra.mxu0 %v5320_v18  ;;  %3985 = vmatpush3.bf16.msra.mxu1 %v5305_v2 }
 0xad7   :  { %2587 = vmatprep.subr.bf16.mxu0 %v5254_v29  ;;  %3990 = vmatprep.subr.bf16.mxu1 %v5776_v7 }
 0xb8c   :  { %v2407_v38 = vpop.f32.mrb[72].mxu0  ;;  %v2448_v53 = vpop.f32.mrb[60].mxu1 }
 0xb8d   :  { %v2454_v45 = vadd.f32 %v2407_v38, %v2011_v42  ;;  %v2409_v61 = vpop.f32.mrb[73].mxu0  ;;  %v3968_v47 = vpop.f32.mrb[61].mxu1  ;;  %v2468_v51 = vadd.f32 %v2448_v53, %v5426_v44  ;;  %v2083_v42 = vadd.f32 %v5335_v15, %v5430_v22  ;;  %v2017_v15 = vadd.f32 %v5368_v43, %v5416_v32 }
 0xb8e   :  { %v2455_v20 = vadd.f32 %v2409_v61, %v2013_v11  ;;  %v2411_v59 = vpop.f32.mrb[74].mxu0  ;;  %v2451_v48 = vpop.f32.mrb[62].mxu1  ;;  %v2019_v53 = vadd.f32 %v5370_v26, %v5422_v4 }
 0xb8f   :  { %v3457_v37 = vmul.f32 -1.442695, %v2454_v45  ;;  %v2412_v55 = vpop.f32.mrb[75].mxu0  ;;  %v3969_v56 = vpop.f32.mrb[63].mxu1 }
 0xb90   :  { %v3458_v41 = vmul.f32 -1.442695, %v2455_v20 }
 0xb91   :  { %4381 = vpow2.f32 %v3457_v37 }
 0xb92   :  { %4383 = vpow2.f32 %v3458_v41 }
 0xb9b   :  { %v4382_v57 = vpop.eup %4381 }
 0xb9c   :  { %v2462_v12 = vadd.f32 1.0, %v4382_v57  ;;  %v4384_v13 = vpop.eup %4383 }
 0xb9d   :  { %v2463_v61 = vadd.f32 1.0, %v4384_v13 }
 0xb9e   :  { %4385 = vrcp.f32 %v2462_v12 }
 0xba8   :  { %v4386_v50 = vpop.eup %4385 }
 0xba9   :  { %v2469_v38 = vmul.f32 %v4386_v50, %v2468_v51 }
 0xbab   :  { %v2470_v11 = vadd.f32 %v2469_v38, %v2083_v42 }
 0xbad   :  { %4387 = vtanh.f32 %v2470_v11 }
 0xbae   :  { %4389 = vrcp.f32 %v2463_v61 }
 0xbb7   :  { %v4388_v45 = vpop.eup %4387 }
 0xbb8   :  { %v2472_v47 = vsub.f32 %v5436_v39, %v4388_v45  ;;  %v4390_v20 = vpop.eup %4389 }
 0xbba   :  { %v2473_v59 = vmul.f32 %v4390_v20, %v2472_v47 }
 0xbbc   :  { %v5483_v48 = vadd.f32 %v4388_v45, %v2473_v59  ;;  %v2088_v59 = vadd.f32 %v5329_v40, %v5430_v22  ;;  %v2021_v40 = vadd.f32 %v5373_v27, %v5416_v32 }
 0xbbe   :  { %v2479_v37 = vpack.c.bf16 %v5483_v48, %v5483_v48 }
 0xbc0   :  { %2513 = vmatmul.mubr.bf16.vlgmr.msra.gmra.mrb[76].mxu0 %v2479_v37  ;;  %3987 = vmatmul.mubr.bf16.vlgmr.msra.gmra.mrb[64].mxu1 %v2479_v37 }
 0xbc1   :  { %2588 = vmatpush1.bf16.msra.mxu0 %v5256_v25  ;;  %3991 = vmatpush3.bf16.msra.mxu1 %v5242_v19 }
 0xbc2   :  { %2589 = vmatprep.subr.bf16.mxu0 %v5259_v30  ;;  %3992 = vmatprep.subr.bf16.mxu1 %v5776_v7 }
 0xbc3   :  { %2619 = vmatprep.mubr.bf16.mxu0 %v5777_v17  ;;  %4006 = vmatprep.mubr.msk.bf16.mxu1 %vm4634_vm0, %v5776_v7 }
 0xbc5   :  { %2590 = vmatpush1.bf16.msra.mxu0 %v5265_v16  ;;  %3993 = vmatpush3.bf16.msra.mxu1 %v5245_v54 }
 0xbc6   :  { %2591 = vmatprep.subr.bf16.mxu0 %v5271_v28  ;;  %3994 = vmatprep.subr.bf16.mxu1 %v5776_v7 }
 0xbc9   :  { %2592 = vmatpush1.bf16.msra.mxu0 %v5273_v23  ;;  %3995 = vmatpush3.bf16.msra.mxu1 %v5249_v6 }
 0xbca   :  { %2593 = vmatprep.subr.bf16.mxu0 %v5281_v62  ;;  %3996 = vmatprep.subr.bf16.mxu1 %v5776_v7 }
 0xbcd   :  { %2594 = vmatpush1.bf16.msra.mxu0 %v5283_v63  ;;  %3997 = vmatpush3.bf16.msra.mxu1 %v5267_v31 }
 0xbce   :  { %2595 = vmatprep.subr.bf16.mxu0 %v5291_v0  ;;  %3998 = vmatprep.subr.bf16.mxu1 %v5776_v7 }
 0xbd1   :  { %2596 = vmatpush1.bf16.msra.mxu0 %v5293_v58  ;;  %3999 = vmatpush3.bf16.msra.mxu1 %v5277_v35 }
 0xbd2   :  { %2597 = vmatprep.subr.bf16.mxu0 %v5300_v24  ;;  %4000 = vmatprep.subr.bf16.mxu1 %v5776_v7 }
 0xbd5   :  { %2598 = vmatpush1.bf16.msra.mxu0 %v5302_v1  ;;  %4001 = vmatpush3.bf16.msra.mxu1 %v5287_v8 }
 0xbd6   :  { %2599 = vmatprep.subr.bf16.mxu0 %v5311_v14  ;;  %4002 = vmatprep.subr.bf16.mxu1 %v5776_v7 }
 0xbd9   :  { %2600 = vmatpush1.bf16.msra.mxu0 %v5313_v36  ;;  %4003 = vmatpush3.bf16.msra.mxu1 %v5297_v60 }
 0xbda   :  { %2601 = vmatprep.subr.bf16.mxu0 %v5318_v3  ;;  %4004 = vmatprep.subr.bf16.mxu1 %v5776_v7 }
 0xbdd   :  { %2602 = vmatpush1.bf16.msra.mxu0 %v5320_v18  ;;  %4005 = vmatpush3.bf16.msra.mxu1 %v5305_v2 }
 0xbde   :  { %2694 = vmatprep.subr.bf16.mxu0 %v5254_v29  ;;  %4010 = vmatprep.subr.bf16.mxu1 %v5776_v7 }
 0xc93   :  { %v2514_v55 = vpop.f32.mrb[76].mxu0  ;;  %v2555_v56 = vpop.f32.mrb[64].mxu1 }
 0xc94   :  { %v2561_v41 = vadd.f32 %v2514_v55, %v2017_v15  ;;  %v2516_v57 = vpop.f32.mrb[77].mxu0  ;;  %v3988_v12 = vpop.f32.mrb[65].mxu1  ;;  %v2575_v26 = vadd.f32 %v2555_v56, %v5426_v44  ;;  %v2023_v56 = vadd.f32 %v5377_v5, %v5422_v4 }
 0xc95   :  { %v2562_v13 = vadd.f32 %v2516_v57, %v2019_v53  ;;  %v2518_v51 = vpop.f32.mrb[78].mxu0  ;;  %v2558_v50 = vpop.f32.mrb[66].mxu1 }
 0xc96   :  { %v3459_v42 = vmul.f32 -1.442695, %v2561_v41  ;;  %v2519_v38 = vpop.f32.mrb[79].mxu0  ;;  %v3989_v11 = vpop.f32.mrb[67].mxu1 }
 0xc97   :  { %v3460_v61 = vmul.f32 -1.442695, %v2562_v13 }
 0xc98   :  { %4391 = vpow2.f32 %v3459_v42 }
 0xc99   :  { %4393 = vpow2.f32 %v3460_v61 }
 0xca2   :  { %v4392_v45 = vpop.eup %4391 }
 0xca3   :  { %v2569_v47 = vadd.f32 1.0, %v4392_v45  ;;  %v4394_v43 = vpop.eup %4393 }
 0xca4   :  { %v2570_v53 = vadd.f32 1.0, %v4394_v43 }
 0xca5   :  { %4395 = vrcp.f32 %v2569_v47 }
 0xcaf   :  { %v4396_v20 = vpop.eup %4395 }
 0xcb0   :  { %v2576_v37 = vmul.f32 %v4396_v20, %v2575_v26 }
 0xcb2   :  { %v2577_v15 = vadd.f32 %v2576_v37, %v2088_v59 }
 0xcb4   :  { %4397 = vtanh.f32 %v2577_v15 }
 0xcb5   :  { %4399 = vrcp.f32 %v2570_v53 }
 0xcbe   :  { %v4398_v55 = vpop.eup %4397 }
 0xcbf   :  { %v2579_v41 = vsub.f32 %v5483_v48, %v4398_v55  ;;  %v4400_v57 = vpop.eup %4399 }
 0xcc1   :  { %v2580_v12 = vmul.f32 %v4400_v57, %v2579_v41  ;;  %v2091_v41 = vadd.f32 %v5333_v46, %v5430_v22  ;;  %v2027_v46 = vadd.f32 %v5392_v49, %v5416_v32 }
 0xcc3   :  { %v5530_v13 = vadd.f32 %v4398_v55, %v2580_v12 }
 0xcc5   :  { %v2586_v51 = vpack.c.bf16 %v5530_v13, %v5530_v13 }
 0xcc7   :  { %2620 = vmatmul.mubr.bf16.vlgmr.msra.gmra.mrb[80].mxu0 %v2586_v51  ;;  %4007 = vmatmul.mubr.bf16.vlgmr.msra.gmra.mrb[68].mxu1 %v2586_v51 }
 0xcc8   :  { %2695 = vmatpush1.bf16.msra.mxu0 %v5256_v25  ;;  %4011 = vmatpush3.bf16.msra.mxu1 %v5242_v19 }
 0xcc9   :  { %2696 = vmatprep.subr.bf16.mxu0 %v5259_v30  ;;  %4012 = vmatprep.subr.bf16.mxu1 %v5776_v7 }
 0xcca   :  { %2726 = vmatprep.mubr.bf16.mxu0 %v5777_v17  ;;  %4026 = vmatprep.mubr.msk.bf16.mxu1 %vm4634_vm0, %v5776_v7 }
 0xccc   :  { %2697 = vmatpush1.bf16.msra.mxu0 %v5265_v16  ;;  %4013 = vmatpush3.bf16.msra.mxu1 %v5245_v54 }
 0xccd   :  { %2698 = vmatprep.subr.bf16.mxu0 %v5271_v28  ;;  %4014 = vmatprep.subr.bf16.mxu1 %v5776_v7 }
 0xcd0   :  { %2699 = vmatpush1.bf16.msra.mxu0 %v5273_v23  ;;  %4015 = vmatpush3.bf16.msra.mxu1 %v5249_v6 }
 0xcd1   :  { %2700 = vmatprep.subr.bf16.mxu0 %v5281_v62  ;;  %4016 = vmatprep.subr.bf16.mxu1 %v5776_v7 }
 0xcd4   :  { %2701 = vmatpush1.bf16.msra.mxu0 %v5283_v63  ;;  %4017 = vmatpush3.bf16.msra.mxu1 %v5267_v31 }
 0xcd5   :  { %2702 = vmatprep.subr.bf16.mxu0 %v5291_v0  ;;  %4018 = vmatprep.subr.bf16.mxu1 %v5776_v7 }
 0xcd8   :  { %2703 = vmatpush1.bf16.msra.mxu0 %v5293_v58  ;;  %4019 = vmatpush3.bf16.msra.mxu1 %v5277_v35 }
 0xcd9   :  { %2704 = vmatprep.subr.bf16.mxu0 %v5300_v24  ;;  %4020 = vmatprep.subr.bf16.mxu1 %v5776_v7 }
 0xcdc   :  { %2705 = vmatpush1.bf16.msra.mxu0 %v5302_v1  ;;  %4021 = vmatpush3.bf16.msra.mxu1 %v5287_v8 }
 0xcdd   :  { %2706 = vmatprep.subr.bf16.mxu0 %v5311_v14  ;;  %4022 = vmatprep.subr.bf16.mxu1 %v5776_v7 }
 0xce0   :  { %2707 = vmatpush1.bf16.msra.mxu0 %v5313_v36  ;;  %4023 = vmatpush3.bf16.msra.mxu1 %v5297_v60 }
 0xce1   :  { %2708 = vmatprep.subr.bf16.mxu0 %v5318_v3  ;;  %4024 = vmatprep.subr.bf16.mxu1 %v5776_v7 }
 0xce4   :  { %2709 = vmatpush1.bf16.msra.mxu0 %v5320_v18  ;;  %4025 = vmatpush3.bf16.msra.mxu1 %v5305_v2 }
 0xce5   :  { %2801 = vmatprep.subr.bf16.mxu0 %v5254_v29  ;;  %4030 = vmatprep.subr.bf16.mxu1 %v5776_v7 }
 0xd9a   :  { %v2621_v50 = vpop.f32.mrb[80].mxu0  ;;  %v2662_v42 = vpop.f32.mrb[68].mxu1 }
 0xd9b   :  { %v2668_v38 = vadd.f32 %v2621_v50, %v2021_v40  ;;  %v2623_v11 = vpop.f32.mrb[81].mxu0  ;;  %v4008_v61 = vpop.f32.mrb[69].mxu1  ;;  %v2682_v5 = vadd.f32 %v2662_v42, %v5426_v44  ;;  %v2029_v42 = vadd.f32 %v5394_v52, %v5422_v4 }
 0xd9c   :  { %v2669_v45 = vadd.f32 %v2623_v11, %v2023_v56  ;;  %v2625_v47 = vpop.f32.mrb[82].mxu0  ;;  %v2665_v43 = vpop.f32.mrb[70].mxu1 }
 0xd9d   :  { %v3461_v26 = vmul.f32 -1.442695, %v2668_v38  ;;  %v2626_v20 = vpop.f32.mrb[83].mxu0  ;;  %v4009_v59 = vpop.f32.mrb[71].mxu1 }
 0xd9e   :  { %v3462_v37 = vmul.f32 -1.442695, %v2669_v45 }
 0xd9f   :  { %4401 = vpow2.f32 %v3461_v26 }
 0xda0   :  { %4403 = vpow2.f32 %v3462_v37 }
 0xda9   :  { %v4402_v15 = vpop.eup %4401 }
 0xdaa   :  { %v2676_v53 = vadd.f32 1.0, %v4402_v15  ;;  %v4404_v27 = vpop.eup %4403 }
 0xdab   :  { %v2677_v51 = vadd.f32 1.0, %v4404_v27 }
 0xdac   :  { %4405 = vrcp.f32 %v2676_v53 }
 0xdb6   :  { %v4406_v55 = vpop.eup %4405 }
 0xdb7   :  { %v2683_v57 = vmul.f32 %v4406_v55, %v2682_v5 }
 0xdb9   :  { %v2684_v12 = vadd.f32 %v2683_v57, %v2091_v41 }
 0xdbb   :  { %4407 = vtanh.f32 %v2684_v12 }
 0xdbc   :  { %4409 = vrcp.f32 %v2677_v51  ;;  %v2096_v51 = vadd.f32 %v5400_v21, %v5430_v22 }
 0xdc5   :  { %v4408_v40 = vpop.eup %4407 }
 0xdc6   :  { %v2686_v56 = vsub.f32 %v5530_v13, %v4408_v40  ;;  %v4410_v50 = vpop.eup %4409 }
 0xdc8   :  { %v2687_v38 = vmul.f32 %v4410_v50, %v2686_v56 }
 0xdca   :  { %v5577_v11 = vadd.f32 %v4408_v40, %v2687_v38 }
 0xdcc   :  { %v2693_v61 = vpack.c.bf16 %v5577_v11, %v5577_v11 }
 0xdce   :  { %2727 = vmatmul.mubr.bf16.vlgmr.msra.gmra.mrb[84].mxu0 %v2693_v61  ;;  %4027 = vmatmul.mubr.bf16.vlgmr.msra.gmra.mrb[72].mxu1 %v2693_v61 }
 0xdcf   :  { %2802 = vmatpush1.bf16.msra.mxu0 %v5256_v25  ;;  %4031 = vmatpush3.bf16.msra.mxu1 %v5242_v19 }
 0xdd0   :  { %2803 = vmatprep.subr.bf16.mxu0 %v5259_v30  ;;  %4032 = vmatprep.subr.bf16.mxu1 %v5776_v7 }
 0xdd1   :  { %2833 = vmatprep.mubr.bf16.mxu0 %v5777_v17  ;;  %4046 = vmatprep.mubr.msk.bf16.mxu1 %vm4634_vm0, %v5776_v7 }
 0xdd3   :  { %2804 = vmatpush1.bf16.msra.mxu0 %v5265_v16  ;;  %4033 = vmatpush3.bf16.msra.mxu1 %v5245_v54 }
 0xdd4   :  { %2805 = vmatprep.subr.bf16.mxu0 %v5271_v28  ;;  %4034 = vmatprep.subr.bf16.mxu1 %v5776_v7 }
 0xdd7   :  { %2806 = vmatpush1.bf16.msra.mxu0 %v5273_v23  ;;  %4035 = vmatpush3.bf16.msra.mxu1 %v5249_v6 }
 0xdd8   :  { %2807 = vmatprep.subr.bf16.mxu0 %v5281_v62  ;;  %4036 = vmatprep.subr.bf16.mxu1 %v5776_v7 }
 0xddb   :  { %2808 = vmatpush1.bf16.msra.mxu0 %v5283_v63  ;;  %4037 = vmatpush3.bf16.msra.mxu1 %v5267_v31 }
 0xddc   :  { %2809 = vmatprep.subr.bf16.mxu0 %v5291_v0  ;;  %4038 = vmatprep.subr.bf16.mxu1 %v5776_v7 }
 0xddf   :  { %2810 = vmatpush1.bf16.msra.mxu0 %v5293_v58  ;;  %4039 = vmatpush3.bf16.msra.mxu1 %v5277_v35 }
 0xde0   :  { %2811 = vmatprep.subr.bf16.mxu0 %v5300_v24  ;;  %4040 = vmatprep.subr.bf16.mxu1 %v5776_v7 }
 0xde3   :  { %2812 = vmatpush1.bf16.msra.mxu0 %v5302_v1  ;;  %4041 = vmatpush3.bf16.msra.mxu1 %v5287_v8 }
 0xde4   :  { %2813 = vmatprep.subr.bf16.mxu0 %v5311_v14  ;;  %4042 = vmatprep.subr.bf16.mxu1 %v5776_v7 }
 0xde7   :  { %2814 = vmatpush1.bf16.msra.mxu0 %v5313_v36  ;;  %4043 = vmatpush3.bf16.msra.mxu1 %v5297_v60 }
 0xde8   :  { %2815 = vmatprep.subr.bf16.mxu0 %v5318_v3  ;;  %4044 = vmatprep.subr.bf16.mxu1 %v5776_v7 }
 0xdeb   :  { %2816 = vmatpush1.bf16.msra.mxu0 %v5320_v18  ;;  %4045 = vmatpush3.bf16.msra.mxu1 %v5305_v2 }
 0xdec   :  { %2908 = vmatprep.subr.bf16.mxu0 %v5254_v29  ;;  %4050 = vmatprep.subr.bf16.mxu1 %v5776_v7 }
 0xea1   :  { %v2728_v45 = vpop.f32.mrb[84].mxu0  ;;  %v2769_v47 = vpop.f32.mrb[72].mxu1 }
 0xea2   :  { %v2775_v43 = vadd.f32 %v2728_v45, %v2027_v46  ;;  %v2730_v26 = vpop.f32.mrb[85].mxu0  ;;  %v4028_v20 = vpop.f32.mrb[73].mxu1  ;;  %v2789_v52 = vadd.f32 %v2769_v47, %v5426_v44 }
 0xea3   :  { %v2776_v59 = vadd.f32 %v2730_v26, %v2029_v42  ;;  %v2732_v37 = vpop.f32.mrb[86].mxu0  ;;  %v2772_v15 = vpop.f32.mrb[74].mxu1  ;;  %v4482_v20 = vld [vmem:[#allocation9 + $0x240] ss:$12 sps:$4 sm:$0xff]  }
 0xea4   :  { %v3463_v53 = vmul.f32 -1.442695, %v2775_v43  ;;  %v2733_v27 = vpop.f32.mrb[87].mxu0  ;;  %v4029_v5 = vpop.f32.mrb[75].mxu1  ;;  %v4485_v37 = vld [vmem:[#allocation9 + $0x258] ss:$12 sps:$4 sm:$0xff]  }
 0xea5   :  { %v3464_v55 = vmul.f32 -1.442695, %v2776_v59  ;;  %v4484_v59 = vld [vmem:[#allocation9 + $0x25c] ss:$12 sps:$4 sm:$0xff]   ;;  %v4486_v15 = vld [vmem:[#allocation9 + $0x260] ss:$12 sps:$4 sm:$0xff]  }
 0xea6   :  { %4411 = vpow2.f32 %v3463_v53  ;;  %v4487_v53 = vld [vmem:[#allocation9 + $0x274] ss:$12 sps:$4 sm:$0xff]   ;;  %v4488_v27 = vld [vmem:[#allocation9 + $0x270] ss:$12 sps:$4 sm:$0xff]   ;;  %v4489_v5 = vld [vmem:[#allocation9 + $0x278] ss:$12 sps:$4 sm:$0xff]  }
 0xea7   :  { %4413 = vpow2.f32 %v3464_v55  ;;  %v4490_v55 = vld [vmem:[#allocation9 + $0x28c] ss:$12 sps:$4 sm:$0xff]  }
 0xeb0   :  { %v4412_v41 = vpop.eup %4411 }
 0xeb1   :  { %v2783_v57 = vadd.f32 1.0, %v4412_v41  ;;  %v4414_v49 = vpop.eup %4413  ;;  %v4492_v41 = vld [vmem:[#allocation9 + $0x290] ss:$12 sps:$4 sm:$0xff]  }
 0xeb2   :  { %v2784_v50 = vadd.f32 1.0, %v4414_v49  ;;  %v4494_v49 = vld [vmem:[#allocation9 + $0x2a0] ss:$12 sps:$4 sm:$0xff]  }
 0xeb3   :  { %4415 = vrcp.f32 %v2783_v57  ;;  %v4493_v57 = vld [vmem:[#allocation9 + $0x2a4] ss:$12 sps:$4 sm:$0xff]  }
 0xebd   :  { %v4416_v12 = vpop.eup %4415 }
 0xebe   :  { %v2790_v40 = vmul.f32 %v4416_v12, %v2789_v52  ;;  %v4495_v52 = vld [vmem:[#allocation9 + $0x2a8] ss:$12 sps:$4 sm:$0xff]  }
 0xebf   :  { %v4496_v12 = vld [vmem:[#allocation9 + $0x2bc] ss:$12 sps:$4 sm:$0xff]  }
 0xec0   :  { %v2791_v56 = vadd.f32 %v2790_v40, %v2096_v51  ;;  %v4497_v51 = vld [vmem:[#allocation9 + $0x2b8] ss:$12 sps:$4 sm:$0xff]   ;;  %v4498_v40 = vld [vmem:[#allocation9 + $0x2c0] ss:$12 sps:$4 sm:$0xff]  }
 0xec2   :  { %4417 = vtanh.f32 %v2791_v56  ;;  %v4499_v56 = vld [vmem:[#allocation9 + $0x2d4] ss:$12 sps:$4 sm:$0xff]  }
 0xec3   :  { %4419 = vrcp.f32 %v2784_v50  ;;  %v4500_v50 = vld [vmem:[#allocation9 + $0x2d0] ss:$12 sps:$4 sm:$0xff]  }
 0xecc   :  { %v4418_v38 = vpop.eup %4417 }
 0xecd   :  { %v2793_v61 = vsub.f32 %v5577_v11, %v4418_v38  ;;  %v4420_v46 = vpop.eup %4419 }
 0xecf   :  { %v2794_v42 = vmul.f32 %v4420_v46, %v2793_v61  ;;  %v4502_v61 = vld [vmem:[#allocation9 + $0x2ec] ss:$12 sps:$4 sm:$0xff]   ;;  %v4503_v46 = vld [vmem:[#allocation9 + $0x2e8] ss:$12 sps:$4 sm:$0xff]  }
 0xed1   :  { %v5624_v45 = vadd.f32 %v4418_v38, %v2794_v42  ;;  %v4501_v38 = vld [vmem:[#allocation9 + $0x2d8] ss:$12 sps:$4 sm:$0xff]   ;;  %v4504_v42 = vld [vmem:[#allocation9 + $0x2f0] ss:$12 sps:$4 sm:$0xff]  }
 0xed3   :  { %v2800_v43 = vpack.c.bf16 %v5624_v45, %v5624_v45 }
 0xed5   :  { %2834 = vmatmul.mubr.bf16.vlgmr.msra.gmra.mrb[88].mxu0 %v2800_v43  ;;  %4047 = vmatmul.mubr.bf16.vlgmr.msra.gmra.mrb[76].mxu1 %v2800_v43  ;;  %v5793_v43 = vld [vmem:[#allocation21_spill] sm:$0xff] }
 0xed6   :  { %2909 = vmatpush1.bf16.msra.mxu0 %v5256_v25  ;;  %4051 = vmatpush3.bf16.msra.mxu1 %v5242_v19  ;;  %v2031_v19 = vadd.f32 %v5398_v9, %v5416_v32 }
 0xed7   :  { %2910 = vmatprep.subr.bf16.mxu0 %v5259_v30  ;;  %4052 = vmatprep.subr.bf16.mxu1 %v5776_v7 }
 0xed8   :  { %2940 = vmatprep.mubr.bf16.mxu0 %v5777_v17  ;;  %4066 = vmatprep.mubr.msk.bf16.mxu1 %vm4634_vm0, %v5776_v7 }
 0xeda   :  { %2911 = vmatpush1.bf16.msra.mxu0 %v5265_v16  ;;  %4053 = vmatpush3.bf16.msra.mxu1 %v5245_v54  ;;  %v2033_v54 = vadd.f32 %v5402_v33, %v5422_v4 }
 0xedb   :  { %2912 = vmatprep.subr.bf16.mxu0 %v5271_v28  ;;  %4054 = vmatprep.subr.bf16.mxu1 %v5776_v7 }
 0xede   :  { %2913 = vmatpush1.bf16.msra.mxu0 %v5273_v23  ;;  %4055 = vmatpush3.bf16.msra.mxu1 %v5249_v6 }
 0xedf   :  { %2914 = vmatprep.subr.bf16.mxu0 %v5281_v62  ;;  %4056 = vmatprep.subr.bf16.mxu1 %v5776_v7 }
 0xee2   :  { %2915 = vmatpush1.bf16.msra.mxu0 %v5283_v63  ;;  %4057 = vmatpush3.bf16.msra.mxu1 %v5267_v31 }
 0xee3   :  { %2916 = vmatprep.subr.bf16.mxu0 %v5291_v0  ;;  %4058 = vmatprep.subr.bf16.mxu1 %v5776_v7 }
 0xee6   :  { %2917 = vmatpush1.bf16.msra.mxu0 %v5293_v58  ;;  %4059 = vmatpush3.bf16.msra.mxu1 %v5277_v35 }
 0xee7   :  { %2918 = vmatprep.subr.bf16.mxu0 %v5300_v24  ;;  %4060 = vmatprep.subr.bf16.mxu1 %v5776_v7 }
 0xeea   :  { %2919 = vmatpush1.bf16.msra.mxu0 %v5302_v1  ;;  %4061 = vmatpush3.bf16.msra.mxu1 %v5287_v8 }
 0xeeb   :  { %2920 = vmatprep.subr.bf16.mxu0 %v5311_v14  ;;  %4062 = vmatprep.subr.bf16.mxu1 %v5776_v7 }
 0xeee   :  { %2921 = vmatpush1.bf16.msra.mxu0 %v5313_v36  ;;  %4063 = vmatpush3.bf16.msra.mxu1 %v5297_v60 }
 0xeef   :  { %2922 = vmatprep.subr.bf16.mxu0 %v5318_v3  ;;  %4064 = vmatprep.subr.bf16.mxu1 %v5776_v7 }
 0xef2   :  { %2923 = vmatpush1.bf16.msra.mxu0 %v5320_v18  ;;  %4065 = vmatpush3.bf16.msra.mxu1 %v5305_v2  ;;  %v2099_v2 = vadd.f32 %v5406_v34, %v5430_v22  ;;  %v4483_v34 = vld [vmem:[#allocation9 + $0x248] ss:$12 sps:$4 sm:$0xff]  }
 0xef3   :  { %3015 = vmatprep.subr.bf16.mxu0 %v5254_v29  ;;  %4070 = vmatprep.subr.bf16.mxu1 %v5776_v7 }
 0xfa8   :  { %v2835_v6 = vpop.f32.mrb[88].mxu0  ;;  %v2876_v25 = vpop.f32.mrb[76].mxu1 }
 0xfa9   :  { %v2882_v30 = vadd.f32 %v2835_v6, %v2031_v19  ;;  %v2837_v16 = vpop.f32.mrb[89].mxu0  ;;  %v4048_v31 = vpop.f32.mrb[77].mxu1  ;;  %v2896_v24 = vadd.f32 %v2876_v25, %v5426_v44  ;;  %v2037_v19 = vadd.f32 %v5793_v43, %v5416_v32 }
 0xfaa   :  { %v2883_v28 = vadd.f32 %v2837_v16, %v2033_v54  ;;  %v2839_v23 = vpop.f32.mrb[90].mxu0  ;;  %v2879_v35 = vpop.f32.mrb[78].mxu1  ;;  %v5794_v54 = vld [vmem:[#allocation25_spill] sm:$0xff] }
 0xfab   :  { %v3465_v62 = vmul.f32 -1.442695, %v2882_v30  ;;  %v2840_v63 = vpop.f32.mrb[91].mxu0  ;;  %v4049_v8 = vpop.f32.mrb[79].mxu1  ;;  %v2039_v6 = vadd.f32 %v5794_v54, %v5422_v4 }
 0xfac   :  { %v3466_v29 = vmul.f32 -1.442695, %v2883_v28 }
 0xfad   :  { %4421 = vpow2.f32 %v3465_v62 }
 0xfae   :  { %4423 = vpow2.f32 %v3466_v29 }
 0xfb7   :  { %v4422_v0 = vpop.eup %4421 }
 0xfb8   :  { %v2890_v58 = vadd.f32 1.0, %v4422_v0  ;;  %v4424_v60 = vpop.eup %4423 }
 0xfb9   :  { %v2891_v3 = vadd.f32 1.0, %v4424_v60 }
 0xfba   :  { %4425 = vrcp.f32 %v2890_v58 }
 0xfc4   :  { %v4426_v1 = vpop.eup %4425 }
 0xfc5   :  { %v2897_v14 = vmul.f32 %v4426_v1, %v2896_v24 }
 0xfc7   :  { %v2898_v36 = vadd.f32 %v2897_v14, %v2099_v2  ;;  %v5795_v14 = vld [vmem:[#allocation23_spill] sm:$0xff] }
 0xfc9   :  { %4427 = vtanh.f32 %v2898_v36  ;;  %v2104_v36 = vadd.f32 %v5795_v14, %v5430_v22 }
 0xfca   :  { %4429 = vrcp.f32 %v2891_v3 }
 0xfd3   :  { %v4428_v18 = vpop.eup %4427 }
 0xfd4   :  { %v2900_v9 = vsub.f32 %v5624_v45, %v4428_v18  ;;  %v4430_v21 = vpop.eup %4429 }
 0xfd6   :  { %v2901_v33 = vmul.f32 %v4430_v21, %v2900_v9 }
 0xfd8   :  { %v5671_v47 = vadd.f32 %v4428_v18, %v2901_v33 }
 0xfda   :  { %v2907_v26 = vpack.c.bf16 %v5671_v47, %v5671_v47 }
 0xfdc   :  { %2941 = vmatmul.mubr.bf16.vlgmr.msra.gmra.mrb[92].mxu0 %v2907_v26  ;;  %4067 = vmatmul.mubr.bf16.vlgmr.msra.gmra.mrb[80].mxu1 %v2907_v26 }
 0xfdd   :  { %3016 = vmatpush1.bf16.msra.mxu0 %v4482_v20  ;;  %4071 = vmatpush3.bf16.msra.mxu1 %v4483_v34 }
 0xfde   :  { %3017 = vmatprep.subr.bf16.mxu0 %v4484_v59  ;;  %4072 = vmatprep.subr.bf16.mxu1 %v5776_v7 }
 0xfdf   :  { %3047 = vmatprep.mubr.bf16.mxu0 %v5777_v17  ;;  %4086 = vmatprep.mubr.msk.bf16.mxu1 %vm4634_vm0, %v5776_v7  ;;  %v4491_v17 = vld [vmem:[#allocation9 + $0x288] ss:$12 sps:$4 sm:$0xff]  }
 0xfe1   :  { %3018 = vmatpush1.bf16.msra.mxu0 %v4485_v37  ;;  %4073 = vmatpush3.bf16.msra.mxu1 %v4486_v15  ;;  %v4283_v37 = vld [vmem:[#allocation9 + $0x308] ss:$12 sps:$4 sm:$0xff]   ;;  %v4284_v15 = vld [vmem:[#allocation9 + $0x320] ss:$12 sps:$4 sm:$0xff]  }
 0xfe2   :  { %3019 = vmatprep.subr.bf16.mxu0 %v4487_v53  ;;  %4074 = vmatprep.subr.bf16.mxu1 %v5776_v7  ;;  %v4285_v53 = vld [vmem:[#allocation9 + $0x338] ss:$12 sps:$4 sm:$0xff]  }
 0xfe5   :  { %3020 = vmatpush1.bf16.msra.mxu0 %v4488_v27  ;;  %4075 = vmatpush3.bf16.msra.mxu1 %v4489_v5  ;;  %v4286_v27 = vld [vmem:[#allocation9 + $0x350] ss:$12 sps:$4 sm:$0xff]   ;;  %v4287_v5 = vld [vmem:[#allocation9 + $0x368] ss:$12 sps:$4 sm:$0xff]  }
 0xfe6   :  { %3021 = vmatprep.subr.bf16.mxu0 %v4490_v55  ;;  %4076 = vmatprep.subr.bf16.mxu1 %v5776_v7  ;;  %v4288_v55 = vld [vmem:[#allocation9 + $0x380] ss:$12 sps:$4 sm:$0xff]  }
 0xfe9   :  { %3022 = vmatpush1.bf16.msra.mxu0 %v4491_v17  ;;  %4077 = vmatpush3.bf16.msra.mxu1 %v4492_v41  ;;  %v4289_v17 = vld [vmem:[#allocation9 + $0x398] ss:$12 sps:$4 sm:$0xff]   ;;  %v4290_v41 = vld [vmem:[#allocation9 + $0x3b0] ss:$12 sps:$4 sm:$0xff]  }
 0xfea   :  { %3023 = vmatprep.subr.bf16.mxu0 %v4493_v57  ;;  %4078 = vmatprep.subr.bf16.mxu1 %v5776_v7  ;;  %v5707_v57 = vld [vmem:[#allocation7] sm:$0xff] }
 0xfed   :  { %3024 = vmatpush1.bf16.msra.mxu0 %v4494_v49  ;;  %4079 = vmatpush3.bf16.msra.mxu1 %v4495_v52  ;;  %v3222_v49 = vmul.f32 %v5707_v57, %v5707_v57  ;;  %v5796_v52 = vld [vmem:[#allocation22_spill] sm:$0xff] }
 0xfee   :  { %3025 = vmatprep.subr.bf16.mxu0 %v4496_v12  ;;  %4080 = vmatprep.subr.bf16.mxu1 %v5776_v7  ;;  %v2041_v12 = vadd.f32 %v5796_v52, %v5416_v32 }
 0xfef   :  { %3257 = vadd.xlane.f32.xlu0 %v3222_v49 }
 0xff1   :  { %3026 = vmatpush1.bf16.msra.mxu0 %v4497_v51  ;;  %4081 = vmatpush3.bf16.msra.mxu1 %v4498_v40  ;;  %v5797_v51 = vld [vmem:[#allocation20_spill] sm:$0xff] }
 0xff2   :  { %3027 = vmatprep.subr.bf16.mxu0 %v4499_v56  ;;  %4082 = vmatprep.subr.bf16.mxu1 %v5776_v7  ;;  %v2043_v40 = vadd.f32 %v5797_v51, %v5422_v4 }
 0xff5   :  { %3028 = vmatpush1.bf16.msra.mxu0 %v4500_v50  ;;  %4083 = vmatpush3.bf16.msra.mxu1 %v4501_v38 }
 0xff6   :  { %3029 = vmatprep.subr.bf16.mxu0 %v4502_v61  ;;  %4084 = vmatprep.subr.bf16.mxu1 %v5776_v7 }
 0xff9   :  { %3030 = vmatpush1.bf16.msra.mxu0 %v4503_v46  ;;  %4085 = vmatpush3.bf16.msra.mxu1 %v4504_v42 }
 0xffa   :  { %4090 = vmatprep.subr.bf16.mxu0 %v5776_v7 }
0x10af   :  { %v2942_v25 = vpop.f32.mrb[92].mxu0  ;;  %v2983_v30 = vpop.f32.mrb[80].mxu1 }
0x10b0   :  { %v2989_v16 = vadd.f32 %v2942_v25, %v2037_v19  ;;  %v2944_v31 = vpop.f32.mrb[93].mxu0  ;;  %v4068_v28 = vpop.f32.mrb[81].mxu1  ;;  %v3003_v1 = vadd.f32 %v2983_v30, %v5426_v44 }
0x10b1   :  { %v2990_v23 = vadd.f32 %v2944_v31, %v2039_v6  ;;  %v2946_v35 = vpop.f32.mrb[94].mxu0  ;;  %v2986_v62 = vpop.f32.mrb[82].mxu1 }
0x10b2   :  { %v3467_v63 = vmul.f32 -1.442695, %v2989_v16  ;;  %v2947_v8 = vpop.f32.mrb[95].mxu0  ;;  %v4069_v29 = vpop.f32.mrb[83].mxu1 }
0x10b3   :  { %v3468_v0 = vmul.f32 -1.442695, %v2990_v23  ;;  %v5798_v23 = vld [vmem:[#allocation24_spill] sm:$0xff]  ;;  %v2475_v29 = vadd.f32 %v5483_v48, %v5436_v39  ;;  %v3216_v39 = vrot.slane %v5707_v57, 4  ;;  %v3223_v48 = vrot.slane %v3222_v49, 4 }
0x10b4   :  { %4431 = vpow2.f32 %v3467_v63  ;;  %v2107_v35 = vadd.f32 %v5798_v23, %v5430_v22 }
0x10b5   :  { %4433 = vpow2.f32 %v3468_v0  ;;  %v2582_v0 = vadd.f32 %v5530_v13, %v2475_v29  ;;  %v3217_v13 = vadd.f32 %v5707_v57, %v3216_v39 }
0x10be   :  { %v4432_v58 = vpop.eup %4431 }
0x10bf   :  { %v2997_v60 = vadd.f32 1.0, %v4432_v58  ;;  %v4434_v24 = vpop.eup %4433  ;;  %v2689_v58 = vadd.f32 %v5577_v11, %v2582_v0  ;;  %v3224_v11 = vadd.f32 %v3223_v48, %v3222_v49 }
0x10c0   :  { %v2998_v9 = vadd.f32 1.0, %v4434_v24 }
0x10c1   :  { %4435 = vrcp.f32 %v2997_v60  ;;  %v2796_v24 = vadd.f32 %v5624_v45, %v2689_v58  ;;  %v3218_v45 = vrot.slane %v3217_v13, 2 }
0x10c3   :  { %v2903_v22 = vadd.f32 %v5671_v47, %v2796_v24 }
0x10cb   :  { %v4436_v2 = vpop.eup %4435 }
0x10cc   :  { %v3004_v3 = vmul.f32 %v4436_v2, %v3003_v1 }
0x10ce   :  { %v3005_v18 = vadd.f32 %v3004_v3, %v2104_v36 }
0x10d0   :  { %4437 = vtanh.f32 %v3005_v18 }
0x10d1   :  { %4439 = vrcp.f32 %v2998_v9 }
0x10da   :  { %v4438_v21 = vpop.eup %4437 }
0x10db   :  { %v3007_v33 = vsub.f32 %v5671_v47, %v4438_v21  ;;  %v4440_v26 = vpop.eup %4439 }
0x10dd   :  { %v3008_v20 = vmul.f32 %v4440_v26, %v3007_v33  ;;  %v3219_v33 = vadd.f32 %v3218_v45, %v3217_v13 }
0x10df   :  { %v5694_v34 = vadd.f32 %v4438_v21, %v3008_v20  ;;  %v3225_v21 = vrot.slane %v3224_v11, 2  ;;  %v245_v20 = vld [vmem:[#allocation10 + $0xb] ss:$0 sm:$0xff] }
0x10e1   :  { %v3014_v59 = vpack.c.bf16 %v5694_v34, %v5694_v34  ;;  %v3010_v14 = vadd.f32 %v5694_v34, %v2903_v22  ;;  %v3226_v26 = vadd.f32 %v3225_v21, %v3224_v11 }
0x10e3   :  { %3048 = vmatmul.mubr.bf16.vlgmr.msra.gmra.mrb[96].mxu0 %v3014_v59  ;;  %4087 = vmatmul.mubr.bf16.vlgmr.msra.gmra.mrb[84].mxu1 %v3014_v59  ;;  %v3220_v59 = vrot.slane %v3219_v33, 1 }
0x10e4   :  { %4106 = vmatprep.mubr.msk.bf16.mxu0 %vm4634_vm0, %v5776_v7  ;;  %4091 = vmatpush3.bf16.msra.mxu0 %v4283_v37 }
0x10e5   :  { %4092 = vmatprep.subr.bf16.mxu0 %v5776_v7 }
0x10e8   :  { %4093 = vmatpush3.bf16.msra.mxu0 %v4284_v15  ;;  %v3227_v15 = vrot.slane %v3226_v26, 1 }
0x10e9   :  { %4094 = vmatprep.subr.bf16.mxu0 %v5776_v7 }
0x10ec   :  { %4095 = vmatpush3.bf16.msra.mxu0 %v4285_v53 }
0x10ed   :  { %4096 = vmatprep.subr.bf16.mxu0 %v5776_v7 }
0x10f0   :  { %4097 = vmatpush3.bf16.msra.mxu0 %v4286_v27 }
0x10f1   :  { %4098 = vmatprep.subr.bf16.mxu0 %v5776_v7 }
0x10f4   :  { %4099 = vmatpush3.bf16.msra.mxu0 %v4287_v5 }
0x10f5   :  { %4100 = vmatprep.subr.bf16.mxu0 %v5776_v7 }
0x10f8   :  { %4101 = vmatpush3.bf16.msra.mxu0 %v4288_v55  ;;  %v3221_v55 = vadd.f32 %v3220_v59, %v3219_v33 }
0x10f9   :  { %4102 = vmatprep.subr.bf16.mxu0 %v5776_v7 }
0x10fc   :  { %4103 = vmatpush3.bf16.msra.mxu0 %v4289_v17 }
0x10fd   :  { %4104 = vmatprep.subr.bf16.mxu0 %v5776_v7 }
0x1100   :  { %4105 = vmatpush3.bf16.msra.mxu0 %v4290_v41  ;;  %v3228_v41 = vadd.f32 %v3227_v15, %v3226_v26 }
0x11b6   :  { %v3049_v56 = vpop.f32.mrb[96].mxu0  ;;  %v3090_v50 = vpop.f32.mrb[84].mxu1 }
0x11b7   :  { %v3096_v38 = vadd.f32 %v3049_v56, %v2041_v12  ;;  %v3051_v61 = vpop.f32.mrb[97].mxu0  ;;  %v4088_v46 = vpop.f32.mrb[85].mxu1  ;;  %v3110_v4 = vadd.f32 %v3090_v50, %v5426_v44 }
0x11b8   :  { %v3097_v42 = vadd.f32 %v3051_v61, %v2043_v40  ;;  %v3053_v43 = vpop.f32.mrb[98].mxu0  ;;  %v3093_v19 = vpop.f32.mrb[86].mxu1 }
0x11b9   :  { %v3469_v54 = vmul.f32 -1.442695, %v3096_v38  ;;  %v3054_v6 = vpop.f32.mrb[99].mxu0  ;;  %v4089_v25 = vpop.f32.mrb[87].mxu1 }
0x11ba   :  { %v3470_v30 = vmul.f32 -1.442695, %v3097_v42  ;;  %v3479_v42 = vsel %vm3213_vm11, 1.0, %v5776_v7  ;;  %v3258_v6 = vpop.xlane.xlu0 %3257 }
0x11bb   :  { %4441 = vpow2.f32 %v3469_v54  ;;  %v3259_v25 = vmax.f32 %v3258_v6, 1e-24 }
0x11bc   :  { %4443 = vpow2.f32 %v3470_v30 }
0x11c5   :  { %v4442_v16 = vpop.eup %4441 }
0x11c6   :  { %v3104_v31 = vadd.f32 1.0, %v4442_v16  ;;  %v4444_v32 = vpop.eup %4443 }
0x11c7   :  { %v3105_v8 = vadd.f32 1.0, %v4444_v32 }
0x11c8   :  { %4445 = vrcp.f32 %v3104_v31 }
0x11d2   :  { %v4446_v28 = vpop.eup %4445 }
0x11d3   :  { %v3111_v62 = vmul.f32 %v4446_v28, %v3110_v4 }
0x11d5   :  { %v3112_v63 = vadd.f32 %v3111_v62, %v2107_v35 }
0x11d7   :  { %4447 = vtanh.f32 %v3112_v63 }
0x11d8   :  { %4449 = vrcp.f32 %v3105_v8 }
0x11e1   :  { %v4448_v60 = vpop.eup %4447 }
0x11e2   :  { %v3114_v44 = vsub.f32 %v5694_v34, %v4448_v60  ;;  %v4450_v1 = vpop.eup %4449 }
0x11e4   :  { %v3115_v2 = vmul.f32 %v4450_v1, %v3114_v44 }
0x11e6   :  { %v3116_v36 = vadd.f32 %v4448_v60, %v3115_v2 }
0x11e8   :  { %v3117_v3 = vadd.f32 %v3116_v36, %v3010_v14 }
0x11ea   :  { %v3118_v18 = vmul.f32 0.125, %v3117_v3 }
0x11ec   :  { %v3119_v9 = vpack.c.bf16 %v3118_v18, %v3118_v18 }
0x11ee   :  { %4107 = vmatmul.mubr.bf16.vlgmr.msra.gmra.mrb[100].mxu0 %v3119_v9 }
0x12c1   :  { %v3202_v47 = vpop.f32.mrb[100].mxu0 }
0x12c2   :  { %v3203_v37 = vadd.f32 %v3202_v47, %v245_v20  ;;  %v4108_v34 = vpop.f32.mrb[101].mxu0 }
0x12c3   :  { %v3205_v53 = vpop.f32.mrb[102].mxu0 }
0x12c4   :  { %vm3208_vm10 = vcmp.gt.f32.partialorder %v3203_v37, 0.0  ;;  %v3209_v27 = vmul.f32 0.2, %v3203_v37  ;;  %v4109_v5 = vpop.f32.mrb[103].mxu0 }
0x12c6   :  { %v3210_v17 = vsel %vm3208_vm10, %v3203_v37, %v3209_v27 }
0x12c7   :  { %v3266_v52 = vmul.f32 %v5707_v57, %v3210_v17  ;;  %v3229_v49 = vmul.f32 2.0, %v3210_v17  ;;  %v3261_v12 = vmul.f32 %v3210_v17, %v3210_v17 }
0x12c9   :  { %3267 = vadd.xlane.f32.xlu1 %v3266_v52  ;;  %v3230_v51 = vmul.f32 %v3229_v49, %v3221_v55  ;;  %3262 = vadd.xlane.f32.xlu0 %v3261_v12  ;;  %v3232_v56 = vmul.f32 %v3229_v49, %v3210_v17 }
0x12cb   :  { %v3231_v40 = vsub.f32 %v3228_v41, %v3230_v51 }
0x12cd   :  { %v3233_v50 = vadd.f32 %v3232_v56, %v3231_v40 }
0x12cf   :  { %v3234_v38 = vmax.f32 %v3233_v50, 0.0 }
0x12d1   :  { %4451 = vrsqrt.f32 %v3234_v38  ;;  %vm3237_vm12 = vcmp.eq.f32.partialorder %v3234_v38, inf  ;;  %v3240_v43 = vand.u32 2147483648, %v3234_v38  ;;  %vm3239_vm13 = vcmp.eq.f32.partialorder %v3234_v38, 0.0 }
0x12d2   :  { %4453 = vrsqrt.f32 %v3259_v25 }
0x12db   :  { %v4452_v61 = vpop.eup %4451 }
0x12dc   :  { %v3236_v46 = vmul.f32 %v4452_v61, %v3234_v38  ;;  %v4454_v31 = vpop.eup %4453 }
0x12de   :  { %v3238_v19 = vsel %vm3237_vm12, %v3234_v38, %v3236_v46 }
0x12df   :  { %v3241_v57 = vsel %vm3239_vm13, %v3240_v43, %v3238_v19 }
0x12e0   :  { %v3242_v54 = vmul.f32 %v3479_v42, %v3241_v57 }
0x12e2   :  { %3243 = vadd.xlane.f32.xlu1 %v3242_v54 }
0x1356   :  { %v3263_v30 = vpop.xlane.xlu0 %3262  ;;  %v3268_v32 = vpop.xlane.xlu1 %3267 }
0x1357   :  { %v3264_v16 = vmax.f32 %v3263_v30, 1e-24  ;;  %v3269_v10 = vmul.f32 %v4454_v31, %v3268_v32 }
0x1359   :  { %4455 = vrsqrt.f32 %v3264_v16 }
0x1363   :  { %v4456_v4 = vpop.eup %4455 }
0x1364   :  { %v3270_v28 = vmul.f32 %v4456_v4, %v3269_v10 }
0x1366   :  { %v3271_v7 = vmul.f32 %v3479_v42, %v3270_v28 }
0x1368   :  { %v3273_v23 = vsel %vm3272_vm14, %v3271_v7, 0.0 }
0x1369   :  { %3274 = vadd.xlane.f32.xlu0 %v3273_v23 }
0x136f   :  { %v3244_v35 = vpop.xlane.xlu1 %3243 }
0x1370   :  { %v3245_v62 = vrot.slane %v3244_v35, 4 }
0x1372   :  { %v3246_v63 = vadd.f32 %v3245_v62, %v3244_v35 }
0x1374   :  { %v3247_v8 = vrot.slane %v3246_v63, 2 }
0x1376   :  { %v3248_v29 = vadd.f32 %v3247_v8, %v3246_v63 }
0x1378   :  { %v3249_v0 = vrot.slane %v3248_v29, 1 }
0x137a   :  { %v3250_v58 = vadd.f32 %v3249_v0, %v3248_v29 }
0x137c   :  { %4110 = vpush %v3250_v58 }
0x13ad   :  { %s4111_s3 = spop %4110 }
0x13ae   :  { %s3254_s16 = smul.f32 0.015625, %s4111_s3 }
0x13b0   :  { %3256 = sst [smem:[#allocation12]] %s3254_s16 }
0x13b1   :  { %4603 = shalt.err (!%p4600_p6)
}
0x13b2   :  { %s4635_s25 = smov [#allocation12]   ;;  %s4604_s30 = scalar_lea.hbm %s5760_s5, 16 }
0x13b3   :  { %3295 = dma.smem_to_hbm %s4635_s25, 16, %s5759_s4, [#allocation6]  }
0x13b4   :  { %p4605_p7 = scmp.ne.s32.totalorder %s5760_s5, %s4604_s30  ;;  %p4608_p8 = scmp.lt.u32.totalorder %s4604_s30, %s5760_s5 }
0x13b6   :  { %p4610_p9 = pnand %p4608_p8, %p4605_p7 }
0x13f6   :  { %v3275_v60 = vpop.xlane.xlu0 %3274 }
0x13f7   :  { %v3276_v24 = vrot.slane %v3275_v60, 4 }
0x13f9   :  { %v3277_v44 = vadd.f32 %v3276_v24, %v3275_v60 }
0x13fb   :  { %v3278_v1 = vrot.slane %v3277_v44, 2 }
0x13fd   :  { %v3279_v22 = vadd.f32 %v3278_v1, %v3277_v44 }
0x13ff   :  { %v3280_v2 = vrot.slane %v3279_v22, 1 }
0x1401   :  { %v3281_v14 = vadd.f32 %v3280_v2, %v3279_v22 }
0x1403   :  { %4112 = vpush %v3281_v14 }
0x1434   :  { %s4113_s28 = spop %4112 }
0x1435   :  { %s3285_s0 = smul.f32 0.5, %s4113_s28 }
0x1437   :  { %3287 = sst [smem:[#allocation13]] %s3285_s0 }
0x1438   :  { %4613 = shalt.err (!%p4610_p9)
}
0x1439   :  { %s4636_s9 = smov [#allocation13]  }
0x143a   :  { %3303 = dma.smem_to_hbm %s4636_s9, 16, %s5760_s5, [#allocation14]  }
0x143b   :  { %4620 = dma.done.wait [#allocation6], 16  }
0x143c   :  { %4621 = vsyncadd [#allocation6], 4294967280 }
0x143d   :  { %4622 = dma.done.wait [#allocation14], 16  }
0x143e   :  { %4623 = vsyncadd [#allocation14], 4294967280 }
0x143f   :  { %3310 = sfence }
0x1440   :  { %3311 = vsyncpa [#allocation5], 1 }
0x1441   :  { %3312 = vsyncpa [#allocation8], 1 }
0x1442   :  { %3313 = vsyncpa [#allocation11], 1 }
0x1443   :  { %3314 = vsyncpa [#allocation6], 1 }
0x1444   :  { %3315 = vsyncpa [#allocation14], 1 }

</bundles_post_ra>
